<compile_context>
chip_gen: v6e
topology: v6e:2x2x1
jax: 0.10.0
libtpu: 0.0.40
codegen_flags: <defaults>
</compile_context>

<pallas_src>
import math

import numpy as np
import jax
import jax.numpy as jnp
from jax.experimental import pallas as pl
from jax.experimental.pallas import tpu as pltpu

# -------------------- module-consistent config --------------------
CONFIG = dict(
    LATENT_DIMS=32,      # embed_dim
    TIME_STEPS_OUT=2,    # forecast_steps
    PATCH_SIZE=(4, 4),
    TIME_STEPS_IN=2,     # in_dims = TIME_STEPS_IN + 2
    NUM_BLOCKS=4,
    MLP_RATIO=4,
    DEPTH=2,
    DROP_RATE=0.0,
)
IMG_SIZE = (16, 16)
SPARSITY_THRESHOLD = 0.01
HARD_THRESHOLDING_FRACTION = 1.0   # ==1 and square patch grid -> all modes kept

_SQRT_HALF = 1.0 / math.sqrt(2.0)


# -------------------- in-kernel math helpers --------------------
def _erf(x):
    # TODO(synk): exact lax.erf lowering in Mosaic is not guaranteed; use the
    # Abramowitz-Stegun 7.1.26 polynomial (abs err ~1.5e-7) built from exp/mul.
    a1, a2, a3, a4, a5 = (0.254829592, -0.284496736, 1.421413741,
                          -1.453152027, 1.061405429)
    p = 0.3275911
    ax = jnp.abs(x)
    t = 1.0 / (1.0 + p * ax)
    poly = ((((a5 * t + a4) * t + a3) * t + a2) * t + a1) * t
    y = 1.0 - poly * jnp.exp(-ax * ax)
    return jnp.where(x >= 0, y, -y)


def _gelu(x):
    # erf-based GELU, matching torch.nn.GELU() / F.gelu default
    return 0.5 * x * (1.0 + _erf(x * _SQRT_HALF))


def _softshrink(x, lam):
    return jnp.where(x > lam, x - lam,
                     jnp.where(x < -lam, x + lam, jnp.zeros_like(x)))


def _vmem():
    return pl.BlockSpec(memory_space=pltpu.MemorySpace.VMEM)


def _dotf(a, b):
    return jnp.dot(a, b, preferred_element_type=jnp.float32)


# -------------------- fused whole-forward Pallas kernel --------------------
def _afno_forward_kernel(patches_ref, wproj_ref, projb_ref, pos_ref,
                         fr_ref, fi_ref, ir_ref, ii_ref,
                         w1a_ref, w1b_ref, b1_ref, w2c_ref, b2c_ref,
                         mw1_ref, mb1_ref, mw2_ref, mb2_ref,
                         hw1_ref, hb1_ref, hw2_ref, hb2_ref,
                         o_ref, *, depth, f_steps, lam):
    # ---- patch embed: projection (strided conv == matmul) + bias + pos emb ----
    x = (_dotf(patches_ref[...], wproj_ref[...])
         + projb_ref[...] + pos_ref[...])                          # (Ntok, C)
    c = x.shape[1]

    fr = fr_ref[...]
    fi = fi_ref[...]
    ir = ir_ref[...]
    ii = ii_ref[...]

    latents = []
    for _ in range(f_steps):
        for d in range(depth):
            # ---- SpectralConvBlockDiag (fused, all modes kept) ----
            # forward 2-D real FFT (ortho) over the patch grid == row-mix matmuls
            xr = _dotf(fr, x)                                      # (Nm, C)
            xi = _dotf(fi, x)                                      # (Nm, C)

            # layer 1: complex block-diag matmul collapsed to 2 dense real matmuls
            h1 = _gelu(_dotf(xr, w1a_ref[d]) + _dotf(xi, w1b_ref[d])
                       + b1_ref[d])                                # (Nm, 2C)

            # layer 2 (real|imag fused into one matmul) + softshrink on 64 lanes
            o2 = _softshrink(_dotf(h1, w2c_ref[d]) + b2c_ref[d], lam)  # (Nm, 2C)
            o_re = o2[:, :c]
            o_im = o2[:, c:]

            # inverse 2-D real FFT (ortho) + "+ bias" residual of the fno block
            xres = _dotf(ir, o_re) + _dotf(ii, o_im) + x           # (Ntok, C)

            # ---- channel-mixer MLP: fc1 -> GELU -> fc2 ----
            h = _gelu(_dotf(xres, mw1_ref[d]) + mb1_ref[d])
            x = _dotf(h, mw2_ref[d]) + mb2_ref[d]
        latents.append(x)

    # ---- head MLP over all forecast steps (zero-padded per-step weights ->
    #      no in-kernel concat, lane-dense output slab) + sigmoid ----
    acc = hb1_ref[...]
    for f in range(f_steps):
        acc = acc + _dotf(latents[f], hw1_ref[f])                  # (Ntok, F*2C)
    h = _gelu(acc)
    y = _dotf(h, hw2_ref[...]) + hb2_ref[...]                      # (Ntok, F*P)
    o_ref[...] = (jnp.exp(-y) + 1.0
                  ).astype(jnp.float32)
    o_ref[...] = pl.reciprocal(o_ref[...], approx=True).astype(o_ref.dtype)


# -------------------- host-side constant / weight packing (done ONCE) --------------------
def _dft_mats_np(batch, hh, ww):
    """Exact real matrices for ortho rfft2 / irfft2 over an (hh, ww) grid,
    block-diagonal over batch, built by probing np.fft with basis vectors."""
    wf = ww // 2 + 1
    hw = hh * ww
    nm = hh * wf
    eye_sp = np.eye(hw, dtype=np.float64).reshape(hw, hh, ww)
    fwd = np.fft.rfft2(eye_sp, axes=(1, 2), norm='ortho').reshape(hw, nm).T   # (nm, hw)
    eye_m = np.eye(nm, dtype=np.float64).reshape(nm, hh, wf)
    inv_r = np.fft.irfft2(eye_m.astype(np.complex128), s=(hh, ww),
                          axes=(1, 2), norm='ortho').reshape(nm, hw).T        # (hw, nm)
    inv_i = np.fft.irfft2(1j * eye_m, s=(hh, ww),
                          axes=(1, 2), norm='ortho').reshape(nm, hw).T        # (hw, nm)
    # sanity: irfft2(rfft2(x)) == x
    assert np.allclose(inv_r @ fwd.real + inv_i @ fwd.imag, np.eye(hw), atol=1e-10)

    def bd(m):
        # TODO(synk): kron(eye(B)) is O(B^2) zeros; fine at B=2, revisit if batch grows.
        return np.kron(np.eye(batch), m).astype(np.float32)

    return dict(fr=bd(fwd.real), fi=bd(fwd.imag), ir=bd(inv_r), ii=bd(inv_i))


def _blockdiag_np(w):  # (nb, bs, bso) -> dense zero-padded (nb*bs, nb*bso)
    nb, bs, bso = w.shape
    out = np.zeros((nb * bs, nb * bso), dtype=np.float32)
    for i in range(nb):
        out[i * bs:(i + 1) * bs, i * bso:(i + 1) * bso] = w[i]
    return out


def _pack_block_weights_np(bp):
    # collapse the per-block complex weights into dense real matrices
    w1 = np.asarray(bp['w1'], np.float32)
    b1 = np.asarray(bp['b1'], np.float32)
    w2 = np.asarray(bp['w2'], np.float32)
    b2 = np.asarray(bp['b2'], np.float32)
    w1r, w1i = _blockdiag_np(w1[0]), _blockdiag_np(w1[1])   # (C, C)
    w2r, w2i = _blockdiag_np(w2[0]), _blockdiag_np(w2[1])   # (C, C)
    b1c = np.concatenate([b1[0].reshape(-1), b1[1].reshape(-1)]).reshape(1, -1)
    # layer 2 real & imag outputs fused into one (2C, 2C) rhs (re lanes | im lanes)
    w2re = np.concatenate([w2r, -w2i], axis=0)              # (2C, C)
    w2im = np.concatenate([w2i, w2r], axis=0)               # (2C, C)
    return dict(
        w1a=np.concatenate([w1r, w1i], axis=1),             # multiplies xr: (C, 2C)
        w1b=np.concatenate([-w1i, w1r], axis=1),             # multiplies xi: (C, 2C)
        b1=b1c,                                              # (1, 2C)
        w2c=np.concatenate([w2re, w2im], axis=1),            # (2C, 2C)
        b2c=np.concatenate([b2[0].reshape(-1), b2[1].reshape(-1)]).reshape(1, -1),
        mw1=np.asarray(bp['mlp_w1'], np.float32),
        mb1=np.asarray(bp['mlp_b1'], np.float32).reshape(1, -1),
        mw2=np.asarray(bp['mlp_w2'], np.float32),
        mb2=np.asarray(bp['mlp_b2'], np.float32).reshape(1, -1),
    )


def _pack_head_np(params, f_steps):
    # per-forecast-step fc1 weights zero-padded into the step's lane block so the
    # kernel needs no concatenate; fc2 is block-diagonal over steps.
    w1 = np.asarray(params['head_w1'], np.float32)    # (E, M)
    b1 = np.asarray(params['head_b1'], np.float32)    # (M,)
    w2 = np.asarray(params['head_w2'], np.float32)    # (M, O)
    b2 = np.asarray(params['head_b2'], np.float32)    # (O,)
    e, m = w1.shape
    _, o = w2.shape
    hw1 = np.zeros((f_steps, e, f_steps * m), np.float32)
    hw2 = np.zeros((f_steps * m, f_steps * o), np.float32)
    for f in range(f_steps):
        hw1[f, :, f * m:(f + 1) * m] = w1
        hw2[f * m:(f + 1) * m, f * o:(f + 1) * o] = w2
    hb1 = np.tile(b1, (f_steps,)).reshape(1, -1)
    hb2 = np.tile(b2, (f_steps,)).reshape(1, -1)
    return hw1, hb1, hw2, hb2


# -------------------- parameters --------------------
def init_params(key, cfg, img_size):
    e = cfg['LATENT_DIMS']
    in_dims = cfg['TIME_STEPS_IN'] + 2
    p1, p2 = cfg['PATCH_SIZE']
    nb = cfg['NUM_BLOCKS']
    bs = e // nb
    mlp_ratio = cfg['MLP_RATIO']
    pcx, pcy = img_size[0] // p1, img_size[1] // p2

    def nrm(k, shape, scale=0.02):
        return scale * jax.random.normal(k, shape, dtype=jnp.float32)

    keys = jax.random.split(key, 3 + cfg['DEPTH'])
    params = {
        'proj_w': nrm(keys[0], (e, in_dims, p1, p2), 0.05),    # Conv2d weight (E,Cin,p1,p2)
        'proj_b': nrm(keys[1], (e,), 0.05),
        'pos_emb': jnp.zeros((1, pcx * pcy, e), jnp.float32),  # zeros, as in __init__
    }
    blocks = []
    for d in range(cfg['DEPTH']):
        bk = jax.random.split(keys[3 + d], 8)
        blocks.append(dict(
            w1=nrm(bk[0], (2, nb, bs, bs)),          # hidden_size_factor = 1
            b1=nrm(bk[1], (2, nb, bs)),
            w2=nrm(bk[2], (2, nb, bs, bs)),
            b2=nrm(bk[3], (2, nb, bs)),
            mlp_w1=nrm(bk[4], (e, e * mlp_ratio), 0.05),
            mlp_b1=nrm(bk[5], (e * mlp_ratio,), 0.05),
            mlp_w2=nrm(bk[6], (e * mlp_ratio, e), 0.05),
            mlp_b2=nrm(bk[7], (e,), 0.05),
        ))
    params['blocks'] = blocks
    hk = jax.random.split(keys[2], 4)
    params['head_w1'] = nrm(hk[0], (e, 2 * e), 0.05)
    params['head_b1'] = nrm(hk[1], (2 * e,), 0.05)
    params['head_w2'] = nrm(hk[2], (2 * e, p1 * p2 * 1), 0.05)   # out_dims = 1
    params['head_b2'] = nrm(hk[3], (p1 * p2 * 1,), 0.05)
    return params


# -------------------- forward factory (packs once, single fused pallas_call) --------------------
def make_afno_forward(cfg, img_size, batch, params):
    e = cfg['LATENT_DIMS']
    in_dims = cfg['TIME_STEPS_IN'] + 2
    p1, p2 = cfg['PATCH_SIZE']
    pcx, pcy = img_size[0] // p1, img_size[1] // p2
    f_steps = cfg['TIME_STEPS_OUT']
    depth = cfg['DEPTH']
    ntok = batch * pcx * pcy

    # all-modes-kept requires fraction==1 and a square patch grid
    assert HARD_THRESHOLDING_FRACTION == 1.0 and pcx == pcy

    # ---- one-time host-side packing (hoisted out of the jitted hot path) ----
    dft = _dft_mats_np(batch, pcx, pcy)

    packed_blocks = [_pack_block_weights_np(bp) for bp in params['blocks']]
    def stack(name):
        return jnp.asarray(np.stack([pb[name] for pb in packed_blocks], axis=0))
    w1a, w1b, b1 = stack('w1a'), stack('w1b'), stack('b1')
    w2c, b2c = stack('w2c'), stack('b2c')
    mw1, mb1, mw2, mb2 = stack('mw1'), stack('mb1'), stack('mw2'), stack('mb2')

    hw1_np, hb1_np, hw2_np, hb2_np = _pack_head_np(params, f_steps)
    hw1, hb1 = jnp.asarray(hw1_np), jnp.asarray(hb1_np)
    hw2, hb2 = jnp.asarray(hw2_np), jnp.asarray(hb2_np)

    wproj = jnp.asarray(
        np.asarray(params['proj_w'], np.float32).reshape(e, in_dims * p1 * p2).T)
    projb = jnp.asarray(np.asarray(params['proj_b'], np.float32).reshape(1, -1))
    pos = jnp.asarray(
        np.tile(np.asarray(params['pos_emb'], np.float32).reshape(pcx * pcy, e),
                (batch, 1)))
    fr, fi = jnp.asarray(dft['fr']), jnp.asarray(dft['fi'])
    ir, ii = jnp.asarray(dft['ir']), jnp.asarray(dft['ii'])

    out_cols = f_steps * p1 * p2
    fused = pl.pallas_call(
        lambda *refs: _afno_forward_kernel(*refs, depth=depth, f_steps=f_steps,
                                           lam=SPARSITY_THRESHOLD),
        out_shape=jax.ShapeDtypeStruct((ntok, out_cols), jnp.float32),
        in_specs=[_vmem()] * 21,
        out_specs=_vmem(),
    )

    @jax.jit
    def forward(x, grid):
        b = batch
        # concat + 'b h w c -> b c h w' + patchify (== strided-conv flattening)
        xin = jnp.concatenate([x, grid], axis=-1)                  # (B,H,W,in_dims)
        xc = jnp.transpose(xin, (0, 3, 1, 2))                      # (B,Cin,H,W)
        patches = xc.reshape(b, in_dims, pcx, p1, pcy, p2)
        patches = jnp.transpose(patches, (0, 2, 4, 1, 3, 5)).reshape(
            b * pcx * pcy, in_dims * p1 * p2)

        y = fused(patches, wproj, projb, pos,
                  fr, fi, ir, ii,
                  w1a, w1b, b1, w2c, b2c,
                  mw1, mb1, mw2, mb2,
                  hw1, hb1, hw2, hb2)                              # (B*P, F*p1*p2)

        # rows = (b, px, py), cols = (f, p1, p2)  ->  (B, H, W, F)
        y = y.reshape(b, pcx, pcy, f_steps, p1, p2)
        y = jnp.transpose(y, (0, 1, 4, 2, 5, 3)).reshape(
            b, pcx * p1, pcy * p2, f_steps)
        return y

    return forward


if __name__ == "__main__":
    key = jax.random.PRNGKey(0)
    kx, kg, kp = jax.random.split(key, 3)
    B = 2
    H, W = IMG_SIZE
    x = jax.random.normal(kx, (B, H, W, CONFIG['TIME_STEPS_IN']), dtype=jnp.float32)
    grid_in = jax.random.normal(kg, (B, H, W, 2), dtype=jnp.float32)
    params = init_params(kp, CONFIG, IMG_SIZE)

    forward = make_afno_forward(CONFIG, IMG_SIZE, B, params)
    out = jax.block_until_ready(forward(x, grid_in))
    assert out.shape == (B, H, W, CONFIG['TIME_STEPS_OUT']), out.shape
    assert bool(jnp.all(jnp.isfinite(out)))
    print("KERNEL_OK")
</pallas_src>

<mosaic_0001>
module attributes {stable_mosaic.version = 11 : i64} {
  func.func @_lambda_(%arg0: memref<32x64xf32, #tpu.memory_space<vmem>>, %arg1: memref<64x32xf32, #tpu.memory_space<vmem>>, %arg2: memref<1x32xf32, #tpu.memory_space<vmem>>, %arg3: memref<32x32xf32, #tpu.memory_space<vmem>>, %arg4: memref<24x32xf32, #tpu.memory_space<vmem>>, %arg5: memref<24x32xf32, #tpu.memory_space<vmem>>, %arg6: memref<32x24xf32, #tpu.memory_space<vmem>>, %arg7: memref<32x24xf32, #tpu.memory_space<vmem>>, %arg8: memref<2x32x64xf32, #tpu.memory_space<vmem>>, %arg9: memref<2x32x64xf32, #tpu.memory_space<vmem>>, %arg10: memref<2x1x64xf32, #tpu.memory_space<vmem>>, %arg11: memref<2x64x64xf32, #tpu.memory_space<vmem>>, %arg12: memref<2x1x64xf32, #tpu.memory_space<vmem>>, %arg13: memref<2x32x128xf32, #tpu.memory_space<vmem>>, %arg14: memref<2x1x128xf32, #tpu.memory_space<vmem>>, %arg15: memref<2x128x32xf32, #tpu.memory_space<vmem>>, %arg16: memref<2x1x32xf32, #tpu.memory_space<vmem>>, %arg17: memref<2x32x128xf32, #tpu.memory_space<vmem>>, %arg18: memref<1x128xf32, #tpu.memory_space<vmem>>, %arg19: memref<128x32xf32, #tpu.memory_space<vmem>>, %arg20: memref<1x32xf32, #tpu.memory_space<vmem>>, %arg21: memref<32x32xf32, #tpu.memory_space<vmem>>) attributes {dimension_semantics = [], scalar_prefetch = 0 : i64, scratch_operands = 0 : i64, tpu.core_type = #tpu.core_type<tc>} {
    %c0 = arith.constant 0 : index
    %c0_0 = arith.constant 0 : index
    %0 = vector.load %arg0[%c0, %c0_0] : memref<32x64xf32, #tpu.memory_space<vmem>>, vector<32x64xf32>
    %c0_1 = arith.constant 0 : index
    %c0_2 = arith.constant 0 : index
    %1 = vector.load %arg1[%c0_1, %c0_2] : memref<64x32xf32, #tpu.memory_space<vmem>>, vector<64x32xf32>
    %cst = arith.constant dense<0.000000e+00> : vector<32x32xf32>
    %2 = tpu.matmul %0, %1, %cst {dimension_numbers = #tpu.dot_dimension_numbers<[1], [0], [0], [1], [0, 0, 1, 1], [], []>} : vector<32x64xf32>, vector<64x32xf32>, vector<32x32xf32> -> vector<32x32xf32>
    %c0_3 = arith.constant 0 : index
    %c0_4 = arith.constant 0 : index
    %3 = vector.load %arg2[%c0_3, %c0_4] : memref<1x32xf32, #tpu.memory_space<vmem>>, vector<1x32xf32>
    %4 = vector.broadcast %3 : vector<1x32xf32> to vector<32x32xf32>
    %5 = arith.addf %2, %4 : vector<32x32xf32>
    %c0_5 = arith.constant 0 : index
    %c0_6 = arith.constant 0 : index
    %6 = vector.load %arg3[%c0_5, %c0_6] : memref<32x32xf32, #tpu.memory_space<vmem>>, vector<32x32xf32>
    %7 = arith.addf %5, %6 : vector<32x32xf32>
    %c0_7 = arith.constant 0 : index
    %c0_8 = arith.constant 0 : index
    %8 = vector.load %arg4[%c0_7, %c0_8] : memref<24x32xf32, #tpu.memory_space<vmem>>, vector<24x32xf32>
    %c0_9 = arith.constant 0 : index
    %c0_10 = arith.constant 0 : index
    %9 = vector.load %arg5[%c0_9, %c0_10] : memref<24x32xf32, #tpu.memory_space<vmem>>, vector<24x32xf32>
    %c0_11 = arith.constant 0 : index
    %c0_12 = arith.constant 0 : index
    %10 = vector.load %arg6[%c0_11, %c0_12] : memref<32x24xf32, #tpu.memory_space<vmem>>, vector<32x24xf32>
    %c0_13 = arith.constant 0 : index
    %c0_14 = arith.constant 0 : index
    %11 = vector.load %arg7[%c0_13, %c0_14] : memref<32x24xf32, #tpu.memory_space<vmem>>, vector<32x24xf32>
    %cst_15 = arith.constant dense<0.000000e+00> : vector<24x32xf32>
    %12 = tpu.matmul %8, %7, %cst_15 {dimension_numbers = #tpu.dot_dimension_numbers<[1], [0], [0], [1], [0, 0, 1, 1], [], []>} : vector<24x32xf32>, vector<32x32xf32>, vector<24x32xf32> -> vector<24x32xf32>
    %cst_16 = arith.constant dense<0.000000e+00> : vector<24x32xf32>
    %13 = tpu.matmul %9, %7, %cst_16 {dimension_numbers = #tpu.dot_dimension_numbers<[1], [0], [0], [1], [0, 0, 1, 1], [], []>} : vector<24x32xf32>, vector<32x32xf32>, vector<24x32xf32> -> vector<24x32xf32>
    %c0_17 = arith.constant 0 : index
    %c0_18 = arith.constant 0 : index
    %c0_19 = arith.constant 0 : index
    %14 = vector.load %arg8[%c0_17, %c0_18, %c0_19] : memref<2x32x64xf32, #tpu.memory_space<vmem>>, vector<1x32x64xf32>
    %15 = vector.shape_cast %14 : vector<1x32x64xf32> to vector<32x64xf32>
    %cst_20 = arith.constant dense<0.000000e+00> : vector<24x64xf32>
    %16 = tpu.matmul %12, %15, %cst_20 {dimension_numbers = #tpu.dot_dimension_numbers<[1], [0], [0], [1], [0, 0, 1, 1], [], []>} : vector<24x32xf32>, vector<32x64xf32>, vector<24x64xf32> -> vector<24x64xf32>
    %c0_21 = arith.constant 0 : index
    %c0_22 = arith.constant 0 : index
    %c0_23 = arith.constant 0 : index
    %17 = vector.load %arg9[%c0_21, %c0_22, %c0_23] : memref<2x32x64xf32, #tpu.memory_space<vmem>>, vector<1x32x64xf32>
    %18 = vector.shape_cast %17 : vector<1x32x64xf32> to vector<32x64xf32>
    %cst_24 = arith.constant dense<0.000000e+00> : vector<24x64xf32>
    %19 = tpu.matmul %13, %18, %cst_24 {dimension_numbers = #tpu.dot_dimension_numbers<[1], [0], [0], [1], [0, 0, 1, 1], [], []>} : vector<24x32xf32>, vector<32x64xf32>, vector<24x64xf32> -> vector<24x64xf32>
    %20 = arith.addf %16, %19 : vector<24x64xf32>
    %c0_25 = arith.constant 0 : index
    %c0_26 = arith.constant 0 : index
    %c0_27 = arith.constant 0 : index
    %21 = vector.load %arg10[%c0_25, %c0_26, %c0_27] : memref<2x1x64xf32, #tpu.memory_space<vmem>>, vector<1x1x64xf32>
    %22 = vector.shape_cast %21 : vector<1x1x64xf32> to vector<1x64xf32>
    %23 = vector.broadcast %22 : vector<1x64xf32> to vector<24x64xf32>
    %24 = arith.addf %20, %23 : vector<24x64xf32>
    %cst_28 = arith.constant 5.000000e-01 : f32
    %25 = vector.broadcast %cst_28 : f32 to vector<24x64xf32>
    %26 = arith.mulf %25, %24 : vector<24x64xf32>
    %cst_29 = arith.constant 0.707106769 : f32
    %27 = vector.broadcast %cst_29 : f32 to vector<24x64xf32>
    %28 = arith.mulf %24, %27 : vector<24x64xf32>
    %29 = math.absf %28 : vector<24x64xf32>
    %cst_30 = arith.constant 0.327591091 : f32
    %30 = vector.broadcast %cst_30 : f32 to vector<24x64xf32>
    %31 = arith.mulf %30, %29 : vector<24x64xf32>
    %cst_31 = arith.constant 1.000000e+00 : f32
    %32 = vector.broadcast %cst_31 : f32 to vector<24x64xf32>
    %33 = arith.addf %32, %31 : vector<24x64xf32>
    %cst_32 = arith.constant 1.000000e+00 : f32
    %34 = vector.broadcast %cst_32 : f32 to vector<24x64xf32>
    %35 = arith.divf %34, %33 : vector<24x64xf32>
    %cst_33 = arith.constant 1.06140542 : f32
    %36 = vector.broadcast %cst_33 : f32 to vector<24x64xf32>
    %37 = arith.mulf %36, %35 : vector<24x64xf32>
    %cst_34 = arith.constant -1.45315206 : f32
    %38 = vector.broadcast %cst_34 : f32 to vector<24x64xf32>
    %39 = arith.addf %37, %38 : vector<24x64xf32>
    %40 = arith.mulf %39, %35 : vector<24x64xf32>
    %cst_35 = arith.constant 1.42141378 : f32
    %41 = vector.broadcast %cst_35 : f32 to vector<24x64xf32>
    %42 = arith.addf %40, %41 : vector<24x64xf32>
    %43 = arith.mulf %42, %35 : vector<24x64xf32>
    %cst_36 = arith.constant -0.284496725 : f32
    %44 = vector.broadcast %cst_36 : f32 to vector<24x64xf32>
    %45 = arith.addf %43, %44 : vector<24x64xf32>
    %46 = arith.mulf %45, %35 : vector<24x64xf32>
    %cst_37 = arith.constant 0.254829586 : f32
    %47 = vector.broadcast %cst_37 : f32 to vector<24x64xf32>
    %48 = arith.addf %46, %47 : vector<24x64xf32>
    %49 = arith.mulf %48, %35 : vector<24x64xf32>
    %cst_38 = arith.constant 0.000000e+00 : f32
    %50 = vector.broadcast %cst_38 : f32 to vector<24x64xf32>
    %51 = arith.subf %50, %29 : vector<24x64xf32>
    %52 = arith.mulf %51, %29 : vector<24x64xf32>
    %53 = math.exp %52 : vector<24x64xf32>
    %54 = arith.mulf %49, %53 : vector<24x64xf32>
    %cst_39 = arith.constant 1.000000e+00 : f32
    %55 = vector.broadcast %cst_39 : f32 to vector<24x64xf32>
    %56 = arith.subf %55, %54 : vector<24x64xf32>
    %cst_40 = arith.constant 0.000000e+00 : f32
    %57 = vector.broadcast %cst_40 : f32 to vector<24x64xf32>
    %58 = arith.cmpf oge, %28, %57 : vector<24x64xf32>
    %cst_41 = arith.constant 0.000000e+00 : f32
    %59 = vector.broadcast %cst_41 : f32 to vector<24x64xf32>
    %60 = arith.subf %59, %56 : vector<24x64xf32>
    %61 = arith.select %58, %56, %60 : vector<24x64xi1>, vector<24x64xf32>
    %cst_42 = arith.constant 1.000000e+00 : f32
    %62 = vector.broadcast %cst_42 : f32 to vector<24x64xf32>
    %63 = arith.addf %62, %61 : vector<24x64xf32>
    %64 = arith.mulf %26, %63 : vector<24x64xf32>
    %c0_43 = arith.constant 0 : index
    %c0_44 = arith.constant 0 : index
    %c0_45 = arith.constant 0 : index
    %65 = vector.load %arg11[%c0_43, %c0_44, %c0_45] : memref<2x64x64xf32, #tpu.memory_space<vmem>>, vector<1x64x64xf32>
    %66 = vector.shape_cast %65 : vector<1x64x64xf32> to vector<64x64xf32>
    %cst_46 = arith.constant dense<0.000000e+00> : vector<24x64xf32>
    %67 = tpu.matmul %64, %66, %cst_46 {dimension_numbers = #tpu.dot_dimension_numbers<[1], [0], [0], [1], [0, 0, 1, 1], [], []>} : vector<24x64xf32>, vector<64x64xf32>, vector<24x64xf32> -> vector<24x64xf32>
    %c0_47 = arith.constant 0 : index
    %c0_48 = arith.constant 0 : index
    %c0_49 = arith.constant 0 : index
    %68 = vector.load %arg12[%c0_47, %c0_48, %c0_49] : memref<2x1x64xf32, #tpu.memory_space<vmem>>, vector<1x1x64xf32>
    %69 = vector.shape_cast %68 : vector<1x1x64xf32> to vector<1x64xf32>
    %70 = vector.broadcast %69 : vector<1x64xf32> to vector<24x64xf32>
    %71 = arith.addf %67, %70 : vector<24x64xf32>
    %cst_50 = arith.constant 0.00999999977 : f32
    %72 = vector.broadcast %cst_50 : f32 to vector<24x64xf32>
    %73 = arith.cmpf ogt, %71, %72 : vector<24x64xf32>
    %cst_51 = arith.constant 0.00999999977 : f32
    %74 = vector.broadcast %cst_51 : f32 to vector<24x64xf32>
    %75 = arith.subf %71, %74 : vector<24x64xf32>
    %cst_52 = arith.constant -0.00999999977 : f32
    %76 = vector.broadcast %cst_52 : f32 to vector<24x64xf32>
    %77 = arith.cmpf olt, %71, %76 : vector<24x64xf32>
    %cst_53 = arith.constant 0.00999999977 : f32
    %78 = vector.broadcast %cst_53 : f32 to vector<24x64xf32>
    %79 = arith.addf %71, %78 : vector<24x64xf32>
    %cst_54 = arith.constant 0.000000e+00 : f32
    %80 = vector.broadcast %cst_54 : f32 to vector<24x64xf32>
    %81 = arith.select %77, %79, %80 : vector<24x64xi1>, vector<24x64xf32>
    %82 = arith.select %73, %75, %81 : vector<24x64xi1>, vector<24x64xf32>
    %83 = vector.extract_strided_slice %82 {offsets = [0, 0], sizes = [24, 32], strides = [1, 1]} : vector<24x64xf32> to vector<24x32xf32>
    %84 = vector.extract_strided_slice %82 {offsets = [0, 32], sizes = [24, 32], strides = [1, 1]} : vector<24x64xf32> to vector<24x32xf32>
    %cst_55 = arith.constant dense<0.000000e+00> : vector<32x32xf32>
    %85 = tpu.matmul %10, %83, %cst_55 {dimension_numbers = #tpu.dot_dimension_numbers<[1], [0], [0], [1], [0, 0, 1, 1], [], []>} : vector<32x24xf32>, vector<24x32xf32>, vector<32x32xf32> -> vector<32x32xf32>
    %cst_56 = arith.constant dense<0.000000e+00> : vector<32x32xf32>
    %86 = tpu.matmul %11, %84, %cst_56 {dimension_numbers = #tpu.dot_dimension_numbers<[1], [0], [0], [1], [0, 0, 1, 1], [], []>} : vector<32x24xf32>, vector<24x32xf32>, vector<32x32xf32> -> vector<32x32xf32>
    %87 = arith.addf %85, %86 : vector<32x32xf32>
    %88 = arith.addf %87, %7 : vector<32x32xf32>
    %c0_57 = arith.constant 0 : index
    %c0_58 = arith.constant 0 : index
    %c0_59 = arith.constant 0 : index
    %89 = vector.load %arg13[%c0_57, %c0_58, %c0_59] : memref<2x32x128xf32, #tpu.memory_space<vmem>>, vector<1x32x128xf32>
    %90 = vector.shape_cast %89 : vector<1x32x128xf32> to vector<32x128xf32>
    %cst_60 = arith.constant dense<0.000000e+00> : vector<32x128xf32>
    %91 = tpu.matmul %88, %90, %cst_60 {dimension_numbers = #tpu.dot_dimension_numbers<[1], [0], [0], [1], [0, 0, 1, 1], [], []>} : vector<32x32xf32>, vector<32x128xf32>, vector<32x128xf32> -> vector<32x128xf32>
    %c0_61 = arith.constant 0 : index
    %c0_62 = arith.constant 0 : index
    %c0_63 = arith.constant 0 : index
    %92 = vector.load %arg14[%c0_61, %c0_62, %c0_63] : memref<2x1x128xf32, #tpu.memory_space<vmem>>, vector<1x1x128xf32>
    %93 = vector.shape_cast %92 : vector<1x1x128xf32> to vector<1x128xf32>
    %94 = vector.broadcast %93 : vector<1x128xf32> to vector<32x128xf32>
    %95 = arith.addf %91, %94 : vector<32x128xf32>
    %cst_64 = arith.constant 5.000000e-01 : f32
    %96 = vector.broadcast %cst_64 : f32 to vector<32x128xf32>
    %97 = arith.mulf %96, %95 : vector<32x128xf32>
    %cst_65 = arith.constant 0.707106769 : f32
    %98 = vector.broadcast %cst_65 : f32 to vector<32x128xf32>
    %99 = arith.mulf %95, %98 : vector<32x128xf32>
    %100 = math.absf %99 : vector<32x128xf32>
    %cst_66 = arith.constant 0.327591091 : f32
    %101 = vector.broadcast %cst_66 : f32 to vector<32x128xf32>
    %102 = arith.mulf %101, %100 : vector<32x128xf32>
    %cst_67 = arith.constant 1.000000e+00 : f32
    %103 = vector.broadcast %cst_67 : f32 to vector<32x128xf32>
    %104 = arith.addf %103, %102 : vector<32x128xf32>
    %cst_68 = arith.constant 1.000000e+00 : f32
    %105 = vector.broadcast %cst_68 : f32 to vector<32x128xf32>
    %106 = arith.divf %105, %104 : vector<32x128xf32>
    %cst_69 = arith.constant 1.06140542 : f32
    %107 = vector.broadcast %cst_69 : f32 to vector<32x128xf32>
    %108 = arith.mulf %107, %106 : vector<32x128xf32>
    %cst_70 = arith.constant -1.45315206 : f32
    %109 = vector.broadcast %cst_70 : f32 to vector<32x128xf32>
    %110 = arith.addf %108, %109 : vector<32x128xf32>
    %111 = arith.mulf %110, %106 : vector<32x128xf32>
    %cst_71 = arith.constant 1.42141378 : f32
    %112 = vector.broadcast %cst_71 : f32 to vector<32x128xf32>
    %113 = arith.addf %111, %112 : vector<32x128xf32>
    %114 = arith.mulf %113, %106 : vector<32x128xf32>
    %cst_72 = arith.constant -0.284496725 : f32
    %115 = vector.broadcast %cst_72 : f32 to vector<32x128xf32>
    %116 = arith.addf %114, %115 : vector<32x128xf32>
    %117 = arith.mulf %116, %106 : vector<32x128xf32>
    %cst_73 = arith.constant 0.254829586 : f32
    %118 = vector.broadcast %cst_73 : f32 to vector<32x128xf32>
    %119 = arith.addf %117, %118 : vector<32x128xf32>
    %120 = arith.mulf %119, %106 : vector<32x128xf32>
    %cst_74 = arith.constant 0.000000e+00 : f32
    %121 = vector.broadcast %cst_74 : f32 to vector<32x128xf32>
    %122 = arith.subf %121, %100 : vector<32x128xf32>
    %123 = arith.mulf %122, %100 : vector<32x128xf32>
    %124 = math.exp %123 : vector<32x128xf32>
    %125 = arith.mulf %120, %124 : vector<32x128xf32>
    %cst_75 = arith.constant 1.000000e+00 : f32
    %126 = vector.broadcast %cst_75 : f32 to vector<32x128xf32>
    %127 = arith.subf %126, %125 : vector<32x128xf32>
    %cst_76 = arith.constant 0.000000e+00 : f32
    %128 = vector.broadcast %cst_76 : f32 to vector<32x128xf32>
    %129 = arith.cmpf oge, %99, %128 : vector<32x128xf32>
    %cst_77 = arith.constant 0.000000e+00 : f32
    %130 = vector.broadcast %cst_77 : f32 to vector<32x128xf32>
    %131 = arith.subf %130, %127 : vector<32x128xf32>
    %132 = arith.select %129, %127, %131 : vector<32x128xi1>, vector<32x128xf32>
    %cst_78 = arith.constant 1.000000e+00 : f32
    %133 = vector.broadcast %cst_78 : f32 to vector<32x128xf32>
    %134 = arith.addf %133, %132 : vector<32x128xf32>
    %135 = arith.mulf %97, %134 : vector<32x128xf32>
    %c0_79 = arith.constant 0 : index
    %c0_80 = arith.constant 0 : index
    %c0_81 = arith.constant 0 : index
    %136 = vector.load %arg15[%c0_79, %c0_80, %c0_81] : memref<2x128x32xf32, #tpu.memory_space<vmem>>, vector<1x128x32xf32>
    %137 = vector.shape_cast %136 : vector<1x128x32xf32> to vector<128x32xf32>
    %cst_82 = arith.constant dense<0.000000e+00> : vector<32x32xf32>
    %138 = tpu.matmul %135, %137, %cst_82 {dimension_numbers = #tpu.dot_dimension_numbers<[1], [0], [0], [1], [0, 0, 1, 1], [], []>} : vector<32x128xf32>, vector<128x32xf32>, vector<32x32xf32> -> vector<32x32xf32>
    %c0_83 = arith.constant 0 : index
    %c0_84 = arith.constant 0 : index
    %c0_85 = arith.constant 0 : index
    %139 = vector.load %arg16[%c0_83, %c0_84, %c0_85] : memref<2x1x32xf32, #tpu.memory_space<vmem>>, vector<1x1x32xf32>
    %140 = vector.shape_cast %139 : vector<1x1x32xf32> to vector<1x32xf32>
    %141 = vector.broadcast %140 : vector<1x32xf32> to vector<32x32xf32>
    %142 = arith.addf %138, %141 : vector<32x32xf32>
    %cst_86 = arith.constant dense<0.000000e+00> : vector<24x32xf32>
    %143 = tpu.matmul %8, %142, %cst_86 {dimension_numbers = #tpu.dot_dimension_numbers<[1], [0], [0], [1], [0, 0, 1, 1], [], []>} : vector<24x32xf32>, vector<32x32xf32>, vector<24x32xf32> -> vector<24x32xf32>
    %cst_87 = arith.constant dense<0.000000e+00> : vector<24x32xf32>
    %144 = tpu.matmul %9, %142, %cst_87 {dimension_numbers = #tpu.dot_dimension_numbers<[1], [0], [0], [1], [0, 0, 1, 1], [], []>} : vector<24x32xf32>, vector<32x32xf32>, vector<24x32xf32> -> vector<24x32xf32>
    %c1 = arith.constant 1 : index
    %c0_88 = arith.constant 0 : index
    %c0_89 = arith.constant 0 : index
    %145 = vector.load %arg8[%c1, %c0_88, %c0_89] : memref<2x32x64xf32, #tpu.memory_space<vmem>>, vector<1x32x64xf32>
    %146 = vector.shape_cast %145 : vector<1x32x64xf32> to vector<32x64xf32>
    %cst_90 = arith.constant dense<0.000000e+00> : vector<24x64xf32>
    %147 = tpu.matmul %143, %146, %cst_90 {dimension_numbers = #tpu.dot_dimension_numbers<[1], [0], [0], [1], [0, 0, 1, 1], [], []>} : vector<24x32xf32>, vector<32x64xf32>, vector<24x64xf32> -> vector<24x64xf32>
    %c1_91 = arith.constant 1 : index
    %c0_92 = arith.constant 0 : index
    %c0_93 = arith.constant 0 : index
    %148 = vector.load %arg9[%c1_91, %c0_92, %c0_93] : memref<2x32x64xf32, #tpu.memory_space<vmem>>, vector<1x32x64xf32>
    %149 = vector.shape_cast %148 : vector<1x32x64xf32> to vector<32x64xf32>
    %cst_94 = arith.constant dense<0.000000e+00> : vector<24x64xf32>
    %150 = tpu.matmul %144, %149, %cst_94 {dimension_numbers = #tpu.dot_dimension_numbers<[1], [0], [0], [1], [0, 0, 1, 1], [], []>} : vector<24x32xf32>, vector<32x64xf32>, vector<24x64xf32> -> vector<24x64xf32>
    %151 = arith.addf %147, %150 : vector<24x64xf32>
    %c1_95 = arith.constant 1 : index
    %c0_96 = arith.constant 0 : index
    %c0_97 = arith.constant 0 : index
    %152 = vector.load %arg10[%c1_95, %c0_96, %c0_97] : memref<2x1x64xf32, #tpu.memory_space<vmem>>, vector<1x1x64xf32>
    %153 = vector.shape_cast %152 : vector<1x1x64xf32> to vector<1x64xf32>
    %154 = vector.broadcast %153 : vector<1x64xf32> to vector<24x64xf32>
    %155 = arith.addf %151, %154 : vector<24x64xf32>
    %cst_98 = arith.constant 5.000000e-01 : f32
    %156 = vector.broadcast %cst_98 : f32 to vector<24x64xf32>
    %157 = arith.mulf %156, %155 : vector<24x64xf32>
    %cst_99 = arith.constant 0.707106769 : f32
    %158 = vector.broadcast %cst_99 : f32 to vector<24x64xf32>
    %159 = arith.mulf %155, %158 : vector<24x64xf32>
    %160 = math.absf %159 : vector<24x64xf32>
    %cst_100 = arith.constant 0.327591091 : f32
    %161 = vector.broadcast %cst_100 : f32 to vector<24x64xf32>
    %162 = arith.mulf %161, %160 : vector<24x64xf32>
    %cst_101 = arith.constant 1.000000e+00 : f32
    %163 = vector.broadcast %cst_101 : f32 to vector<24x64xf32>
    %164 = arith.addf %163, %162 : vector<24x64xf32>
    %cst_102 = arith.constant 1.000000e+00 : f32
    %165 = vector.broadcast %cst_102 : f32 to vector<24x64xf32>
    %166 = arith.divf %165, %164 : vector<24x64xf32>
    %cst_103 = arith.constant 1.06140542 : f32
    %167 = vector.broadcast %cst_103 : f32 to vector<24x64xf32>
    %168 = arith.mulf %167, %166 : vector<24x64xf32>
    %cst_104 = arith.constant -1.45315206 : f32
    %169 = vector.broadcast %cst_104 : f32 to vector<24x64xf32>
    %170 = arith.addf %168, %169 : vector<24x64xf32>
    %171 = arith.mulf %170, %166 : vector<24x64xf32>
    %cst_105 = arith.constant 1.42141378 : f32
    %172 = vector.broadcast %cst_105 : f32 to vector<24x64xf32>
    %173 = arith.addf %171, %172 : vector<24x64xf32>
    %174 = arith.mulf %173, %166 : vector<24x64xf32>
    %cst_106 = arith.constant -0.284496725 : f32
    %175 = vector.broadcast %cst_106 : f32 to vector<24x64xf32>
    %176 = arith.addf %174, %175 : vector<24x64xf32>
    %177 = arith.mulf %176, %166 : vector<24x64xf32>
    %cst_107 = arith.constant 0.254829586 : f32
    %178 = vector.broadcast %cst_107 : f32 to vector<24x64xf32>
    %179 = arith.addf %177, %178 : vector<24x64xf32>
    %180 = arith.mulf %179, %166 : vector<24x64xf32>
    %cst_108 = arith.constant 0.000000e+00 : f32
    %181 = vector.broadcast %cst_108 : f32 to vector<24x64xf32>
    %182 = arith.subf %181, %160 : vector<24x64xf32>
    %183 = arith.mulf %182, %160 : vector<24x64xf32>
    %184 = math.exp %183 : vector<24x64xf32>
    %185 = arith.mulf %180, %184 : vector<24x64xf32>
    %cst_109 = arith.constant 1.000000e+00 : f32
    %186 = vector.broadcast %cst_109 : f32 to vector<24x64xf32>
    %187 = arith.subf %186, %185 : vector<24x64xf32>
    %cst_110 = arith.constant 0.000000e+00 : f32
    %188 = vector.broadcast %cst_110 : f32 to vector<24x64xf32>
    %189 = arith.cmpf oge, %159, %188 : vector<24x64xf32>
    %cst_111 = arith.constant 0.000000e+00 : f32
    %190 = vector.broadcast %cst_111 : f32 to vector<24x64xf32>
    %191 = arith.subf %190, %187 : vector<24x64xf32>
    %192 = arith.select %189, %187, %191 : vector<24x64xi1>, vector<24x64xf32>
    %cst_112 = arith.constant 1.000000e+00 : f32
    %193 = vector.broadcast %cst_112 : f32 to vector<24x64xf32>
    %194 = arith.addf %193, %192 : vector<24x64xf32>
    %195 = arith.mulf %157, %194 : vector<24x64xf32>
    %c1_113 = arith.constant 1 : index
    %c0_114 = arith.constant 0 : index
    %c0_115 = arith.constant 0 : index
    %196 = vector.load %arg11[%c1_113, %c0_114, %c0_115] : memref<2x64x64xf32, #tpu.memory_space<vmem>>, vector<1x64x64xf32>
    %197 = vector.shape_cast %196 : vector<1x64x64xf32> to vector<64x64xf32>
    %cst_116 = arith.constant dense<0.000000e+00> : vector<24x64xf32>
    %198 = tpu.matmul %195, %197, %cst_116 {dimension_numbers = #tpu.dot_dimension_numbers<[1], [0], [0], [1], [0, 0, 1, 1], [], []>} : vector<24x64xf32>, vector<64x64xf32>, vector<24x64xf32> -> vector<24x64xf32>
    %c1_117 = arith.constant 1 : index
    %c0_118 = arith.constant 0 : index
    %c0_119 = arith.constant 0 : index
    %199 = vector.load %arg12[%c1_117, %c0_118, %c0_119] : memref<2x1x64xf32, #tpu.memory_space<vmem>>, vector<1x1x64xf32>
    %200 = vector.shape_cast %199 : vector<1x1x64xf32> to vector<1x64xf32>
    %201 = vector.broadcast %200 : vector<1x64xf32> to vector<24x64xf32>
    %202 = arith.addf %198, %201 : vector<24x64xf32>
    %cst_120 = arith.constant 0.00999999977 : f32
    %203 = vector.broadcast %cst_120 : f32 to vector<24x64xf32>
    %204 = arith.cmpf ogt, %202, %203 : vector<24x64xf32>
    %cst_121 = arith.constant 0.00999999977 : f32
    %205 = vector.broadcast %cst_121 : f32 to vector<24x64xf32>
    %206 = arith.subf %202, %205 : vector<24x64xf32>
    %cst_122 = arith.constant -0.00999999977 : f32
    %207 = vector.broadcast %cst_122 : f32 to vector<24x64xf32>
    %208 = arith.cmpf olt, %202, %207 : vector<24x64xf32>
    %cst_123 = arith.constant 0.00999999977 : f32
    %209 = vector.broadcast %cst_123 : f32 to vector<24x64xf32>
    %210 = arith.addf %202, %209 : vector<24x64xf32>
    %cst_124 = arith.constant 0.000000e+00 : f32
    %211 = vector.broadcast %cst_124 : f32 to vector<24x64xf32>
    %212 = arith.select %208, %210, %211 : vector<24x64xi1>, vector<24x64xf32>
    %213 = arith.select %204, %206, %212 : vector<24x64xi1>, vector<24x64xf32>
    %214 = vector.extract_strided_slice %213 {offsets = [0, 0], sizes = [24, 32], strides = [1, 1]} : vector<24x64xf32> to vector<24x32xf32>
    %215 = vector.extract_strided_slice %213 {offsets = [0, 32], sizes = [24, 32], strides = [1, 1]} : vector<24x64xf32> to vector<24x32xf32>
    %cst_125 = arith.constant dense<0.000000e+00> : vector<32x32xf32>
    %216 = tpu.matmul %10, %214, %cst_125 {dimension_numbers = #tpu.dot_dimension_numbers<[1], [0], [0], [1], [0, 0, 1, 1], [], []>} : vector<32x24xf32>, vector<24x32xf32>, vector<32x32xf32> -> vector<32x32xf32>
    %cst_126 = arith.constant dense<0.000000e+00> : vector<32x32xf32>
    %217 = tpu.matmul %11, %215, %cst_126 {dimension_numbers = #tpu.dot_dimension_numbers<[1], [0], [0], [1], [0, 0, 1, 1], [], []>} : vector<32x24xf32>, vector<24x32xf32>, vector<32x32xf32> -> vector<32x32xf32>
    %218 = arith.addf %216, %217 : vector<32x32xf32>
    %219 = arith.addf %218, %142 : vector<32x32xf32>
    %c1_127 = arith.constant 1 : index
    %c0_128 = arith.constant 0 : index
    %c0_129 = arith.constant 0 : index
    %220 = vector.load %arg13[%c1_127, %c0_128, %c0_129] : memref<2x32x128xf32, #tpu.memory_space<vmem>>, vector<1x32x128xf32>
    %221 = vector.shape_cast %220 : vector<1x32x128xf32> to vector<32x128xf32>
    %cst_130 = arith.constant dense<0.000000e+00> : vector<32x128xf32>
    %222 = tpu.matmul %219, %221, %cst_130 {dimension_numbers = #tpu.dot_dimension_numbers<[1], [0], [0], [1], [0, 0, 1, 1], [], []>} : vector<32x32xf32>, vector<32x128xf32>, vector<32x128xf32> -> vector<32x128xf32>
    %c1_131 = arith.constant 1 : index
    %c0_132 = arith.constant 0 : index
    %c0_133 = arith.constant 0 : index
    %223 = vector.load %arg14[%c1_131, %c0_132, %c0_133] : memref<2x1x128xf32, #tpu.memory_space<vmem>>, vector<1x1x128xf32>
    %224 = vector.shape_cast %223 : vector<1x1x128xf32> to vector<1x128xf32>
    %225 = vector.broadcast %224 : vector<1x128xf32> to vector<32x128xf32>
    %226 = arith.addf %222, %225 : vector<32x128xf32>
    %cst_134 = arith.constant 5.000000e-01 : f32
    %227 = vector.broadcast %cst_134 : f32 to vector<32x128xf32>
    %228 = arith.mulf %227, %226 : vector<32x128xf32>
    %cst_135 = arith.constant 0.707106769 : f32
    %229 = vector.broadcast %cst_135 : f32 to vector<32x128xf32>
    %230 = arith.mulf %226, %229 : vector<32x128xf32>
    %231 = math.absf %230 : vector<32x128xf32>
    %cst_136 = arith.constant 0.327591091 : f32
    %232 = vector.broadcast %cst_136 : f32 to vector<32x128xf32>
    %233 = arith.mulf %232, %231 : vector<32x128xf32>
    %cst_137 = arith.constant 1.000000e+00 : f32
    %234 = vector.broadcast %cst_137 : f32 to vector<32x128xf32>
    %235 = arith.addf %234, %233 : vector<32x128xf32>
    %cst_138 = arith.constant 1.000000e+00 : f32
    %236 = vector.broadcast %cst_138 : f32 to vector<32x128xf32>
    %237 = arith.divf %236, %235 : vector<32x128xf32>
    %cst_139 = arith.constant 1.06140542 : f32
    %238 = vector.broadcast %cst_139 : f32 to vector<32x128xf32>
    %239 = arith.mulf %238, %237 : vector<32x128xf32>
    %cst_140 = arith.constant -1.45315206 : f32
    %240 = vector.broadcast %cst_140 : f32 to vector<32x128xf32>
    %241 = arith.addf %239, %240 : vector<32x128xf32>
    %242 = arith.mulf %241, %237 : vector<32x128xf32>
    %cst_141 = arith.constant 1.42141378 : f32
    %243 = vector.broadcast %cst_141 : f32 to vector<32x128xf32>
    %244 = arith.addf %242, %243 : vector<32x128xf32>
    %245 = arith.mulf %244, %237 : vector<32x128xf32>
    %cst_142 = arith.constant -0.284496725 : f32
    %246 = vector.broadcast %cst_142 : f32 to vector<32x128xf32>
    %247 = arith.addf %245, %246 : vector<32x128xf32>
    %248 = arith.mulf %247, %237 : vector<32x128xf32>
    %cst_143 = arith.constant 0.254829586 : f32
    %249 = vector.broadcast %cst_143 : f32 to vector<32x128xf32>
    %250 = arith.addf %248, %249 : vector<32x128xf32>
    %251 = arith.mulf %250, %237 : vector<32x128xf32>
    %cst_144 = arith.constant 0.000000e+00 : f32
    %252 = vector.broadcast %cst_144 : f32 to vector<32x128xf32>
    %253 = arith.subf %252, %231 : vector<32x128xf32>
    %254 = arith.mulf %253, %231 : vector<32x128xf32>
    %255 = math.exp %254 : vector<32x128xf32>
    %256 = arith.mulf %251, %255 : vector<32x128xf32>
    %cst_145 = arith.constant 1.000000e+00 : f32
    %257 = vector.broadcast %cst_145 : f32 to vector<32x128xf32>
    %258 = arith.subf %257, %256 : vector<32x128xf32>
    %cst_146 = arith.constant 0.000000e+00 : f32
    %259 = vector.broadcast %cst_146 : f32 to vector<32x128xf32>
    %260 = arith.cmpf oge, %230, %259 : vector<32x128xf32>
    %cst_147 = arith.constant 0.000000e+00 : f32
    %261 = vector.broadcast %cst_147 : f32 to vector<32x128xf32>
    %262 = arith.subf %261, %258 : vector<32x128xf32>
    %263 = arith.select %260, %258, %262 : vector<32x128xi1>, vector<32x128xf32>
    %cst_148 = arith.constant 1.000000e+00 : f32
    %264 = vector.broadcast %cst_148 : f32 to vector<32x128xf32>
    %265 = arith.addf %264, %263 : vector<32x128xf32>
    %266 = arith.mulf %228, %265 : vector<32x128xf32>
    %c1_149 = arith.constant 1 : index
    %c0_150 = arith.constant 0 : index
    %c0_151 = arith.constant 0 : index
    %267 = vector.load %arg15[%c1_149, %c0_150, %c0_151] : memref<2x128x32xf32, #tpu.memory_space<vmem>>, vector<1x128x32xf32>
    %268 = vector.shape_cast %267 : vector<1x128x32xf32> to vector<128x32xf32>
    %cst_152 = arith.constant dense<0.000000e+00> : vector<32x32xf32>
    %269 = tpu.matmul %266, %268, %cst_152 {dimension_numbers = #tpu.dot_dimension_numbers<[1], [0], [0], [1], [0, 0, 1, 1], [], []>} : vector<32x128xf32>, vector<128x32xf32>, vector<32x32xf32> -> vector<32x32xf32>
    %c1_153 = arith.constant 1 : index
    %c0_154 = arith.constant 0 : index
    %c0_155 = arith.constant 0 : index
    %270 = vector.load %arg16[%c1_153, %c0_154, %c0_155] : memref<2x1x32xf32, #tpu.memory_space<vmem>>, vector<1x1x32xf32>
    %271 = vector.shape_cast %270 : vector<1x1x32xf32> to vector<1x32xf32>
    %272 = vector.broadcast %271 : vector<1x32xf32> to vector<32x32xf32>
    %273 = arith.addf %269, %272 : vector<32x32xf32>
    %cst_156 = arith.constant dense<0.000000e+00> : vector<24x32xf32>
    %274 = tpu.matmul %8, %273, %cst_156 {dimension_numbers = #tpu.dot_dimension_numbers<[1], [0], [0], [1], [0, 0, 1, 1], [], []>} : vector<24x32xf32>, vector<32x32xf32>, vector<24x32xf32> -> vector<24x32xf32>
    %cst_157 = arith.constant dense<0.000000e+00> : vector<24x32xf32>
    %275 = tpu.matmul %9, %273, %cst_157 {dimension_numbers = #tpu.dot_dimension_numbers<[1], [0], [0], [1], [0, 0, 1, 1], [], []>} : vector<24x32xf32>, vector<32x32xf32>, vector<24x32xf32> -> vector<24x32xf32>
    %c0_158 = arith.constant 0 : index
    %c0_159 = arith.constant 0 : index
    %c0_160 = arith.constant 0 : index
    %276 = vector.load %arg8[%c0_158, %c0_159, %c0_160] : memref<2x32x64xf32, #tpu.memory_space<vmem>>, vector<1x32x64xf32>
    %277 = vector.shape_cast %276 : vector<1x32x64xf32> to vector<32x64xf32>
    %cst_161 = arith.constant dense<0.000000e+00> : vector<24x64xf32>
    %278 = tpu.matmul %274, %277, %cst_161 {dimension_numbers = #tpu.dot_dimension_numbers<[1], [0], [0], [1], [0, 0, 1, 1], [], []>} : vector<24x32xf32>, vector<32x64xf32>, vector<24x64xf32> -> vector<24x64xf32>
    %c0_162 = arith.constant 0 : index
    %c0_163 = arith.constant 0 : index
    %c0_164 = arith.constant 0 : index
    %279 = vector.load %arg9[%c0_162, %c0_163, %c0_164] : memref<2x32x64xf32, #tpu.memory_space<vmem>>, vector<1x32x64xf32>
    %280 = vector.shape_cast %279 : vector<1x32x64xf32> to vector<32x64xf32>
    %cst_165 = arith.constant dense<0.000000e+00> : vector<24x64xf32>
    %281 = tpu.matmul %275, %280, %cst_165 {dimension_numbers = #tpu.dot_dimension_numbers<[1], [0], [0], [1], [0, 0, 1, 1], [], []>} : vector<24x32xf32>, vector<32x64xf32>, vector<24x64xf32> -> vector<24x64xf32>
    %282 = arith.addf %278, %281 : vector<24x64xf32>
    %c0_166 = arith.constant 0 : index
    %c0_167 = arith.constant 0 : index
    %c0_168 = arith.constant 0 : index
    %283 = vector.load %arg10[%c0_166, %c0_167, %c0_168] : memref<2x1x64xf32, #tpu.memory_space<vmem>>, vector<1x1x64xf32>
    %284 = vector.shape_cast %283 : vector<1x1x64xf32> to vector<1x64xf32>
    %285 = vector.broadcast %284 : vector<1x64xf32> to vector<24x64xf32>
    %286 = arith.addf %282, %285 : vector<24x64xf32>
    %cst_169 = arith.constant 5.000000e-01 : f32
    %287 = vector.broadcast %cst_169 : f32 to vector<24x64xf32>
    %288 = arith.mulf %287, %286 : vector<24x64xf32>
    %cst_170 = arith.constant 0.707106769 : f32
    %289 = vector.broadcast %cst_170 : f32 to vector<24x64xf32>
    %290 = arith.mulf %286, %289 : vector<24x64xf32>
    %291 = math.absf %290 : vector<24x64xf32>
    %cst_171 = arith.constant 0.327591091 : f32
    %292 = vector.broadcast %cst_171 : f32 to vector<24x64xf32>
    %293 = arith.mulf %292, %291 : vector<24x64xf32>
    %cst_172 = arith.constant 1.000000e+00 : f32
    %294 = vector.broadcast %cst_172 : f32 to vector<24x64xf32>
    %295 = arith.addf %294, %293 : vector<24x64xf32>
    %cst_173 = arith.constant 1.000000e+00 : f32
    %296 = vector.broadcast %cst_173 : f32 to vector<24x64xf32>
    %297 = arith.divf %296, %295 : vector<24x64xf32>
    %cst_174 = arith.constant 1.06140542 : f32
    %298 = vector.broadcast %cst_174 : f32 to vector<24x64xf32>
    %299 = arith.mulf %298, %297 : vector<24x64xf32>
    %cst_175 = arith.constant -1.45315206 : f32
    %300 = vector.broadcast %cst_175 : f32 to vector<24x64xf32>
    %301 = arith.addf %299, %300 : vector<24x64xf32>
    %302 = arith.mulf %301, %297 : vector<24x64xf32>
    %cst_176 = arith.constant 1.42141378 : f32
    %303 = vector.broadcast %cst_176 : f32 to vector<24x64xf32>
    %304 = arith.addf %302, %303 : vector<24x64xf32>
    %305 = arith.mulf %304, %297 : vector<24x64xf32>
    %cst_177 = arith.constant -0.284496725 : f32
    %306 = vector.broadcast %cst_177 : f32 to vector<24x64xf32>
    %307 = arith.addf %305, %306 : vector<24x64xf32>
    %308 = arith.mulf %307, %297 : vector<24x64xf32>
    %cst_178 = arith.constant 0.254829586 : f32
    %309 = vector.broadcast %cst_178 : f32 to vector<24x64xf32>
    %310 = arith.addf %308, %309 : vector<24x64xf32>
    %311 = arith.mulf %310, %297 : vector<24x64xf32>
    %cst_179 = arith.constant 0.000000e+00 : f32
    %312 = vector.broadcast %cst_179 : f32 to vector<24x64xf32>
    %313 = arith.subf %312, %291 : vector<24x64xf32>
    %314 = arith.mulf %313, %291 : vector<24x64xf32>
    %315 = math.exp %314 : vector<24x64xf32>
    %316 = arith.mulf %311, %315 : vector<24x64xf32>
    %cst_180 = arith.constant 1.000000e+00 : f32
    %317 = vector.broadcast %cst_180 : f32 to vector<24x64xf32>
    %318 = arith.subf %317, %316 : vector<24x64xf32>
    %cst_181 = arith.constant 0.000000e+00 : f32
    %319 = vector.broadcast %cst_181 : f32 to vector<24x64xf32>
    %320 = arith.cmpf oge, %290, %319 : vector<24x64xf32>
    %cst_182 = arith.constant 0.000000e+00 : f32
    %321 = vector.broadcast %cst_182 : f32 to vector<24x64xf32>
    %322 = arith.subf %321, %318 : vector<24x64xf32>
    %323 = arith.select %320, %318, %322 : vector<24x64xi1>, vector<24x64xf32>
    %cst_183 = arith.constant 1.000000e+00 : f32
    %324 = vector.broadcast %cst_183 : f32 to vector<24x64xf32>
    %325 = arith.addf %324, %323 : vector<24x64xf32>
    %326 = arith.mulf %288, %325 : vector<24x64xf32>
    %c0_184 = arith.constant 0 : index
    %c0_185 = arith.constant 0 : index
    %c0_186 = arith.constant 0 : index
    %327 = vector.load %arg11[%c0_184, %c0_185, %c0_186] : memref<2x64x64xf32, #tpu.memory_space<vmem>>, vector<1x64x64xf32>
    %328 = vector.shape_cast %327 : vector<1x64x64xf32> to vector<64x64xf32>
    %cst_187 = arith.constant dense<0.000000e+00> : vector<24x64xf32>
    %329 = tpu.matmul %326, %328, %cst_187 {dimension_numbers = #tpu.dot_dimension_numbers<[1], [0], [0], [1], [0, 0, 1, 1], [], []>} : vector<24x64xf32>, vector<64x64xf32>, vector<24x64xf32> -> vector<24x64xf32>
    %c0_188 = arith.constant 0 : index
    %c0_189 = arith.constant 0 : index
    %c0_190 = arith.constant 0 : index
    %330 = vector.load %arg12[%c0_188, %c0_189, %c0_190] : memref<2x1x64xf32, #tpu.memory_space<vmem>>, vector<1x1x64xf32>
    %331 = vector.shape_cast %330 : vector<1x1x64xf32> to vector<1x64xf32>
    %332 = vector.broadcast %331 : vector<1x64xf32> to vector<24x64xf32>
    %333 = arith.addf %329, %332 : vector<24x64xf32>
    %cst_191 = arith.constant 0.00999999977 : f32
    %334 = vector.broadcast %cst_191 : f32 to vector<24x64xf32>
    %335 = arith.cmpf ogt, %333, %334 : vector<24x64xf32>
    %cst_192 = arith.constant 0.00999999977 : f32
    %336 = vector.broadcast %cst_192 : f32 to vector<24x64xf32>
    %337 = arith.subf %333, %336 : vector<24x64xf32>
    %cst_193 = arith.constant -0.00999999977 : f32
    %338 = vector.broadcast %cst_193 : f32 to vector<24x64xf32>
    %339 = arith.cmpf olt, %333, %338 : vector<24x64xf32>
    %cst_194 = arith.constant 0.00999999977 : f32
    %340 = vector.broadcast %cst_194 : f32 to vector<24x64xf32>
    %341 = arith.addf %333, %340 : vector<24x64xf32>
    %cst_195 = arith.constant 0.000000e+00 : f32
    %342 = vector.broadcast %cst_195 : f32 to vector<24x64xf32>
    %343 = arith.select %339, %341, %342 : vector<24x64xi1>, vector<24x64xf32>
    %344 = arith.select %335, %337, %343 : vector<24x64xi1>, vector<24x64xf32>
    %345 = vector.extract_strided_slice %344 {offsets = [0, 0], sizes = [24, 32], strides = [1, 1]} : vector<24x64xf32> to vector<24x32xf32>
    %346 = vector.extract_strided_slice %344 {offsets = [0, 32], sizes = [24, 32], strides = [1, 1]} : vector<24x64xf32> to vector<24x32xf32>
    %cst_196 = arith.constant dense<0.000000e+00> : vector<32x32xf32>
    %347 = tpu.matmul %10, %345, %cst_196 {dimension_numbers = #tpu.dot_dimension_numbers<[1], [0], [0], [1], [0, 0, 1, 1], [], []>} : vector<32x24xf32>, vector<24x32xf32>, vector<32x32xf32> -> vector<32x32xf32>
    %cst_197 = arith.constant dense<0.000000e+00> : vector<32x32xf32>
    %348 = tpu.matmul %11, %346, %cst_197 {dimension_numbers = #tpu.dot_dimension_numbers<[1], [0], [0], [1], [0, 0, 1, 1], [], []>} : vector<32x24xf32>, vector<24x32xf32>, vector<32x32xf32> -> vector<32x32xf32>
    %349 = arith.addf %347, %348 : vector<32x32xf32>
    %350 = arith.addf %349, %273 : vector<32x32xf32>
    %c0_198 = arith.constant 0 : index
    %c0_199 = arith.constant 0 : index
    %c0_200 = arith.constant 0 : index
    %351 = vector.load %arg13[%c0_198, %c0_199, %c0_200] : memref<2x32x128xf32, #tpu.memory_space<vmem>>, vector<1x32x128xf32>
    %352 = vector.shape_cast %351 : vector<1x32x128xf32> to vector<32x128xf32>
    %cst_201 = arith.constant dense<0.000000e+00> : vector<32x128xf32>
    %353 = tpu.matmul %350, %352, %cst_201 {dimension_numbers = #tpu.dot_dimension_numbers<[1], [0], [0], [1], [0, 0, 1, 1], [], []>} : vector<32x32xf32>, vector<32x128xf32>, vector<32x128xf32> -> vector<32x128xf32>
    %c0_202 = arith.constant 0 : index
    %c0_203 = arith.constant 0 : index
    %c0_204 = arith.constant 0 : index
    %354 = vector.load %arg14[%c0_202, %c0_203, %c0_204] : memref<2x1x128xf32, #tpu.memory_space<vmem>>, vector<1x1x128xf32>
    %355 = vector.shape_cast %354 : vector<1x1x128xf32> to vector<1x128xf32>
    %356 = vector.broadcast %355 : vector<1x128xf32> to vector<32x128xf32>
    %357 = arith.addf %353, %356 : vector<32x128xf32>
    %cst_205 = arith.constant 5.000000e-01 : f32
    %358 = vector.broadcast %cst_205 : f32 to vector<32x128xf32>
    %359 = arith.mulf %358, %357 : vector<32x128xf32>
    %cst_206 = arith.constant 0.707106769 : f32
    %360 = vector.broadcast %cst_206 : f32 to vector<32x128xf32>
    %361 = arith.mulf %357, %360 : vector<32x128xf32>
    %362 = math.absf %361 : vector<32x128xf32>
    %cst_207 = arith.constant 0.327591091 : f32
    %363 = vector.broadcast %cst_207 : f32 to vector<32x128xf32>
    %364 = arith.mulf %363, %362 : vector<32x128xf32>
    %cst_208 = arith.constant 1.000000e+00 : f32
    %365 = vector.broadcast %cst_208 : f32 to vector<32x128xf32>
    %366 = arith.addf %365, %364 : vector<32x128xf32>
    %cst_209 = arith.constant 1.000000e+00 : f32
    %367 = vector.broadcast %cst_209 : f32 to vector<32x128xf32>
    %368 = arith.divf %367, %366 : vector<32x128xf32>
    %cst_210 = arith.constant 1.06140542 : f32
    %369 = vector.broadcast %cst_210 : f32 to vector<32x128xf32>
    %370 = arith.mulf %369, %368 : vector<32x128xf32>
    %cst_211 = arith.constant -1.45315206 : f32
    %371 = vector.broadcast %cst_211 : f32 to vector<32x128xf32>
    %372 = arith.addf %370, %371 : vector<32x128xf32>
    %373 = arith.mulf %372, %368 : vector<32x128xf32>
    %cst_212 = arith.constant 1.42141378 : f32
    %374 = vector.broadcast %cst_212 : f32 to vector<32x128xf32>
    %375 = arith.addf %373, %374 : vector<32x128xf32>
    %376 = arith.mulf %375, %368 : vector<32x128xf32>
    %cst_213 = arith.constant -0.284496725 : f32
    %377 = vector.broadcast %cst_213 : f32 to vector<32x128xf32>
    %378 = arith.addf %376, %377 : vector<32x128xf32>
    %379 = arith.mulf %378, %368 : vector<32x128xf32>
    %cst_214 = arith.constant 0.254829586 : f32
    %380 = vector.broadcast %cst_214 : f32 to vector<32x128xf32>
    %381 = arith.addf %379, %380 : vector<32x128xf32>
    %382 = arith.mulf %381, %368 : vector<32x128xf32>
    %cst_215 = arith.constant 0.000000e+00 : f32
    %383 = vector.broadcast %cst_215 : f32 to vector<32x128xf32>
    %384 = arith.subf %383, %362 : vector<32x128xf32>
    %385 = arith.mulf %384, %362 : vector<32x128xf32>
    %386 = math.exp %385 : vector<32x128xf32>
    %387 = arith.mulf %382, %386 : vector<32x128xf32>
    %cst_216 = arith.constant 1.000000e+00 : f32
    %388 = vector.broadcast %cst_216 : f32 to vector<32x128xf32>
    %389 = arith.subf %388, %387 : vector<32x128xf32>
    %cst_217 = arith.constant 0.000000e+00 : f32
    %390 = vector.broadcast %cst_217 : f32 to vector<32x128xf32>
    %391 = arith.cmpf oge, %361, %390 : vector<32x128xf32>
    %cst_218 = arith.constant 0.000000e+00 : f32
    %392 = vector.broadcast %cst_218 : f32 to vector<32x128xf32>
    %393 = arith.subf %392, %389 : vector<32x128xf32>
    %394 = arith.select %391, %389, %393 : vector<32x128xi1>, vector<32x128xf32>
    %cst_219 = arith.constant 1.000000e+00 : f32
    %395 = vector.broadcast %cst_219 : f32 to vector<32x128xf32>
    %396 = arith.addf %395, %394 : vector<32x128xf32>
    %397 = arith.mulf %359, %396 : vector<32x128xf32>
    %c0_220 = arith.constant 0 : index
    %c0_221 = arith.constant 0 : index
    %c0_222 = arith.constant 0 : index
    %398 = vector.load %arg15[%c0_220, %c0_221, %c0_222] : memref<2x128x32xf32, #tpu.memory_space<vmem>>, vector<1x128x32xf32>
    %399 = vector.shape_cast %398 : vector<1x128x32xf32> to vector<128x32xf32>
    %cst_223 = arith.constant dense<0.000000e+00> : vector<32x32xf32>
    %400 = tpu.matmul %397, %399, %cst_223 {dimension_numbers = #tpu.dot_dimension_numbers<[1], [0], [0], [1], [0, 0, 1, 1], [], []>} : vector<32x128xf32>, vector<128x32xf32>, vector<32x32xf32> -> vector<32x32xf32>
    %c0_224 = arith.constant 0 : index
    %c0_225 = arith.constant 0 : index
    %c0_226 = arith.constant 0 : index
    %401 = vector.load %arg16[%c0_224, %c0_225, %c0_226] : memref<2x1x32xf32, #tpu.memory_space<vmem>>, vector<1x1x32xf32>
    %402 = vector.shape_cast %401 : vector<1x1x32xf32> to vector<1x32xf32>
    %403 = vector.broadcast %402 : vector<1x32xf32> to vector<32x32xf32>
    %404 = arith.addf %400, %403 : vector<32x32xf32>
    %cst_227 = arith.constant dense<0.000000e+00> : vector<24x32xf32>
    %405 = tpu.matmul %8, %404, %cst_227 {dimension_numbers = #tpu.dot_dimension_numbers<[1], [0], [0], [1], [0, 0, 1, 1], [], []>} : vector<24x32xf32>, vector<32x32xf32>, vector<24x32xf32> -> vector<24x32xf32>
    %cst_228 = arith.constant dense<0.000000e+00> : vector<24x32xf32>
    %406 = tpu.matmul %9, %404, %cst_228 {dimension_numbers = #tpu.dot_dimension_numbers<[1], [0], [0], [1], [0, 0, 1, 1], [], []>} : vector<24x32xf32>, vector<32x32xf32>, vector<24x32xf32> -> vector<24x32xf32>
    %c1_229 = arith.constant 1 : index
    %c0_230 = arith.constant 0 : index
    %c0_231 = arith.constant 0 : index
    %407 = vector.load %arg8[%c1_229, %c0_230, %c0_231] : memref<2x32x64xf32, #tpu.memory_space<vmem>>, vector<1x32x64xf32>
    %408 = vector.shape_cast %407 : vector<1x32x64xf32> to vector<32x64xf32>
    %cst_232 = arith.constant dense<0.000000e+00> : vector<24x64xf32>
    %409 = tpu.matmul %405, %408, %cst_232 {dimension_numbers = #tpu.dot_dimension_numbers<[1], [0], [0], [1], [0, 0, 1, 1], [], []>} : vector<24x32xf32>, vector<32x64xf32>, vector<24x64xf32> -> vector<24x64xf32>
    %c1_233 = arith.constant 1 : index
    %c0_234 = arith.constant 0 : index
    %c0_235 = arith.constant 0 : index
    %410 = vector.load %arg9[%c1_233, %c0_234, %c0_235] : memref<2x32x64xf32, #tpu.memory_space<vmem>>, vector<1x32x64xf32>
    %411 = vector.shape_cast %410 : vector<1x32x64xf32> to vector<32x64xf32>
    %cst_236 = arith.constant dense<0.000000e+00> : vector<24x64xf32>
    %412 = tpu.matmul %406, %411, %cst_236 {dimension_numbers = #tpu.dot_dimension_numbers<[1], [0], [0], [1], [0, 0, 1, 1], [], []>} : vector<24x32xf32>, vector<32x64xf32>, vector<24x64xf32> -> vector<24x64xf32>
    %413 = arith.addf %409, %412 : vector<24x64xf32>
    %c1_237 = arith.constant 1 : index
    %c0_238 = arith.constant 0 : index
    %c0_239 = arith.constant 0 : index
    %414 = vector.load %arg10[%c1_237, %c0_238, %c0_239] : memref<2x1x64xf32, #tpu.memory_space<vmem>>, vector<1x1x64xf32>
    %415 = vector.shape_cast %414 : vector<1x1x64xf32> to vector<1x64xf32>
    %416 = vector.broadcast %415 : vector<1x64xf32> to vector<24x64xf32>
    %417 = arith.addf %413, %416 : vector<24x64xf32>
    %cst_240 = arith.constant 5.000000e-01 : f32
    %418 = vector.broadcast %cst_240 : f32 to vector<24x64xf32>
    %419 = arith.mulf %418, %417 : vector<24x64xf32>
    %cst_241 = arith.constant 0.707106769 : f32
    %420 = vector.broadcast %cst_241 : f32 to vector<24x64xf32>
    %421 = arith.mulf %417, %420 : vector<24x64xf32>
    %422 = math.absf %421 : vector<24x64xf32>
    %cst_242 = arith.constant 0.327591091 : f32
    %423 = vector.broadcast %cst_242 : f32 to vector<24x64xf32>
    %424 = arith.mulf %423, %422 : vector<24x64xf32>
    %cst_243 = arith.constant 1.000000e+00 : f32
    %425 = vector.broadcast %cst_243 : f32 to vector<24x64xf32>
    %426 = arith.addf %425, %424 : vector<24x64xf32>
    %cst_244 = arith.constant 1.000000e+00 : f32
    %427 = vector.broadcast %cst_244 : f32 to vector<24x64xf32>
    %428 = arith.divf %427, %426 : vector<24x64xf32>
    %cst_245 = arith.constant 1.06140542 : f32
    %429 = vector.broadcast %cst_245 : f32 to vector<24x64xf32>
    %430 = arith.mulf %429, %428 : vector<24x64xf32>
    %cst_246 = arith.constant -1.45315206 : f32
    %431 = vector.broadcast %cst_246 : f32 to vector<24x64xf32>
    %432 = arith.addf %430, %431 : vector<24x64xf32>
    %433 = arith.mulf %432, %428 : vector<24x64xf32>
    %cst_247 = arith.constant 1.42141378 : f32
    %434 = vector.broadcast %cst_247 : f32 to vector<24x64xf32>
    %435 = arith.addf %433, %434 : vector<24x64xf32>
    %436 = arith.mulf %435, %428 : vector<24x64xf32>
    %cst_248 = arith.constant -0.284496725 : f32
    %437 = vector.broadcast %cst_248 : f32 to vector<24x64xf32>
    %438 = arith.addf %436, %437 : vector<24x64xf32>
    %439 = arith.mulf %438, %428 : vector<24x64xf32>
    %cst_249 = arith.constant 0.254829586 : f32
    %440 = vector.broadcast %cst_249 : f32 to vector<24x64xf32>
    %441 = arith.addf %439, %440 : vector<24x64xf32>
    %442 = arith.mulf %441, %428 : vector<24x64xf32>
    %cst_250 = arith.constant 0.000000e+00 : f32
    %443 = vector.broadcast %cst_250 : f32 to vector<24x64xf32>
    %444 = arith.subf %443, %422 : vector<24x64xf32>
    %445 = arith.mulf %444, %422 : vector<24x64xf32>
    %446 = math.exp %445 : vector<24x64xf32>
    %447 = arith.mulf %442, %446 : vector<24x64xf32>
    %cst_251 = arith.constant 1.000000e+00 : f32
    %448 = vector.broadcast %cst_251 : f32 to vector<24x64xf32>
    %449 = arith.subf %448, %447 : vector<24x64xf32>
    %cst_252 = arith.constant 0.000000e+00 : f32
    %450 = vector.broadcast %cst_252 : f32 to vector<24x64xf32>
    %451 = arith.cmpf oge, %421, %450 : vector<24x64xf32>
    %cst_253 = arith.constant 0.000000e+00 : f32
    %452 = vector.broadcast %cst_253 : f32 to vector<24x64xf32>
    %453 = arith.subf %452, %449 : vector<24x64xf32>
    %454 = arith.select %451, %449, %453 : vector<24x64xi1>, vector<24x64xf32>
    %cst_254 = arith.constant 1.000000e+00 : f32
    %455 = vector.broadcast %cst_254 : f32 to vector<24x64xf32>
    %456 = arith.addf %455, %454 : vector<24x64xf32>
    %457 = arith.mulf %419, %456 : vector<24x64xf32>
    %c1_255 = arith.constant 1 : index
    %c0_256 = arith.constant 0 : index
    %c0_257 = arith.constant 0 : index
    %458 = vector.load %arg11[%c1_255, %c0_256, %c0_257] : memref<2x64x64xf32, #tpu.memory_space<vmem>>, vector<1x64x64xf32>
    %459 = vector.shape_cast %458 : vector<1x64x64xf32> to vector<64x64xf32>
    %cst_258 = arith.constant dense<0.000000e+00> : vector<24x64xf32>
    %460 = tpu.matmul %457, %459, %cst_258 {dimension_numbers = #tpu.dot_dimension_numbers<[1], [0], [0], [1], [0, 0, 1, 1], [], []>} : vector<24x64xf32>, vector<64x64xf32>, vector<24x64xf32> -> vector<24x64xf32>
    %c1_259 = arith.constant 1 : index
    %c0_260 = arith.constant 0 : index
    %c0_261 = arith.constant 0 : index
    %461 = vector.load %arg12[%c1_259, %c0_260, %c0_261] : memref<2x1x64xf32, #tpu.memory_space<vmem>>, vector<1x1x64xf32>
    %462 = vector.shape_cast %461 : vector<1x1x64xf32> to vector<1x64xf32>
    %463 = vector.broadcast %462 : vector<1x64xf32> to vector<24x64xf32>
    %464 = arith.addf %460, %463 : vector<24x64xf32>
    %cst_262 = arith.constant 0.00999999977 : f32
    %465 = vector.broadcast %cst_262 : f32 to vector<24x64xf32>
    %466 = arith.cmpf ogt, %464, %465 : vector<24x64xf32>
    %cst_263 = arith.constant 0.00999999977 : f32
    %467 = vector.broadcast %cst_263 : f32 to vector<24x64xf32>
    %468 = arith.subf %464, %467 : vector<24x64xf32>
    %cst_264 = arith.constant -0.00999999977 : f32
    %469 = vector.broadcast %cst_264 : f32 to vector<24x64xf32>
    %470 = arith.cmpf olt, %464, %469 : vector<24x64xf32>
    %cst_265 = arith.constant 0.00999999977 : f32
    %471 = vector.broadcast %cst_265 : f32 to vector<24x64xf32>
    %472 = arith.addf %464, %471 : vector<24x64xf32>
    %cst_266 = arith.constant 0.000000e+00 : f32
    %473 = vector.broadcast %cst_266 : f32 to vector<24x64xf32>
    %474 = arith.select %470, %472, %473 : vector<24x64xi1>, vector<24x64xf32>
    %475 = arith.select %466, %468, %474 : vector<24x64xi1>, vector<24x64xf32>
    %476 = vector.extract_strided_slice %475 {offsets = [0, 0], sizes = [24, 32], strides = [1, 1]} : vector<24x64xf32> to vector<24x32xf32>
    %477 = vector.extract_strided_slice %475 {offsets = [0, 32], sizes = [24, 32], strides = [1, 1]} : vector<24x64xf32> to vector<24x32xf32>
    %cst_267 = arith.constant dense<0.000000e+00> : vector<32x32xf32>
    %478 = tpu.matmul %10, %476, %cst_267 {dimension_numbers = #tpu.dot_dimension_numbers<[1], [0], [0], [1], [0, 0, 1, 1], [], []>} : vector<32x24xf32>, vector<24x32xf32>, vector<32x32xf32> -> vector<32x32xf32>
    %cst_268 = arith.constant dense<0.000000e+00> : vector<32x32xf32>
    %479 = tpu.matmul %11, %477, %cst_268 {dimension_numbers = #tpu.dot_dimension_numbers<[1], [0], [0], [1], [0, 0, 1, 1], [], []>} : vector<32x24xf32>, vector<24x32xf32>, vector<32x32xf32> -> vector<32x32xf32>
    %480 = arith.addf %478, %479 : vector<32x32xf32>
    %481 = arith.addf %480, %404 : vector<32x32xf32>
    %c1_269 = arith.constant 1 : index
    %c0_270 = arith.constant 0 : index
    %c0_271 = arith.constant 0 : index
    %482 = vector.load %arg13[%c1_269, %c0_270, %c0_271] : memref<2x32x128xf32, #tpu.memory_space<vmem>>, vector<1x32x128xf32>
    %483 = vector.shape_cast %482 : vector<1x32x128xf32> to vector<32x128xf32>
    %cst_272 = arith.constant dense<0.000000e+00> : vector<32x128xf32>
    %484 = tpu.matmul %481, %483, %cst_272 {dimension_numbers = #tpu.dot_dimension_numbers<[1], [0], [0], [1], [0, 0, 1, 1], [], []>} : vector<32x32xf32>, vector<32x128xf32>, vector<32x128xf32> -> vector<32x128xf32>
    %c1_273 = arith.constant 1 : index
    %c0_274 = arith.constant 0 : index
    %c0_275 = arith.constant 0 : index
    %485 = vector.load %arg14[%c1_273, %c0_274, %c0_275] : memref<2x1x128xf32, #tpu.memory_space<vmem>>, vector<1x1x128xf32>
    %486 = vector.shape_cast %485 : vector<1x1x128xf32> to vector<1x128xf32>
    %487 = vector.broadcast %486 : vector<1x128xf32> to vector<32x128xf32>
    %488 = arith.addf %484, %487 : vector<32x128xf32>
    %cst_276 = arith.constant 5.000000e-01 : f32
    %489 = vector.broadcast %cst_276 : f32 to vector<32x128xf32>
    %490 = arith.mulf %489, %488 : vector<32x128xf32>
    %cst_277 = arith.constant 0.707106769 : f32
    %491 = vector.broadcast %cst_277 : f32 to vector<32x128xf32>
    %492 = arith.mulf %488, %491 : vector<32x128xf32>
    %493 = math.absf %492 : vector<32x128xf32>
    %cst_278 = arith.constant 0.327591091 : f32
    %494 = vector.broadcast %cst_278 : f32 to vector<32x128xf32>
    %495 = arith.mulf %494, %493 : vector<32x128xf32>
    %cst_279 = arith.constant 1.000000e+00 : f32
    %496 = vector.broadcast %cst_279 : f32 to vector<32x128xf32>
    %497 = arith.addf %496, %495 : vector<32x128xf32>
    %cst_280 = arith.constant 1.000000e+00 : f32
    %498 = vector.broadcast %cst_280 : f32 to vector<32x128xf32>
    %499 = arith.divf %498, %497 : vector<32x128xf32>
    %cst_281 = arith.constant 1.06140542 : f32
    %500 = vector.broadcast %cst_281 : f32 to vector<32x128xf32>
    %501 = arith.mulf %500, %499 : vector<32x128xf32>
    %cst_282 = arith.constant -1.45315206 : f32
    %502 = vector.broadcast %cst_282 : f32 to vector<32x128xf32>
    %503 = arith.addf %501, %502 : vector<32x128xf32>
    %504 = arith.mulf %503, %499 : vector<32x128xf32>
    %cst_283 = arith.constant 1.42141378 : f32
    %505 = vector.broadcast %cst_283 : f32 to vector<32x128xf32>
    %506 = arith.addf %504, %505 : vector<32x128xf32>
    %507 = arith.mulf %506, %499 : vector<32x128xf32>
    %cst_284 = arith.constant -0.284496725 : f32
    %508 = vector.broadcast %cst_284 : f32 to vector<32x128xf32>
    %509 = arith.addf %507, %508 : vector<32x128xf32>
    %510 = arith.mulf %509, %499 : vector<32x128xf32>
    %cst_285 = arith.constant 0.254829586 : f32
    %511 = vector.broadcast %cst_285 : f32 to vector<32x128xf32>
    %512 = arith.addf %510, %511 : vector<32x128xf32>
    %513 = arith.mulf %512, %499 : vector<32x128xf32>
    %cst_286 = arith.constant 0.000000e+00 : f32
    %514 = vector.broadcast %cst_286 : f32 to vector<32x128xf32>
    %515 = arith.subf %514, %493 : vector<32x128xf32>
    %516 = arith.mulf %515, %493 : vector<32x128xf32>
    %517 = math.exp %516 : vector<32x128xf32>
    %518 = arith.mulf %513, %517 : vector<32x128xf32>
    %cst_287 = arith.constant 1.000000e+00 : f32
    %519 = vector.broadcast %cst_287 : f32 to vector<32x128xf32>
    %520 = arith.subf %519, %518 : vector<32x128xf32>
    %cst_288 = arith.constant 0.000000e+00 : f32
    %521 = vector.broadcast %cst_288 : f32 to vector<32x128xf32>
    %522 = arith.cmpf oge, %492, %521 : vector<32x128xf32>
    %cst_289 = arith.constant 0.000000e+00 : f32
    %523 = vector.broadcast %cst_289 : f32 to vector<32x128xf32>
    %524 = arith.subf %523, %520 : vector<32x128xf32>
    %525 = arith.select %522, %520, %524 : vector<32x128xi1>, vector<32x128xf32>
    %cst_290 = arith.constant 1.000000e+00 : f32
    %526 = vector.broadcast %cst_290 : f32 to vector<32x128xf32>
    %527 = arith.addf %526, %525 : vector<32x128xf32>
    %528 = arith.mulf %490, %527 : vector<32x128xf32>
    %c1_291 = arith.constant 1 : index
    %c0_292 = arith.constant 0 : index
    %c0_293 = arith.constant 0 : index
    %529 = vector.load %arg15[%c1_291, %c0_292, %c0_293] : memref<2x128x32xf32, #tpu.memory_space<vmem>>, vector<1x128x32xf32>
    %530 = vector.shape_cast %529 : vector<1x128x32xf32> to vector<128x32xf32>
    %cst_294 = arith.constant dense<0.000000e+00> : vector<32x32xf32>
    %531 = tpu.matmul %528, %530, %cst_294 {dimension_numbers = #tpu.dot_dimension_numbers<[1], [0], [0], [1], [0, 0, 1, 1], [], []>} : vector<32x128xf32>, vector<128x32xf32>, vector<32x32xf32> -> vector<32x32xf32>
    %c1_295 = arith.constant 1 : index
    %c0_296 = arith.constant 0 : index
    %c0_297 = arith.constant 0 : index
    %532 = vector.load %arg16[%c1_295, %c0_296, %c0_297] : memref<2x1x32xf32, #tpu.memory_space<vmem>>, vector<1x1x32xf32>
    %533 = vector.shape_cast %532 : vector<1x1x32xf32> to vector<1x32xf32>
    %534 = vector.broadcast %533 : vector<1x32xf32> to vector<32x32xf32>
    %535 = arith.addf %531, %534 : vector<32x32xf32>
    %c0_298 = arith.constant 0 : index
    %c0_299 = arith.constant 0 : index
    %536 = vector.load %arg18[%c0_298, %c0_299] : memref<1x128xf32, #tpu.memory_space<vmem>>, vector<1x128xf32>
    %c0_300 = arith.constant 0 : index
    %c0_301 = arith.constant 0 : index
    %c0_302 = arith.constant 0 : index
    %537 = vector.load %arg17[%c0_300, %c0_301, %c0_302] : memref<2x32x128xf32, #tpu.memory_space<vmem>>, vector<1x32x128xf32>
    %538 = vector.shape_cast %537 : vector<1x32x128xf32> to vector<32x128xf32>
    %cst_303 = arith.constant dense<0.000000e+00> : vector<32x128xf32>
    %539 = tpu.matmul %273, %538, %cst_303 {dimension_numbers = #tpu.dot_dimension_numbers<[1], [0], [0], [1], [0, 0, 1, 1], [], []>} : vector<32x32xf32>, vector<32x128xf32>, vector<32x128xf32> -> vector<32x128xf32>
    %540 = vector.broadcast %536 : vector<1x128xf32> to vector<32x128xf32>
    %541 = arith.addf %540, %539 : vector<32x128xf32>
    %c1_304 = arith.constant 1 : index
    %c0_305 = arith.constant 0 : index
    %c0_306 = arith.constant 0 : index
    %542 = vector.load %arg17[%c1_304, %c0_305, %c0_306] : memref<2x32x128xf32, #tpu.memory_space<vmem>>, vector<1x32x128xf32>
    %543 = vector.shape_cast %542 : vector<1x32x128xf32> to vector<32x128xf32>
    %cst_307 = arith.constant dense<0.000000e+00> : vector<32x128xf32>
    %544 = tpu.matmul %535, %543, %cst_307 {dimension_numbers = #tpu.dot_dimension_numbers<[1], [0], [0], [1], [0, 0, 1, 1], [], []>} : vector<32x32xf32>, vector<32x128xf32>, vector<32x128xf32> -> vector<32x128xf32>
    %545 = arith.addf %541, %544 : vector<32x128xf32>
    %cst_308 = arith.constant 5.000000e-01 : f32
    %546 = vector.broadcast %cst_308 : f32 to vector<32x128xf32>
    %547 = arith.mulf %546, %545 : vector<32x128xf32>
    %cst_309 = arith.constant 0.707106769 : f32
    %548 = vector.broadcast %cst_309 : f32 to vector<32x128xf32>
    %549 = arith.mulf %545, %548 : vector<32x128xf32>
    %550 = math.absf %549 : vector<32x128xf32>
    %cst_310 = arith.constant 0.327591091 : f32
    %551 = vector.broadcast %cst_310 : f32 to vector<32x128xf32>
    %552 = arith.mulf %551, %550 : vector<32x128xf32>
    %cst_311 = arith.constant 1.000000e+00 : f32
    %553 = vector.broadcast %cst_311 : f32 to vector<32x128xf32>
    %554 = arith.addf %553, %552 : vector<32x128xf32>
    %cst_312 = arith.constant 1.000000e+00 : f32
    %555 = vector.broadcast %cst_312 : f32 to vector<32x128xf32>
    %556 = arith.divf %555, %554 : vector<32x128xf32>
    %cst_313 = arith.constant 1.06140542 : f32
    %557 = vector.broadcast %cst_313 : f32 to vector<32x128xf32>
    %558 = arith.mulf %557, %556 : vector<32x128xf32>
    %cst_314 = arith.constant -1.45315206 : f32
    %559 = vector.broadcast %cst_314 : f32 to vector<32x128xf32>
    %560 = arith.addf %558, %559 : vector<32x128xf32>
    %561 = arith.mulf %560, %556 : vector<32x128xf32>
    %cst_315 = arith.constant 1.42141378 : f32
    %562 = vector.broadcast %cst_315 : f32 to vector<32x128xf32>
    %563 = arith.addf %561, %562 : vector<32x128xf32>
    %564 = arith.mulf %563, %556 : vector<32x128xf32>
    %cst_316 = arith.constant -0.284496725 : f32
    %565 = vector.broadcast %cst_316 : f32 to vector<32x128xf32>
    %566 = arith.addf %564, %565 : vector<32x128xf32>
    %567 = arith.mulf %566, %556 : vector<32x128xf32>
    %cst_317 = arith.constant 0.254829586 : f32
    %568 = vector.broadcast %cst_317 : f32 to vector<32x128xf32>
    %569 = arith.addf %567, %568 : vector<32x128xf32>
    %570 = arith.mulf %569, %556 : vector<32x128xf32>
    %cst_318 = arith.constant 0.000000e+00 : f32
    %571 = vector.broadcast %cst_318 : f32 to vector<32x128xf32>
    %572 = arith.subf %571, %550 : vector<32x128xf32>
    %573 = arith.mulf %572, %550 : vector<32x128xf32>
    %574 = math.exp %573 : vector<32x128xf32>
    %575 = arith.mulf %570, %574 : vector<32x128xf32>
    %cst_319 = arith.constant 1.000000e+00 : f32
    %576 = vector.broadcast %cst_319 : f32 to vector<32x128xf32>
    %577 = arith.subf %576, %575 : vector<32x128xf32>
    %cst_320 = arith.constant 0.000000e+00 : f32
    %578 = vector.broadcast %cst_320 : f32 to vector<32x128xf32>
    %579 = arith.cmpf oge, %549, %578 : vector<32x128xf32>
    %cst_321 = arith.constant 0.000000e+00 : f32
    %580 = vector.broadcast %cst_321 : f32 to vector<32x128xf32>
    %581 = arith.subf %580, %577 : vector<32x128xf32>
    %582 = arith.select %579, %577, %581 : vector<32x128xi1>, vector<32x128xf32>
    %cst_322 = arith.constant 1.000000e+00 : f32
    %583 = vector.broadcast %cst_322 : f32 to vector<32x128xf32>
    %584 = arith.addf %583, %582 : vector<32x128xf32>
    %585 = arith.mulf %547, %584 : vector<32x128xf32>
    %c0_323 = arith.constant 0 : index
    %c0_324 = arith.constant 0 : index
    %586 = vector.load %arg19[%c0_323, %c0_324] : memref<128x32xf32, #tpu.memory_space<vmem>>, vector<128x32xf32>
    %cst_325 = arith.constant dense<0.000000e+00> : vector<32x32xf32>
    %587 = tpu.matmul %585, %586, %cst_325 {dimension_numbers = #tpu.dot_dimension_numbers<[1], [0], [0], [1], [0, 0, 1, 1], [], []>} : vector<32x128xf32>, vector<128x32xf32>, vector<32x32xf32> -> vector<32x32xf32>
    %c0_326 = arith.constant 0 : index
    %c0_327 = arith.constant 0 : index
    %588 = vector.load %arg20[%c0_326, %c0_327] : memref<1x32xf32, #tpu.memory_space<vmem>>, vector<1x32xf32>
    %589 = vector.broadcast %588 : vector<1x32xf32> to vector<32x32xf32>
    %590 = arith.addf %587, %589 : vector<32x32xf32>
    %cst_328 = arith.constant 0.000000e+00 : f32
    %591 = vector.broadcast %cst_328 : f32 to vector<32x32xf32>
    %592 = arith.subf %591, %590 : vector<32x32xf32>
    %593 = math.exp %592 : vector<32x32xf32>
    %cst_329 = arith.constant 1.000000e+00 : f32
    %594 = vector.broadcast %cst_329 : f32 to vector<32x32xf32>
    %595 = arith.addf %593, %594 : vector<32x32xf32>
    %c0_330 = arith.constant 0 : index
    %c0_331 = arith.constant 0 : index
    %596 = vector.load %arg21[%c0_330, %c0_331] : memref<32x32xf32, #tpu.memory_space<vmem>>, vector<32x32xf32>
    tpu.vector_store %arg21[%c0_330, %c0_331], %595 {strides = array<i32>} : memref<32x32xf32, #tpu.memory_space<vmem>>, vector<32x32xf32>,
    %c0_332 = arith.constant 0 : index
    %c0_333 = arith.constant 0 : index
    %597 = vector.load %arg21[%c0_332, %c0_333] : memref<32x32xf32, #tpu.memory_space<vmem>>, vector<32x32xf32>
    %598 = tpu.reciprocal %597 {approx = true} : vector<32x32xf32> -> vector<32x32xf32>
    %c0_334 = arith.constant 0 : index
    %c0_335 = arith.constant 0 : index
    %599 = vector.load %arg21[%c0_334, %c0_335] : memref<32x32xf32, #tpu.memory_space<vmem>>, vector<32x32xf32>
    tpu.vector_store %arg21[%c0_334, %c0_335], %598 {strides = array<i32>} : memref<32x32xf32, #tpu.memory_space<vmem>>, vector<32x32xf32>,
    return
  }
}

</mosaic_0001>

<bundles_post_ra>
// kernel: forward.1
= control target key start
LH: loop header
LB: loop body
LE: loop exit
PB: predicated region body
PF: predicated region fallthrough
CT: control target
= control target key end

     0   :  { %vm87_vm0 = vcmask 523264   ;;  %v6445_v12 = vmov 0.0   ;;  %vm6446_vm1 = vmmov 0   ;;  %vm207_vm2 = vcmask 261120   ;;  %s6447_s28 = smov 96   ;;  %s8100_s1 = inlined_call_operand.vmem [shape: f32[64,32], index: 1, kind: input, shape index: {}]   ;;  %s8101_s0 = inlined_call_operand.vmem [shape: f32[32,64], index: 0, kind: input, shape index: {}]   ;;  %s8102_s2 = inlined_call_operand.vmem [shape: f32[1,32], index: 2, kind: input, shape index: {}]   ;;  %s8103_s3 = inlined_call_operand.vmem [shape: f32[32,32], index: 3, kind: input, shape index: {}]   ;;  %s8104_s4 = inlined_call_operand.vmem [shape: f32[24,32], index: 4, kind: input, shape index: {}]   ;;  %s8105_s5 = inlined_call_operand.vmem [shape: f32[24,32], index: 5, kind: input, shape index: {}]   ;;  %s8106_s8 = inlined_call_operand.vmem [shape: f32[2,32,64], index: 8, kind: input, shape index: {}]   ;;  %s8107_s9 = inlined_call_operand.vmem [shape: f32[2,32,64], index: 9, kind: input, shape index: {}]   ;;  %s8108_s11 = inlined_call_operand.vmem [shape: f32[2,64,64], index: 11, kind: input, shape index: {}]   ;;  %s8109_s10 = inlined_call_operand.vmem [shape: f32[2,1,64], index: 10, kind: input, shape index: {}]   ;;  %s8110_s12 = inlined_call_operand.vmem [shape: f32[2,1,64], index: 12, kind: input, shape index: {}]   ;;  %s8111_s7 = inlined_call_operand.vmem [shape: f32[32,24], index: 7, kind: input, shape index: {}]   ;;  %s8112_s6 = inlined_call_operand.vmem [shape: f32[32,24], index: 6, kind: input, shape index: {}]   ;;  %s8113_s13 = inlined_call_operand.vmem [shape: f32[2,32,128], index: 13, kind: input, shape index: {}]   ;;  %s8114_s15 = inlined_call_operand.vmem [shape: f32[2,128,32], index: 15, kind: input, shape index: {}]   ;;  %s8115_s14 = inlined_call_operand.vmem [shape: f32[2,1,128], index: 14, kind: input, shape index: {}]   ;;  %s8116_s16 = inlined_call_operand.vmem [shape: f32[2,1,32], index: 16, kind: input, shape index: {}]   ;;  %s8117_s17 = inlined_call_operand.vmem [shape: f32[2,32,128], index: 17, kind: input, shape index: {}]   ;;  %s8118_s19 = inlined_call_operand.vmem [shape: f32[128,32], index: 19, kind: input, shape index: {}]   ;;  %s8119_s18 = inlined_call_operand.vmem [shape: f32[1,128], index: 18, kind: input, shape index: {}]   ;;  %s8120_s20 = inlined_call_operand.vmem [shape: f32[1,32], index: 20, kind: input, shape index: {}]   ;;  %s8121_s21 = inlined_call_operand.vmem [shape: f32[32,32], index: 21, kind: output, shape index: {}]  }
   0x1   :  { %8127 = sst [smem:[#allocation2_spill]] %s8100_s1  ;;  %5459 = vmatprep.subr.mxu1 %v6445_v12  ;;  %5467 = vmatprep.mubr.msk.f32.mxu1 %vm6446_vm1, %v6445_v12  ;;  %v389_v34 = vld [vmem:[%s8106_s8 + $0x18] sm:$0xff]  ;;  %v388_v35 = vld [vmem:[%s8106_s8 + $0x10] sm:$0xff]  ;;  %v387_v37 = vld [vmem:[%s8106_s8 + $0x8] sm:$0xff]  ;;  %vm797_vm8 = vcmask 195584  }
   0x2   :  { %8128 = sst [smem:[#allocation3_spill]] %s8101_s0  ;;  %v386_v39 = vld [vmem:[%s8106_s8] sm:$0xff]  ;;  %v393_v40 = vld [vmem:[%s8107_s9 + $0x18] sm:$0xff]  ;;  %v392_v41 = vld [vmem:[%s8107_s9 + $0x10] sm:$0xff] }
   0x3   :  { %8129 = sst [smem:[#allocation4_spill]] %s8102_s2  ;;  %v391_v42 = vld [vmem:[%s8107_s9 + $0x8] sm:$0xff]  ;;  %v390_v43 = vld [vmem:[%s8107_s9] sm:$0xff]  ;;  %v670_v56 = vld [vmem:[%s8108_s11 + $0x38] sm:$0xff] }
   0x4   :  { %8130 = sst [smem:[#allocation5_spill]] %s8103_s3  ;;  %v669_v57 = vld [vmem:[%s8108_s11 + $0x30] sm:$0xff]  ;;  %v668_v58 = vld [vmem:[%s8108_s11 + $0x28] sm:$0xff]  ;;  %v667_v59 = vld [vmem:[%s8108_s11 + $0x20] sm:$0xff] }
   0x5   :  { %8131 = sst [smem:[#allocation6_spill]] %s8104_s4  ;;  %v666_v60 = vld [vmem:[%s8108_s11 + $0x18] sm:$0xff]  ;;  %v665_v61 = vld [vmem:[%s8108_s11 + $0x10] sm:$0xff]  ;;  %v664_v62 = vld [vmem:[%s8108_s11 + $0x8] sm:$0xff] }
   0x6   :  { %8132 = sst [smem:[#allocation7_spill]] %s8105_s5  ;;  %v663_v63 = vld [vmem:[%s8108_s11] sm:$0xff] }
   0x7   :  { %s8133_s26 = sld [smem:[#allocation2_spill]] }
   0x8   :  { %s8134_s30 = sld [smem:[#allocation3_spill]] }
   0x9   :  { %s8135_s24 = sld [smem:[#allocation4_spill]] }
   0xa   :  { %s8136_s25 = sld [smem:[#allocation5_spill]] }
   0xb   :  { %s8137_s23 = sld [smem:[#allocation6_spill]] }
   0xc   :  { %s8138_s27 = sld [smem:[#allocation7_spill]] }
   0xd   :  { %v79_v0 = vld [vmem:[%s8133_s26 + $0x38] sm:$0xff]  ;;  %v78_v1 = vld [vmem:[%s8133_s26 + $0x30] sm:$0xff]  ;;  %v77_v2 = vld [vmem:[%s8133_s26 + $0x28] sm:$0xff] }
   0xe   :  { %5437 = vmatprep.subr.mxu0 %v79_v0  ;;  %v68_v3 = vld [vmem:[%s8134_s30] sm:$0xff]  ;;  %v75_v5 = vld [vmem:[%s8133_s26 + $0x18] sm:$0xff]  ;;  %v74_v6 = vld [vmem:[%s8133_s26 + $0x10] sm:$0xff] }
   0xf   :  { %5438 = vmatpush3.msra.mxu0 %v79_v0  ;;  %5453 = vmatprep.mubr.msk.f32.mxu0 %vm87_vm0, %v68_v3  ;;  %v76_v4 = vld [vmem:[%s8133_s26 + $0x20] sm:$0xff]  ;;  %v73_v7 = vld [vmem:[%s8133_s26 + $0x8] sm:$0xff]  ;;  %v70_v10 = vld [vmem:[%s8134_s30 + $0x10] sm:$0xff] }
  0x10   :  { %5439 = vmatprep.subr.mxu0 %v78_v1  ;;  %v72_v8 = vld [vmem:[%s8133_s26] sm:$0xff]  ;;  %v69_v9 = vld [vmem:[%s8134_s30 + $0x8] sm:$0xff]  ;;  %v71_v11 = vld [vmem:[%s8134_s30 + $0x18] sm:$0xff] }
  0x11   :  { %5440 = vmatpush3.msra.mxu0 %v78_v1  ;;  %v4878_v15 = vld [vmem:[%s8135_s24] ss:$0 sm:$0xff]  ;;  %v188_v17 = vld [vmem:[%s8136_s25 + $0x18] sm:$0xff]  ;;  %v187_v20 = vld [vmem:[%s8136_s25 + $0x10] sm:$0xff] }
  0x12   :  { %5441 = vmatprep.subr.mxu0 %v77_v2  ;;  %v186_v24 = vld [vmem:[%s8136_s25 + $0x8] sm:$0xff]  ;;  %v185_v27 = vld [vmem:[%s8136_s25] sm:$0xff]  ;;  %v195_v32 = vld [vmem:[%s8137_s23 + $0x10] sm:$0xff] }
  0x13   :  { %5442 = vmatpush3.msra.mxu0 %v77_v2  ;;  %v193_v30 = vld [vmem:[%s8137_s23] sm:$0xff]  ;;  %v194_v31 = vld [vmem:[%s8137_s23 + $0x8] sm:$0xff]  ;;  %v6693_v38 = vld [vmem:[%s8138_s27 + $0x10] sm:$0xff] }
  0x14   :  { %5443 = vmatprep.subr.mxu0 %v76_v4  ;;  %v6664_v33 = vld [vmem:[%s8138_s27] sm:$0xff]  ;;  %v6679_v36 = vld [vmem:[%s8138_s27 + $0x8] sm:$0xff] }
  0x15   :  { %5444 = vmatpush3.msra.mxu0 %v76_v4 }
  0x16   :  { %5445 = vmatprep.subr.mxu0 %v75_v5 }
  0x17   :  { %5446 = vmatpush3.msra.mxu0 %v75_v5 }
  0x18   :  { %5447 = vmatprep.subr.mxu0 %v74_v6 }
  0x19   :  { %5448 = vmatpush3.msra.mxu0 %v74_v6 }
  0x1a   :  { %5449 = vmatprep.subr.mxu0 %v73_v7 }
  0x1b   :  { %5450 = vmatpush3.msra.mxu0 %v73_v7  ;;  %v4895_v7 = vld [vmem:[%s8109_s10] ss:$0 sm:$0xff] }
  0x1c   :  { %5451 = vmatprep.subr.mxu0 %v72_v8 }
  0x1d   :  { %5452 = vmatpush3.msra.mxu0 %v72_v8 }
  0x1e   :  { %5454 = vmatmul.mubr.msk.f32.vlgmr.msra.gmra.mxu0 %vm87_vm0, %v69_v9  ;;  %5493 = vmatprep.subr.mxu0 %v6445_v12 }
  0x1f   :  { %5456 = vmatprep.mubr.msk.f32.mxu0 %vm87_vm0, %v70_v10  ;;  %5494 = vmatpush3.msra.mxu0 %v393_v40 }
  0x20   :  { %5495 = vmatprep.subr.mxu0 %v6445_v12 }
  0x21   :  { %5496 = vmatpush3.msra.mxu0 %v392_v41 }
  0x22   :  { %5457 = vmatmul.mubr.msk.f32.gmra.mxu0 %vm87_vm0, %v71_v11  ;;  %5497 = vmatprep.subr.mxu0 %v6445_v12 }
  0x23   :  { %5501 = vmatprep.mubr.msk.f32.mxu0 %vm6446_vm1, %v6445_v12  ;;  %5498 = vmatpush3.msra.mxu0 %v391_v42 }
  0x24   :  { %5499 = vmatprep.subr.mxu0 %v6445_v12 }
  0x25   :  { %5500 = vmatpush3.msra.mxu0 %v390_v43 }
  0x26   :  { %5527 = vmatprep.subr.mxu0 %v6445_v12 }
  0xde   :  { %v5455_v13 = vpop.f32.mrf.mxu0 }
  0xdf   :  { %v172_v21 = vadd.f32 %v5455_v13, %v4878_v15 }
  0xe0   :  { %v166_v14 = vpop.f32.mrf.mxu0 }
  0xe1   :  { %v167_v25 = vadd.f32 %v4878_v15, %v166_v14  ;;  %v6625_v28 = vadd.f32 %v186_v24, %v172_v21 }
  0xe2   :  { %v5458_v16 = vpop.f32.mrf.mxu0 }
  0xe3   :  { %v182_v18 = vadd.f32 %v5458_v16, %v4878_v15  ;;  %v6629_v29 = vadd.f32 %v185_v27, %v167_v25 }
  0xe4   :  { %v176_v19 = vpop.f32.mrf.mxu0 }
  0xe5   :  { %v6613_v22 = vadd.f32 %v188_v17, %v182_v18  ;;  %v177_v23 = vadd.f32 %v4878_v15, %v176_v19 }
  0xe7   :  { %v6618_v26 = vadd.f32 %v187_v20, %v177_v23  ;;  %5460 = vmatpush3.msra.mxu1 %v6613_v22 }
  0xe8   :  { %5461 = vmatprep.subr.mxu1 %v6445_v12 }
  0xe9   :  { %5462 = vmatpush3.msra.mxu1 %v6618_v26 }
  0xea   :  { %5463 = vmatprep.subr.mxu1 %v6445_v12 }
  0xeb   :  { %5464 = vmatpush3.msra.mxu1 %v6625_v28 }
  0xec   :  { %5465 = vmatprep.subr.mxu1 %v6445_v12 }
  0xed   :  { %5466 = vmatpush3.msra.mxu1 %v6629_v29 }
  0xee   :  { %5468 = vmatmul.mubr.msk.f32.vlgmr.msra.gmra.mxu1 %vm207_vm2, %v193_v30  ;;  %5476 = vmatprep.subr.mxu1 %v6445_v12 }
  0xef   :  { %5477 = vmatpush3.msra.mxu1 %v6613_v22  ;;  %5470 = vmatprep.mubr.msk.f32.mxu1 %vm6446_vm1, %v6445_v12 }
  0xf0   :  { %5478 = vmatprep.subr.mxu1 %v6445_v12 }
  0xf1   :  { %5479 = vmatpush3.msra.mxu1 %v6618_v26 }
  0xf2   :  { %5471 = vmatmul.mubr.msk.f32.gmra.mxu1 %vm207_vm2, %v194_v31  ;;  %5480 = vmatprep.subr.mxu1 %v6445_v12 }
  0xf3   :  { %5481 = vmatpush3.msra.mxu1 %v6625_v28  ;;  %5473 = vmatprep.mubr.msk.f32.mxu1 %vm6446_vm1, %v6445_v12 }
  0xf4   :  { %5482 = vmatprep.subr.mxu1 %v6445_v12 }
  0xf5   :  { %5483 = vmatpush3.msra.mxu1 %v6629_v29 }
  0xf6   :  { %5474 = vmatmul.mubr.msk.f32.gmra.mxu1 %vm207_vm2, %v195_v32  ;;  %5510 = vmatprep.subr.mxu1 %v6445_v12 }
  0xf7   :  { %5484 = vmatprep.mubr.msk.f32.mxu1 %vm6446_vm1, %v6445_v12 }
  0xfa   :  { %5485 = vmatmul.mubr.msk.f32.vlgmr.msra.gmra.mxu1 %vm207_vm2, %v6664_v33 }
  0xfb   :  { %5487 = vmatprep.mubr.msk.f32.mxu1 %vm6446_vm1, %v6445_v12  ;;  %5511 = vmatpush3.msra.mxu1 %v389_v34 }
  0xfc   :  { %5512 = vmatprep.subr.mxu1 %v6445_v12 }
  0xfd   :  { %5513 = vmatpush3.msra.mxu1 %v388_v35 }
  0xfe   :  { %5488 = vmatmul.mubr.msk.f32.gmra.mxu1 %vm207_vm2, %v6679_v36  ;;  %5514 = vmatprep.subr.mxu1 %v6445_v12 }
  0xff   :  { %5490 = vmatprep.mubr.msk.f32.mxu1 %vm6446_vm1, %v6445_v12  ;;  %5515 = vmatpush3.msra.mxu1 %v387_v37 }
 0x100   :  { %5516 = vmatprep.subr.mxu1 %v6445_v12 }
 0x101   :  { %5517 = vmatpush3.msra.mxu1 %v386_v39 }
 0x102   :  { %5491 = vmatmul.mubr.msk.f32.gmra.mxu1 %vm207_vm2, %v6693_v38 }
 0x103   :  { %5518 = vmatprep.mubr.msk.f32.mxu1 %vm6446_vm1, %v6445_v12 }
 0x1ae   :  { %v283_v44 = vpop.f32.mrf.mxu1 }
 0x1af   :  { %5519 = vmatmul.mubr.msk.f32.vlgmr.msra.gmra.mxu1 %vm207_vm2, %v283_v44 }
 0x1b0   :  { %v5469_v45 = vpop.f32.mrf.mxu1  ;;  %5521 = vmatprep.mubr.msk.f32.mxu1 %vm6446_vm1, %v6445_v12 }
 0x1b2   :  { %v288_v46 = vpop.f32.mrf.mxu1 }
 0x1b3   :  { %5522 = vmatmul.mubr.msk.f32.gmra.mxu1 %vm207_vm2, %v288_v46 }
 0x1b4   :  { %v5472_v47 = vpop.f32.mrf.mxu1  ;;  %5524 = vmatprep.mubr.msk.f32.mxu1 %vm6446_vm1, %v6445_v12 }
 0x1b6   :  { %v293_v48 = vpop.f32.mrf.mxu1 }
 0x1b7   :  { %5525 = vmatmul.mubr.msk.f32.gmra.mxu1 %vm207_vm2, %v293_v48 }
 0x1b8   :  { %v5475_v49 = vpop.f32.mrf.mxu1 }
 0x1ba   :  { %v372_v50 = vpop.f32.mrf.mxu1 }
 0x1bb   :  { %5502 = vmatmul.mubr.msk.f32.vlgmr.msra.gmra.mxu0 %vm207_vm2, %v372_v50 }
 0x1bc   :  { %v5486_v51 = vpop.f32.mrf.mxu1  ;;  %5504 = vmatprep.mubr.msk.f32.mxu0 %vm6446_vm1, %v6445_v12  ;;  %5528 = vmatpush3.msra.mxu0 %v670_v56 }
 0x1bd   :  { %5529 = vmatprep.subr.mxu0 %v6445_v12 }
 0x1be   :  { %v377_v52 = vpop.f32.mrf.mxu1  ;;  %5530 = vmatpush3.msra.mxu0 %v669_v57 }
 0x1bf   :  { %5505 = vmatmul.mubr.msk.f32.gmra.mxu0 %vm207_vm2, %v377_v52  ;;  %5531 = vmatprep.subr.mxu0 %v6445_v12 }
 0x1c0   :  { %v5489_v53 = vpop.f32.mrf.mxu1  ;;  %5507 = vmatprep.mubr.msk.f32.mxu0 %vm6446_vm1, %v6445_v12  ;;  %5532 = vmatpush3.msra.mxu0 %v668_v58 }
 0x1c1   :  { %5533 = vmatprep.subr.mxu0 %v6445_v12 }
 0x1c2   :  { %v382_v54 = vpop.f32.mrf.mxu1  ;;  %5534 = vmatpush3.msra.mxu0 %v667_v59 }
 0x1c3   :  { %5508 = vmatmul.mubr.msk.f32.gmra.mxu0 %vm207_vm2, %v382_v54  ;;  %5535 = vmatprep.subr.mxu0 %v6445_v12 }
 0x1c4   :  { %v5492_v55 = vpop.f32.mrf.mxu1  ;;  %5543 = vmatprep.mubr.msk.f32.mxu0 %vm6446_vm1, %v6445_v12  ;;  %5536 = vmatpush3.msra.mxu0 %v666_v60 }
 0x1c5   :  { %5537 = vmatprep.subr.mxu0 %v6445_v12 }
 0x1c6   :  { %5538 = vmatpush3.msra.mxu0 %v665_v61 }
 0x1c7   :  { %5539 = vmatprep.subr.mxu0 %v6445_v12 }
 0x1c8   :  { %5540 = vmatpush3.msra.mxu0 %v664_v62 }
 0x1c9   :  { %5541 = vmatprep.subr.mxu0 %v6445_v12 }
 0x1ca   :  { %5542 = vmatpush3.msra.mxu0 %v663_v63 }
 0x26f   :  { %v558_v0 = vpop.f32.mrf.mxu1 }
 0x271   :  { %v5520_v1 = vpop.f32.mrf.mxu1 }
 0x273   :  { %v563_v2 = vpop.f32.mrf.mxu1 }
 0x275   :  { %v5523_v3 = vpop.f32.mrf.mxu1 }
 0x277   :  { %v568_v4 = vpop.f32.mrf.mxu1 }
 0x279   :  { %v5526_v5 = vpop.f32.mrf.mxu1 }
 0x27b   :  { %v469_v6 = vpop.f32.mrf.mxu0 }
 0x27c   :  { %v559_v8 = vadd.f32 %v558_v0, %v469_v6 }
 0x27d   :  { %v5503_v9 = vpop.f32.mrf.mxu0 }
 0x27e   :  { %v6769_v10 = vadd.f32 %v4895_v7, %v559_v8 }
 0x27f   :  { %v474_v11 = vpop.f32.mrf.mxu0 }
 0x280   :  { %v6772_v13 = vmul.f32 0.70710677, %v6769_v10  ;;  %v564_v14 = vadd.f32 %v563_v2, %v474_v11 }
 0x281   :  { %v5506_v15 = vpop.f32.mrf.mxu0 }
 0x282   :  { %v588_v16 = vand.u32 2147483647, %v6772_v13  ;;  %v6775_v17 = vadd.f32 %v4895_v7, %v564_v14  ;;  %vm648_vm3 = vcmp.ge.f32.partialorder %v6772_v13, 0.0 }
 0x283   :  { %v479_v18 = vpop.f32.mrf.mxu0 }
 0x284   :  { %v591_v19 = vmul.f32 0.3275911, %v588_v16  ;;  %v6778_v20 = vmul.f32 0.70710677, %v6775_v17  ;;  %v569_v21 = vadd.f32 %v568_v4, %v479_v18  ;;  %v630_v37 = vsub.f32 0.0, %v588_v16 }
 0x285   :  { %v5509_v23 = vpop.f32.mrf.mxu0 }
 0x286   :  { %v594_v24 = vadd.f32 1.0, %v591_v19  ;;  %v589_v25 = vand.u32 2147483647, %v6778_v20  ;;  %v6781_v27 = vadd.f32 %v4895_v7, %v569_v21  ;;  %v633_v40 = vmul.f32 %v630_v37, %v588_v16 }
 0x287   :  { %vm649_vm4 = vcmp.ge.f32.partialorder %v6778_v20, 0.0 }
 0x288   :  { %6204 = vrcp.f32 %v594_v24  ;;  %v592_v30 = vmul.f32 0.3275911, %v589_v25  ;;  %v6784_v31 = vmul.f32 0.70710677, %v6781_v27  ;;  %v631_v41 = vsub.f32 0.0, %v589_v25 }
 0x289   :  { %v636_v44 = vmul.f32 1.442695, %v633_v40  ;;  %v584_v20 = vmul.f32 0.5, %v6781_v27 }
 0x28a   :  { %v595_v32 = vadd.f32 1.0, %v592_v30  ;;  %v590_v34 = vand.u32 2147483647, %v6784_v31  ;;  %v634_v45 = vmul.f32 %v631_v41, %v589_v25  ;;  %vm650_vm5 = vcmp.ge.f32.partialorder %v6784_v31, 0.0 }
 0x28c   :  { %6206 = vrcp.f32 %v595_v32  ;;  %v593_v35 = vmul.f32 0.3275911, %v590_v34  ;;  %v632_v46 = vsub.f32 0.0, %v590_v34  ;;  %v638_v51 = vmul.f32 1.442695, %v634_v45 }
 0x28d   :  { %v582_v32 = vmul.f32 0.5, %v6769_v10 }
 0x28e   :  { %v596_v39 = vadd.f32 1.0, %v593_v35  ;;  %v635_v52 = vmul.f32 %v632_v46, %v590_v34 }
 0x290   :  { %6208 = vrcp.f32 %v596_v39  ;;  %v640_v59 = vmul.f32 1.442695, %v635_v52 }
 0x291   :  { %6210 = vpow2.f32 %v636_v44 }
 0x292   :  { %6212 = vpow2.f32 %v638_v51 }
 0x293   :  { %6214 = vpow2.f32 %v640_v59  ;;  %v6807_v59 = vld [vmem:[%s8111_s7] sm:$0xff] }
 0x295   :  { %v6205_v42 = vpop.eup %6204 }
 0x296   :  { %v603_v43 = vmul.f32 1.0614054, %v6205_v42 }
 0x298   :  { %v606_v47 = vadd.f32 -1.4531521, %v603_v43  ;;  %v583_v43 = vmul.f32 0.5, %v6775_v17 }
 0x299   :  { %v6207_v48 = vpop.eup %6206 }
 0x29a   :  { %v609_v49 = vmul.f32 %v6205_v42, %v606_v47  ;;  %v604_v50 = vmul.f32 1.0614054, %v6207_v48 }
 0x29c   :  { %v612_v53 = vadd.f32 1.4214138, %v609_v49  ;;  %v607_v54 = vadd.f32 -1.4531521, %v604_v50 }
 0x29d   :  { %v6209_v55 = vpop.eup %6208 }
 0x29e   :  { %v615_v56 = vmul.f32 %v6205_v42, %v612_v53  ;;  %v610_v57 = vmul.f32 %v6207_v48, %v607_v54  ;;  %v605_v58 = vmul.f32 1.0614054, %v6209_v55  ;;  %v6211_v7 = vpop.eup %6210 }
 0x29f   :  { %v6213_v18 = vpop.eup %6212 }
 0x2a0   :  { %v618_v60 = vadd.f32 -0.28449672, %v615_v56  ;;  %v613_v61 = vadd.f32 1.4214138, %v610_v57  ;;  %v608_v62 = vadd.f32 -1.4531521, %v605_v58  ;;  %v6215_v37 = vpop.eup %6214 }
 0x2a2   :  { %v621_v63 = vmul.f32 %v6205_v42, %v618_v60  ;;  %v616_v0 = vmul.f32 %v6207_v48, %v613_v61  ;;  %v611_v1 = vmul.f32 %v6209_v55, %v608_v62 }
 0x2a4   :  { %v624_v2 = vadd.f32 0.2548296, %v621_v63  ;;  %v619_v3 = vadd.f32 -0.28449672, %v616_v0  ;;  %v614_v4 = vadd.f32 1.4214138, %v611_v1 }
 0x2a6   :  { %v627_v5 = vmul.f32 %v6205_v42, %v624_v2  ;;  %v622_v6 = vmul.f32 %v6207_v48, %v619_v3  ;;  %v617_v8 = vmul.f32 %v6209_v55, %v614_v4 }
 0x2a8   :  { %v642_v9 = vmul.f32 %v6211_v7, %v627_v5  ;;  %v625_v11 = vadd.f32 0.2548296, %v622_v6  ;;  %v620_v14 = vadd.f32 -0.28449672, %v617_v8  ;;  %v6816_v8 = vld [vmem:[%s8111_s7 + $0x8] sm:$0xff] }
 0x2aa   :  { %v645_v15 = vsub.f32 1.0, %v642_v9  ;;  %v628_v16 = vmul.f32 %v6207_v48, %v625_v11  ;;  %v623_v19 = vmul.f32 %v6209_v55, %v620_v14  ;;  %v4896_v48 = vld [vmem:[%s8110_s12] ss:$0 sm:$0xff]  ;;  %v6821_v9 = vld [vmem:[%s8111_s7 + $0x10] sm:$0xff]  ;;  %v6830_v11 = vld [vmem:[%s8111_s7 + $0x18] sm:$0xff] }
 0x2ab   :  { %v6835_v14 = vld [vmem:[%s8112_s6] sm:$0xff] }
 0x2ac   :  { %v651_v21 = vsub.f32 0.0, %v645_v15  ;;  %v643_v23 = vmul.f32 %v6213_v18, %v628_v16  ;;  %v626_v24 = vadd.f32 0.2548296, %v623_v19  ;;  %v6849_v16 = vld [vmem:[%s8112_s6 + $0x10] sm:$0xff]  ;;  %v6858_v18 = vld [vmem:[%s8112_s6 + $0x18] sm:$0xff] }
 0x2ad   :  { %v999_v19 = vld [vmem:[%s8113_s13 + $0x18] sm:$0xff] }
 0x2ae   :  { %v654_v25 = vsel %vm648_vm3, %v645_v15, %v651_v21  ;;  %v646_v30 = vsub.f32 1.0, %v643_v23  ;;  %v629_v35 = vmul.f32 %v6209_v55, %v626_v24  ;;  %v6844_v15 = vld [vmem:[%s8112_s6 + $0x8] sm:$0xff]  ;;  %5576 = vmatprep.subr.mxu1 %v999_v19  ;;  %v998_v21 = vld [vmem:[%s8113_s13 + $0x10] sm:$0xff]  ;;  %v996_v24 = vld [vmem:[%s8113_s13] sm:$0xff] }
 0x2af   :  { %v657_v34 = vadd.f32 1.0, %v654_v25  ;;  %5577 = vmatpush3.msra.mxu1 %v999_v19  ;;  %v997_v23 = vld [vmem:[%s8113_s13 + $0x8] sm:$0xff] }
 0x2b0   :  { %v652_v39 = vsub.f32 0.0, %v646_v30  ;;  %v644_v41 = vmul.f32 %v6215_v37, %v629_v35  ;;  %5578 = vmatprep.subr.mxu1 %v998_v21 }
 0x2b1   :  { %v660_v40 = vmul.f32 %v657_v34, %v582_v32  ;;  %5579 = vmatpush3.msra.mxu1 %v998_v21 }
 0x2b2   :  { %v655_v42 = vsel %vm649_vm4, %v646_v30, %v652_v39  ;;  %v647_v45 = vsub.f32 1.0, %v644_v41  ;;  %5580 = vmatprep.subr.mxu1 %v997_v23 }
 0x2b3   :  { %v658_v44 = vadd.f32 1.0, %v655_v42  ;;  %5544 = vmatmul.mubr.msk.f32.vlgmr.msra.gmra.mxu0 %vm87_vm0, %v660_v40  ;;  %5581 = vmatpush3.msra.mxu1 %v997_v23 }
 0x2b4   :  { %5546 = vmatprep.mubr.msk.f32.mxu0 %vm6446_vm1, %v6445_v12  ;;  %v653_v10 = vsub.f32 0.0, %v647_v45  ;;  %5582 = vmatprep.subr.mxu1 %v996_v24 }
 0x2b5   :  { %v661_v13 = vmul.f32 %v658_v44, %v583_v43  ;;  %5583 = vmatpush3.msra.mxu1 %v996_v24 }
 0x2b6   :  { %v656_v46 = vsel %vm650_vm5, %v647_v45, %v653_v10  ;;  %5628 = vmatprep.subr.mxu1 %v6445_v12 }
 0x2b7   :  { %5547 = vmatmul.mubr.msk.f32.gmra.mxu0 %vm87_vm0, %v661_v13  ;;  %v659_v47 = vadd.f32 1.0, %v656_v46 }
 0x2b8   :  { %5549 = vmatprep.mubr.msk.f32.mxu0 %vm6446_vm1, %v6445_v12 }
 0x2b9   :  { %v662_v17 = vmul.f32 %v659_v47, %v584_v20  ;;  %v1223_v20 = vld [vmem:[%s8114_s15 + $0x58] sm:$0xff]  ;;  %v1222_v47 = vld [vmem:[%s8114_s15 + $0x50] sm:$0xff] }
 0x2bb   :  { %5550 = vmatmul.mubr.msk.f32.gmra.mxu0 %vm87_vm0, %v662_v17  ;;  %v1221_v17 = vld [vmem:[%s8114_s15 + $0x48] sm:$0xff] }
 0x2bc   :  { %5558 = vmatprep.mubr.msk.f32.mxu0 %vm797_vm8, %v6807_v59 }
 0x373   :  { %v753_v49 = vpop.f32.mrf.mxu0 }
 0x374   :  { %v754_v50 = vadd.f32 %v4896_v48, %v753_v49  ;;  %v1219_v49 = vld [vmem:[%s8114_s15 + $0x38] sm:$0xff] }
 0x375   :  { %v5545_v51 = vpop.f32.mrf.mxu0 }
 0x376   :  { %v4900_v31 = vadd.f32 -0.01, %v754_v50  ;;  %vm773_vm6 = vcmp.lt.f32.partialorder %v754_v50, -0.01  ;;  %v776_v53 = vadd.f32 0.01, %v754_v50 }
 0x377   :  { %v758_v52 = vpop.f32.mrf.mxu0  ;;  %vm767_vm7 = vcmp.gt.f32.partialorder %v754_v50, 0.01  ;;  %v1218_v50 = vld [vmem:[%s8114_s15 + $0x30] sm:$0xff]  ;;  %v1217_v51 = vld [vmem:[%s8114_s15 + $0x28] sm:$0xff] }
 0x378   :  { %v779_v27 = vsel %vm773_vm6, %v776_v53, 0.0  ;;  %v759_v56 = vadd.f32 %v4896_v48, %v758_v52  ;;  %v1215_v52 = vld [vmem:[%s8114_s15 + $0x18] sm:$0xff]  ;;  %v1214_v53 = vld [vmem:[%s8114_s15 + $0x10] sm:$0xff] }
 0x379   :  { %v5548_v54 = vpop.f32.mrf.mxu0  ;;  %v782_v55 = vsel %vm767_vm7, %v4900_v31, %v779_v27  ;;  %v1216_v31 = vld [vmem:[%s8114_s15 + $0x20] sm:$0xff] }
 0x37a   :  { %788 = vrot.lane.b32.xlu1 %v782_v55, %s6447_s28  ;;  %v777_v63 = vadd.f32 0.01, %v759_v56  ;;  %vm774_vm10 = vcmp.lt.f32.partialorder %v759_v56, -0.01  ;;  %v4901_v2 = vadd.f32 -0.01, %v759_v56 }
 0x37b   :  { %v763_v57 = vpop.f32.mrf.mxu0  ;;  %vm768_vm12 = vcmp.gt.f32.partialorder %v759_v56, 0.01  ;;  %v1213_v54 = vld [vmem:[%s8114_s15 + $0x8] sm:$0xff]  ;;  %v1212_v27 = vld [vmem:[%s8114_s15] sm:$0xff] }
 0x37c   :  { %v764_v58 = vadd.f32 %v4896_v48, %v763_v57  ;;  %v780_v3 = vsel %vm774_vm10, %v777_v63, 0.0  ;;  %v1220_v48 = vld [vmem:[%s8114_s15 + $0x40] sm:$0xff] }
 0x37d   :  { %v5551_v60 = vpop.f32.mrf.mxu0  ;;  %v783_v4 = vsel %vm768_vm12, %v4901_v2, %v780_v3 }
 0x37e   :  { %v4902_v61 = vadd.f32 -0.01, %v764_v58  ;;  %vm775_vm9 = vcmp.lt.f32.partialorder %v764_v58, -0.01  ;;  %v778_v62 = vadd.f32 0.01, %v764_v58 }
 0x37f   :  { %vm769_vm11 = vcmp.gt.f32.partialorder %v764_v58, 0.01 }
 0x380   :  { %v781_v0 = vsel %vm775_vm9, %v778_v62, 0.0 }
 0x381   :  { %v784_v1 = vsel %vm769_vm11, %v4902_v61, %v781_v0 }
 0x382   :  { %792 = vrot.lane.b32.xlu0 %v784_v1, %s6447_s28 }
 0x386   :  { %790 = vrot.lane.b32.xlu0 %v783_v4, %s6447_s28 }
 0x3ec   :  { %v789_v7 = vpop.permute.xlu1 %788 }
 0x3f4   :  { %v793_v5 = vpop.permute.xlu0 %792 }
 0x3f5   :  { %5552 = vmatprep.subr.mxu0 %v793_v5 }
 0x3f6   :  { %5553 = vmatpush3.msra.mxu0 %v793_v5 }
 0x3f8   :  { %v791_v6 = vpop.permute.xlu0 %790 }
 0x3f9   :  { %5554 = vmatprep.subr.mxu0 %v791_v6 }
 0x3fa   :  { %5555 = vmatpush3.msra.mxu0 %v791_v6 }
 0x3fb   :  { %5556 = vmatprep.subr.mxu0 %v789_v7 }
 0x3fc   :  { %5557 = vmatpush3.msra.mxu0 %v789_v7 }
 0x3fd   :  { %5559 = vmatmul.mubr.msk.f32.vlgmr.msra.gmra.mxu0 %vm797_vm8, %v6816_v8  ;;  %5564 = vmatprep.subr.mxu0 %v784_v1 }
 0x3fe   :  { %5565 = vmatpush3.msra.mxu0 %v784_v1  ;;  %5561 = vmatprep.mubr.msk.f32.mxu0 %vm797_vm8, %v6821_v9 }
 0x3ff   :  { %5566 = vmatprep.subr.mxu0 %v783_v4 }
 0x400   :  { %5567 = vmatpush3.msra.mxu0 %v783_v4 }
 0x401   :  { %5562 = vmatmul.mubr.msk.f32.gmra.mxu0 %vm797_vm8, %v6830_v11  ;;  %5568 = vmatprep.subr.mxu0 %v782_v55 }
 0x402   :  { %5569 = vmatpush3.msra.mxu0 %v782_v55  ;;  %5570 = vmatprep.mubr.msk.f32.mxu0 %vm797_vm8, %v6835_v14  ;;  %v4911_v55 = vld [vmem:[%s8115_s14] ss:$0 sm:$0xff] }
 0x405   :  { %5571 = vmatmul.mubr.msk.f32.vlgmr.msra.gmra.mxu0 %vm797_vm8, %v6844_v15 }
 0x406   :  { %5573 = vmatprep.mubr.msk.f32.mxu0 %vm797_vm8, %v6849_v16 }
 0x409   :  { %5574 = vmatmul.mubr.msk.f32.gmra.mxu0 %vm797_vm8, %v6858_v18 }
 0x4bd   :  { %v5560_v25 = vpop.f32.mrf.mxu0 }
 0x4bf   :  { %v876_v30 = vpop.f32.mrf.mxu0 }
 0x4c1   :  { %v5563_v32 = vpop.f32.mrf.mxu0 }
 0x4c3   :  { %v886_v34 = vpop.f32.mrf.mxu0 }
 0x4c5   :  { %v5572_v35 = vpop.f32.mrf.mxu0 }
 0x4c6   :  { %v979_v37 = vadd.f32 %v5572_v35, %v5560_v25 }
 0x4c7   :  { %v973_v39 = vpop.f32.mrf.mxu0 }
 0x4c8   :  { %v974_v40 = vadd.f32 %v973_v39, %v876_v30  ;;  %v993_v43 = vadd.f32 %v979_v37, %v6625_v28  ;;  %v1227_v28 = vld [vmem:[%s8114_s15 + $0x78] sm:$0xff] }
 0x4c9   :  { %v5575_v41 = vpop.f32.mrf.mxu0  ;;  %5590 = vmatprep.subr.mxu0 %v1227_v28 }
 0x4ca   :  { %v992_v42 = vadd.f32 %v974_v40, %v6629_v29  ;;  %v989_v44 = vadd.f32 %v5575_v41, %v5563_v32  ;;  %5591 = vmatpush3.msra.mxu0 %v1227_v28  ;;  %v1226_v29 = vld [vmem:[%s8114_s15 + $0x70] sm:$0xff] }
 0x4cb   :  { %v983_v45 = vpop.f32.mrf.mxu0  ;;  %5592 = vmatprep.subr.mxu0 %v1226_v29 }
 0x4cc   :  { %v984_v13 = vadd.f32 %v983_v45, %v886_v34  ;;  %5584 = vmatprep.mubr.msk.f32.mxu1 %vm207_vm2, %v992_v42  ;;  %v995_v46 = vadd.f32 %v989_v44, %v6613_v22  ;;  %5593 = vmatpush3.msra.mxu0 %v1226_v29  ;;  %v1225_v22 = vld [vmem:[%s8114_s15 + $0x68] sm:$0xff] }
 0x4cd   :  { %5585 = vmatmul.mubr.msk.f32.vlgmr.msra.gmra.mxu1 %vm207_vm2, %v993_v43  ;;  %5594 = vmatprep.subr.mxu0 %v1225_v22 }
 0x4ce   :  { %v994_v10 = vadd.f32 %v984_v13, %v6618_v26  ;;  %5595 = vmatpush3.msra.mxu0 %v1225_v22  ;;  %v1224_v26 = vld [vmem:[%s8114_s15 + $0x60] sm:$0xff] }
 0x4cf   :  { %5596 = vmatprep.subr.mxu0 %v1224_v26 }
 0x4d0   :  { %5587 = vmatprep.mubr.msk.f32.mxu1 %vm207_vm2, %v994_v10  ;;  %5597 = vmatpush3.msra.mxu0 %v1224_v26 }
 0x4d1   :  { %5588 = vmatmul.mubr.msk.f32.gmra.mxu1 %vm207_vm2, %v995_v46  ;;  %5598 = vmatprep.subr.mxu0 %v1223_v20 }
 0x4d2   :  { %5636 = vmatprep.mubr.msk.f32.mxu1 %vm6446_vm1, %v6445_v12  ;;  %5599 = vmatpush3.msra.mxu0 %v1223_v20 }
 0x4d3   :  { %5600 = vmatprep.subr.mxu0 %v1222_v47 }
 0x4d4   :  { %5601 = vmatpush3.msra.mxu0 %v1222_v47 }
 0x4d5   :  { %5602 = vmatprep.subr.mxu0 %v1221_v17 }
 0x4d6   :  { %5603 = vmatpush3.msra.mxu0 %v1221_v17 }
 0x4d7   :  { %5604 = vmatprep.subr.mxu0 %v1220_v48 }
 0x4d8   :  { %5605 = vmatpush3.msra.mxu0 %v1220_v48 }
 0x4d9   :  { %5606 = vmatprep.subr.mxu0 %v1219_v49 }
 0x4da   :  { %5607 = vmatpush3.msra.mxu0 %v1219_v49 }
 0x4db   :  { %5608 = vmatprep.subr.mxu0 %v1218_v50 }
 0x4dc   :  { %5609 = vmatpush3.msra.mxu0 %v1218_v50 }
 0x4dd   :  { %5610 = vmatprep.subr.mxu0 %v1217_v51 }
 0x4de   :  { %5611 = vmatpush3.msra.mxu0 %v1217_v51 }
 0x4df   :  { %5612 = vmatprep.subr.mxu0 %v1216_v31 }
 0x4e0   :  { %5613 = vmatpush3.msra.mxu0 %v1216_v31 }
 0x4e1   :  { %5614 = vmatprep.subr.mxu0 %v1215_v52 }
 0x4e2   :  { %5615 = vmatpush3.msra.mxu0 %v1215_v52 }
 0x4e3   :  { %5616 = vmatprep.subr.mxu0 %v1214_v53 }
 0x4e4   :  { %5617 = vmatpush3.msra.mxu0 %v1214_v53 }
 0x4e5   :  { %5618 = vmatprep.subr.mxu0 %v1213_v54 }
 0x4e6   :  { %5619 = vmatpush3.msra.mxu0 %v1213_v54 }
 0x4e7   :  { %5620 = vmatprep.subr.mxu0 %v1212_v27 }
 0x4e8   :  { %5621 = vmatpush3.msra.mxu0 %v1212_v27 }
 0x4e9   :  { %5679 = vmatprep.subr.mxu0 %v6445_v12 }
 0x58d   :  { %v5586_v56 = vpop.f32.mrf.mxu1 }
 0x58e   :  { %v6937_v57 = vadd.f32 %v5586_v56, %v4911_v55 }
 0x58f   :  { %v1085_v58 = vpop.f32.mrf.mxu1 }
 0x590   :  { %v6940_v60 = vmul.f32 0.70710677, %v6937_v57  ;;  %v6942_v61 = vadd.f32 %v4911_v55, %v1085_v58 }
 0x591   :  { %v5589_v62 = vpop.f32.mrf.mxu1 }
 0x592   :  { %v1113_v63 = vand.u32 2147483647, %v6940_v60  ;;  %v6946_v0 = vmul.f32 0.70710677, %v6942_v61  ;;  %v6948_v1 = vadd.f32 %v5589_v62, %v4911_v55  ;;  %vm1193_vm13 = vcmp.ge.f32.partialorder %v6940_v60, 0.0 }
 0x593   :  { %v1095_v2 = vpop.f32.mrf.mxu1  ;;  %v1105_v60 = vmul.f32 0.5, %v6937_v57  ;;  %v4926_v57 = vld [vmem:[%s8106_s8 + $0x38] sm:$0xff] }
 0x594   :  { %v1117_v3 = vmul.f32 0.3275911, %v1113_v63  ;;  %v1112_v4 = vand.u32 2147483647, %v6946_v0  ;;  %v6952_v5 = vmul.f32 0.70710677, %v6948_v1  ;;  %v6954_v6 = vadd.f32 %v4911_v55, %v1095_v2 }
 0x595   :  { %v1169_v37 = vsub.f32 0.0, %v1113_v63  ;;  %vm1192_vm14 = vcmp.ge.f32.partialorder %v6946_v0, 0.0 }
 0x596   :  { %v1121_v7 = vadd.f32 1.0, %v1117_v3  ;;  %v1116_v19 = vmul.f32 0.3275911, %v1112_v4  ;;  %v1115_v21 = vand.u32 2147483647, %v6952_v5  ;;  %v1168_v39 = vsub.f32 0.0, %v1112_v4 }
 0x597   :  { %v6958_v23 = vmul.f32 0.70710677, %v6954_v6  ;;  %v1173_v40 = vmul.f32 %v1169_v37, %v1113_v63  ;;  %vm1195_vm15 = vcmp.ge.f32.partialorder %v6952_v5, 0.0 }
 0x598   :  { %6216 = vrcp.f32 %v1121_v7  ;;  %v1120_v24 = vadd.f32 1.0, %v1116_v19  ;;  %v1119_v25 = vmul.f32 0.3275911, %v1115_v21  ;;  %v1171_v41 = vsub.f32 0.0, %v1115_v21 }
 0x599   :  { %v1114_v30 = vand.u32 2147483647, %v6958_v23  ;;  %v1172_v43 = vmul.f32 %v1168_v39, %v1112_v4  ;;  %v1178_v45 = vmul.f32 1.442695, %v1173_v40  ;;  %vm1194_vm3 = vcmp.ge.f32.partialorder %v6958_v23, 0.0  ;;  %v4925_v23 = vld [vmem:[%s8106_s8 + $0x30] sm:$0xff] }
 0x59a   :  { %6218 = vrcp.f32 %v1120_v24  ;;  %v1123_v32 = vadd.f32 1.0, %v1119_v25  ;;  %v1175_v10 = vmul.f32 %v1171_v41, %v1115_v21 }
 0x59b   :  { %v1118_v34 = vmul.f32 0.3275911, %v1114_v30  ;;  %v1170_v13 = vsub.f32 0.0, %v1114_v30  ;;  %v1176_v29 = vmul.f32 1.442695, %v1172_v43 }
 0x59c   :  { %6220 = vrcp.f32 %v1123_v32  ;;  %v1182_v17 = vmul.f32 1.442695, %v1175_v10 }
 0x59d   :  { %v1122_v35 = vadd.f32 1.0, %v1118_v34  ;;  %v1174_v47 = vmul.f32 %v1170_v13, %v1114_v30 }
 0x59f   :  { %6222 = vrcp.f32 %v1122_v35  ;;  %v1180_v54 = vmul.f32 1.442695, %v1174_v47 }
 0x5a0   :  { %6224 = vpow2.f32 %v1178_v45 }
 0x5a1   :  { %6226 = vpow2.f32 %v1176_v29 }
 0x5a2   :  { %6228 = vpow2.f32 %v1182_v17 }
 0x5a3   :  { %6230 = vpow2.f32 %v1180_v54 }
 0x5a5   :  { %v6217_v42 = vpop.eup %6216 }
 0x5a6   :  { %v1133_v44 = vmul.f32 1.0614054, %v6217_v42 }
 0x5a7   :  { %v6219_v46 = vpop.eup %6218 }
 0x5a8   :  { %v1137_v28 = vadd.f32 -1.4531521, %v1133_v44  ;;  %v1132_v22 = vmul.f32 1.0614054, %v6219_v46 }
 0x5a9   :  { %v6221_v26 = vpop.eup %6220 }
 0x5aa   :  { %v1141_v20 = vmul.f32 %v6217_v42, %v1137_v28  ;;  %v1136_v48 = vadd.f32 -1.4531521, %v1132_v22  ;;  %v1135_v49 = vmul.f32 1.0614054, %v6221_v26 }
 0x5ac   :  { %v1145_v50 = vadd.f32 1.4214138, %v1141_v20  ;;  %v6223_v51 = vpop.eup %6222  ;;  %v1140_v31 = vmul.f32 %v6219_v46, %v1136_v48  ;;  %v1139_v52 = vadd.f32 -1.4531521, %v1135_v49 }
 0x5ad   :  { %v1134_v27 = vmul.f32 1.0614054, %v6223_v51  ;;  %v6225_v35 = vpop.eup %6224 }
 0x5ae   :  { %v1149_v53 = vmul.f32 %v6217_v42, %v1145_v50  ;;  %v1144_v55 = vadd.f32 1.4214138, %v1140_v31  ;;  %v1143_v56 = vmul.f32 %v6221_v26, %v1139_v52  ;;  %v6227_v45 = vpop.eup %6226 }
 0x5af   :  { %v1138_v62 = vadd.f32 -1.4531521, %v1134_v27  ;;  %v6229_v22 = vpop.eup %6228 }
 0x5b0   :  { %v1153_v58 = vadd.f32 -0.28449672, %v1149_v53  ;;  %v1148_v63 = vmul.f32 %v6219_v46, %v1144_v55  ;;  %v1147_v2 = vadd.f32 1.4214138, %v1143_v56  ;;  %v6231_v50 = vpop.eup %6230 }
 0x5b1   :  { %v1142_v4 = vmul.f32 %v6223_v51, %v1138_v62 }
 0x5b2   :  { %v1157_v3 = vmul.f32 %v6217_v42, %v1153_v58  ;;  %v1152_v7 = vadd.f32 -0.28449672, %v1148_v63  ;;  %v1151_v19 = vmul.f32 %v6221_v26, %v1147_v2 }
 0x5b3   :  { %v1146_v24 = vadd.f32 1.4214138, %v1142_v4 }
 0x5b4   :  { %v1161_v21 = vadd.f32 0.2548296, %v1157_v3  ;;  %v1156_v25 = vmul.f32 %v6219_v46, %v1152_v7  ;;  %v1155_v30 = vadd.f32 -0.28449672, %v1151_v19  ;;  %v1106_v3 = vmul.f32 0.5, %v6954_v6 }
 0x5b5   :  { %v1150_v34 = vmul.f32 %v6223_v51, %v1146_v24 }
 0x5b6   :  { %v1165_v32 = vmul.f32 %v6217_v42, %v1161_v21  ;;  %v1160_v37 = vadd.f32 0.2548296, %v1156_v25  ;;  %v1159_v39 = vmul.f32 %v6221_v26, %v1155_v30  ;;  %v4916_v21 = vld [vmem:[%s8116_s16] ss:$0 sm:$0xff] }
 0x5b7   :  { %v1154_v41 = vadd.f32 -0.28449672, %v1150_v34 }
 0x5b8   :  { %v1185_v40 = vmul.f32 %v6225_v35, %v1165_v32  ;;  %v1164_v43 = vmul.f32 %v6219_v46, %v1160_v37  ;;  %v1163_v44 = vadd.f32 0.2548296, %v1159_v39  ;;  %v7004_v37 = vld [vmem:[%s8137_s23] sm:$0xff]  ;;  %v7017_v39 = vld [vmem:[%s8137_s23 + $0x8] sm:$0xff] }
 0x5b9   :  { %v1158_v10 = vmul.f32 %v6223_v51, %v1154_v41  ;;  %v4923_v41 = vld [vmem:[%s8106_s8 + $0x20] sm:$0xff] }
 0x5ba   :  { %v1189_v13 = vsub.f32 1.0, %v1185_v40  ;;  %v1184_v28 = vmul.f32 %v6227_v45, %v1164_v43  ;;  %v1167_v29 = vmul.f32 %v6221_v26, %v1163_v44  ;;  %v1104_v26 = vmul.f32 0.5, %v6942_v61  ;;  %v7030_v40 = vld [vmem:[%s8137_s23 + $0x10] sm:$0xff]  ;;  %v4927_v43 = vld [vmem:[%s8107_s9 + $0x20] sm:$0xff] }
 0x5bb   :  { %v1162_v47 = vadd.f32 0.2548296, %v1158_v10  ;;  %v1107_v61 = vmul.f32 0.5, %v6948_v1  ;;  %v4924_v1 = vld [vmem:[%s8106_s8 + $0x28] sm:$0xff] }
 0x5bc   :  { %v1197_v20 = vsub.f32 0.0, %v1189_v13  ;;  %v1188_v17 = vsub.f32 1.0, %v1184_v28  ;;  %v1187_v42 = vmul.f32 %v6229_v22, %v1167_v29 }
 0x5bd   :  { %v1166_v49 = vmul.f32 %v6223_v51, %v1162_v47 }
 0x5be   :  { %v1201_v48 = vsel %vm1193_vm13, %v1189_v13, %v1197_v20  ;;  %v1196_v31 = vsub.f32 0.0, %v1188_v17  ;;  %v1191_v52 = vsub.f32 1.0, %v1187_v42 }
 0x5bf   :  { %v1186_v46 = vmul.f32 %v6231_v50, %v1166_v49  ;;  %v1205_v53 = vadd.f32 1.0, %v1201_v48  ;;  %v4945_v49 = vld [vmem:[%s8108_s11 + $0x70] sm:$0xff]  ;;  %v4944_v50 = vld [vmem:[%s8108_s11 + $0x68] sm:$0xff] }
 0x5c0   :  { %v1200_v54 = vsel %vm1192_vm14, %v1188_v17, %v1196_v31  ;;  %v1199_v27 = vsub.f32 0.0, %v1191_v52  ;;  %v4943_v31 = vld [vmem:[%s8108_s11 + $0x60] sm:$0xff] }
 0x5c1   :  { %v1204_v55 = vadd.f32 1.0, %v1200_v54  ;;  %v1190_v56 = vsub.f32 1.0, %v1186_v46  ;;  %v1209_v63 = vmul.f32 %v1205_v53, %v1105_v60  ;;  %v4941_v46 = vld [vmem:[%s8108_s11 + $0x50] sm:$0xff]  ;;  %v4940_v53 = vld [vmem:[%s8108_s11 + $0x48] sm:$0xff]  ;;  %v4939_v54 = vld [vmem:[%s8108_s11 + $0x40] sm:$0xff] }
 0x5c2   :  { %v1203_v58 = vsel %vm1195_vm15, %v1191_v52, %v1199_v27  ;;  %v4942_v52 = vld [vmem:[%s8108_s11 + $0x58] sm:$0xff] }
 0x5c3   :  { %v1208_v62 = vmul.f32 %v1204_v55, %v1104_v26  ;;  %v1198_v51 = vsub.f32 0.0, %v1190_v56  ;;  %v1207_v2 = vadd.f32 1.0, %v1203_v58 }
 0x5c5   :  { %5622 = vmatprep.mubr.f32.mxu0 %v1208_v62  ;;  %v1202_v0 = vsel %vm1194_vm3, %v1190_v56, %v1198_v51  ;;  %v1211_v7 = vmul.f32 %v1207_v2, %v1107_v61  ;;  %v4938_v51 = vld [vmem:[%s8109_s10 + $0x1] ss:$0 sm:$0xff] }
 0x5c6   :  { %5623 = vmatmul.mubr.f32.vlgmr.msra.gmra.mxu0 %v1209_v63  ;;  %v1206_v4 = vadd.f32 1.0, %v1202_v0 }
 0x5c7   :  { %5680 = vmatpush3.msra.mxu0 %v4926_v57 }
 0x5c8   :  { %v1210_v5 = vmul.f32 %v1206_v4, %v1106_v3  ;;  %5681 = vmatprep.subr.mxu0 %v6445_v12 }
 0x5c9   :  { %5682 = vmatpush3.msra.mxu0 %v4925_v23 }
 0x5ca   :  { %5625 = vmatprep.mubr.f32.mxu0 %v1210_v5  ;;  %5683 = vmatprep.subr.mxu0 %v6445_v12 }
 0x5cb   :  { %5626 = vmatmul.mubr.f32.gmra.mxu0 %v1211_v7 }
 0x5cc   :  { %5687 = vmatprep.mubr.msk.f32.mxu0 %vm6446_vm1, %v6445_v12  ;;  %5684 = vmatpush3.msra.mxu0 %v4924_v1 }
 0x5cd   :  { %5685 = vmatprep.subr.mxu0 %v6445_v12 }
 0x5ce   :  { %5686 = vmatpush3.msra.mxu0 %v4923_v41 }
 0x686   :  { %v5624_v6 = vpop.f32.mrf.mxu0 }
 0x687   :  { %v6992_v34 = vadd.f32 %v5624_v6, %v4916_v21 }
 0x688   :  { %v1301_v19 = vpop.f32.mrf.mxu0 }
 0x689   :  { %v6996_v35 = vadd.f32 %v4916_v21, %v1301_v19 }
 0x68b   :  { %v5627_v24 = vpop.f32.mrf.mxu0 }
 0x68c   :  { %v6986_v25 = vadd.f32 %v5627_v24, %v4916_v21 }
 0x68d   :  { %v1311_v30 = vpop.f32.mrf.mxu0 }
 0x68e   :  { %v6988_v32 = vadd.f32 %v4916_v21, %v1311_v30  ;;  %5629 = vmatpush3.msra.mxu1 %v6986_v25 }
 0x68f   :  { %5630 = vmatprep.subr.mxu1 %v6445_v12 }
 0x690   :  { %5631 = vmatpush3.msra.mxu1 %v6988_v32 }
 0x691   :  { %5632 = vmatprep.subr.mxu1 %v6445_v12 }
 0x692   :  { %5633 = vmatpush3.msra.mxu1 %v6992_v34 }
 0x693   :  { %5634 = vmatprep.subr.mxu1 %v6445_v12 }
 0x694   :  { %5635 = vmatpush3.msra.mxu1 %v6996_v35 }
 0x695   :  { %5637 = vmatmul.mubr.msk.f32.vlgmr.msra.gmra.mxu1 %vm207_vm2, %v7004_v37  ;;  %5645 = vmatprep.subr.mxu1 %v6445_v12 }
 0x696   :  { %5646 = vmatpush3.msra.mxu1 %v6986_v25  ;;  %5639 = vmatprep.mubr.msk.f32.mxu1 %vm6446_vm1, %v6445_v12 }
 0x697   :  { %5647 = vmatprep.subr.mxu1 %v6445_v12 }
 0x698   :  { %5648 = vmatpush3.msra.mxu1 %v6988_v32 }
 0x699   :  { %5640 = vmatmul.mubr.msk.f32.gmra.mxu1 %vm207_vm2, %v7017_v39  ;;  %5649 = vmatprep.subr.mxu1 %v6445_v12 }
 0x69a   :  { %5650 = vmatpush3.msra.mxu1 %v6992_v34  ;;  %5642 = vmatprep.mubr.msk.f32.mxu1 %vm6446_vm1, %v6445_v12 }
 0x69b   :  { %5651 = vmatprep.subr.mxu1 %v6445_v12 }
 0x69c   :  { %5652 = vmatpush3.msra.mxu1 %v6996_v35 }
 0x69d   :  { %5643 = vmatmul.mubr.msk.f32.gmra.mxu1 %vm207_vm2, %v7030_v40  ;;  %5662 = vmatprep.subr.mxu1 %v6445_v12 }
 0x69e   :  { %5653 = vmatprep.mubr.msk.f32.mxu1 %vm6446_vm1, %v6445_v12 }
 0x6a1   :  { %5654 = vmatmul.mubr.msk.f32.vlgmr.msra.gmra.mxu1 %vm207_vm2, %v6664_v33  ;;  %v4930_v33 = vld [vmem:[%s8107_s9 + $0x38] sm:$0xff] }
 0x6a2   :  { %5656 = vmatprep.mubr.msk.f32.mxu1 %vm6446_vm1, %v6445_v12  ;;  %5663 = vmatpush3.msra.mxu1 %v4930_v33 }
 0x6a3   :  { %5664 = vmatprep.subr.mxu1 %v6445_v12 }
 0x6a5   :  { %5657 = vmatmul.mubr.msk.f32.gmra.mxu1 %vm207_vm2, %v6679_v36  ;;  %v4929_v36 = vld [vmem:[%s8107_s9 + $0x30] sm:$0xff] }
 0x6a6   :  { %5659 = vmatprep.mubr.msk.f32.mxu1 %vm6446_vm1, %v6445_v12  ;;  %5665 = vmatpush3.msra.mxu1 %v4929_v36 }
 0x6a7   :  { %5666 = vmatprep.subr.mxu1 %v6445_v12 }
 0x6a9   :  { %5660 = vmatmul.mubr.msk.f32.gmra.mxu1 %vm207_vm2, %v6693_v38  ;;  %v4928_v38 = vld [vmem:[%s8107_s9 + $0x28] sm:$0xff] }
 0x6aa   :  { %5670 = vmatprep.mubr.msk.f32.mxu1 %vm6446_vm1, %v6445_v12  ;;  %5667 = vmatpush3.msra.mxu1 %v4928_v38 }
 0x6ab   :  { %5668 = vmatprep.subr.mxu1 %v6445_v12 }
 0x6ac   :  { %5669 = vmatpush3.msra.mxu1 %v4927_v43 }
 0x6ad   :  { %5696 = vmatprep.subr.mxu1 %v6445_v12 }
 0x755   :  { %v1386_v44 = vpop.f32.mrf.mxu1 }
 0x756   :  { %5688 = vmatmul.mubr.msk.f32.vlgmr.msra.gmra.mxu0 %vm207_vm2, %v1386_v44 }
 0x757   :  { %v5638_v45 = vpop.f32.mrf.mxu1  ;;  %5690 = vmatprep.mubr.msk.f32.mxu0 %vm6446_vm1, %v6445_v12 }
 0x759   :  { %v1391_v13 = vpop.f32.mrf.mxu1 }
 0x75a   :  { %5691 = vmatmul.mubr.msk.f32.gmra.mxu0 %vm207_vm2, %v1391_v13 }
 0x75b   :  { %v5641_v10 = vpop.f32.mrf.mxu1  ;;  %5693 = vmatprep.mubr.msk.f32.mxu0 %vm6446_vm1, %v6445_v12 }
 0x75d   :  { %v1396_v28 = vpop.f32.mrf.mxu1 }
 0x75e   :  { %5694 = vmatmul.mubr.msk.f32.gmra.mxu0 %vm207_vm2, %v1396_v28 }
 0x75f   :  { %v5644_v29 = vpop.f32.mrf.mxu1  ;;  %5727 = vmatprep.mubr.msk.f32.mxu0 %vm797_vm8, %v6807_v59  ;;  %v4946_v59 = vld [vmem:[%s8108_s11 + $0x78] sm:$0xff] }
 0x761   :  { %v1466_v22 = vpop.f32.mrf.mxu1 }
 0x762   :  { %5671 = vmatmul.mubr.msk.f32.vlgmr.msra.gmra.mxu1 %vm207_vm2, %v1466_v22 }
 0x763   :  { %v5655_v20 = vpop.f32.mrf.mxu1  ;;  %5673 = vmatprep.mubr.msk.f32.mxu1 %vm6446_vm1, %v6445_v12  ;;  %5697 = vmatpush3.msra.mxu1 %v4946_v59 }
 0x764   :  { %5698 = vmatprep.subr.mxu1 %v6445_v12 }
 0x765   :  { %v1471_v47 = vpop.f32.mrf.mxu1  ;;  %5699 = vmatpush3.msra.mxu1 %v4945_v49 }
 0x766   :  { %5674 = vmatmul.mubr.msk.f32.gmra.mxu1 %vm207_vm2, %v1471_v47  ;;  %5700 = vmatprep.subr.mxu1 %v6445_v12 }
 0x767   :  { %v5658_v17 = vpop.f32.mrf.mxu1  ;;  %5676 = vmatprep.mubr.msk.f32.mxu1 %vm6446_vm1, %v6445_v12  ;;  %5701 = vmatpush3.msra.mxu1 %v4944_v50 }
 0x768   :  { %5702 = vmatprep.subr.mxu1 %v6445_v12 }
 0x769   :  { %v1476_v42 = vpop.f32.mrf.mxu1  ;;  %5703 = vmatpush3.msra.mxu1 %v4943_v31 }
 0x76a   :  { %5677 = vmatmul.mubr.msk.f32.gmra.mxu1 %vm207_vm2, %v1476_v42  ;;  %5704 = vmatprep.subr.mxu1 %v6445_v12 }
 0x76b   :  { %v5661_v48 = vpop.f32.mrf.mxu1  ;;  %5712 = vmatprep.mubr.msk.f32.mxu1 %vm6446_vm1, %v6445_v12  ;;  %5705 = vmatpush3.msra.mxu1 %v4942_v52 }
 0x76c   :  { %5706 = vmatprep.subr.mxu1 %v6445_v12 }
 0x76d   :  { %5707 = vmatpush3.msra.mxu1 %v4941_v46 }
 0x76e   :  { %5708 = vmatprep.subr.mxu1 %v6445_v12 }
 0x76f   :  { %5709 = vmatpush3.msra.mxu1 %v4940_v53 }
 0x770   :  { %5710 = vmatprep.subr.mxu1 %v6445_v12 }
 0x771   :  { %5711 = vmatpush3.msra.mxu1 %v4939_v54 }
 0x816   :  { %v1654_v27 = vpop.f32.mrf.mxu0 }
 0x818   :  { %v5689_v26 = vpop.f32.mrf.mxu0 }
 0x81a   :  { %v1659_v55 = vpop.f32.mrf.mxu0 }
 0x81c   :  { %v5692_v56 = vpop.f32.mrf.mxu0 }
 0x81e   :  { %v1664_v60 = vpop.f32.mrf.mxu0 }
 0x820   :  { %v5695_v58 = vpop.f32.mrf.mxu0 }
 0x822   :  { %v1565_v62 = vpop.f32.mrf.mxu1 }
 0x823   :  { %v1655_v63 = vadd.f32 %v1654_v27, %v1565_v62 }
 0x824   :  { %v5672_v0 = vpop.f32.mrf.mxu1 }
 0x825   :  { %v7120_v2 = vadd.f32 %v4938_v51, %v1655_v63 }
 0x826   :  { %v1570_v3 = vpop.f32.mrf.mxu1 }
 0x827   :  { %v7123_v4 = vmul.f32 0.70710677, %v7120_v2  ;;  %v1660_v61 = vadd.f32 %v1659_v55, %v1570_v3 }
 0x828   :  { %v5675_v5 = vpop.f32.mrf.mxu1 }
 0x829   :  { %v1685_v7 = vand.u32 2147483647, %v7123_v4  ;;  %v7126_v57 = vadd.f32 %v4938_v51, %v1660_v61  ;;  %vm1745_vm4 = vcmp.ge.f32.partialorder %v7123_v4, 0.0 }
 0x82a   :  { %v1575_v23 = vpop.f32.mrf.mxu1 }
 0x82b   :  { %v1688_v1 = vmul.f32 0.3275911, %v1685_v7  ;;  %v7129_v6 = vmul.f32 0.70710677, %v7126_v57  ;;  %v1665_v19 = vadd.f32 %v1664_v60, %v1575_v23  ;;  %v1727_v45 = vsub.f32 0.0, %v1685_v7 }
 0x82c   :  { %v5678_v21 = vpop.f32.mrf.mxu1 }
 0x82d   :  { %v1691_v24 = vadd.f32 1.0, %v1688_v1  ;;  %v1686_v30 = vand.u32 2147483647, %v7129_v6  ;;  %v7132_v41 = vadd.f32 %v4938_v51, %v1665_v19  ;;  %v1730_v10 = vmul.f32 %v1727_v45, %v1685_v7 }
 0x82e   :  { %vm1746_vm5 = vcmp.ge.f32.partialorder %v7129_v6, 0.0 }
 0x82f   :  { %6232 = vrcp.f32 %v1691_v24  ;;  %v1689_v33 = vmul.f32 0.3275911, %v1686_v30  ;;  %v7135_v36 = vmul.f32 0.70710677, %v7132_v41  ;;  %v1728_v28 = vsub.f32 0.0, %v1686_v30 }
 0x830   :  { %v1733_v20 = vmul.f32 1.442695, %v1730_v10  ;;  %v1681_v6 = vmul.f32 0.5, %v7132_v41 }
 0x831   :  { %v1692_v38 = vadd.f32 1.0, %v1689_v33  ;;  %v1687_v43 = vand.u32 2147483647, %v7135_v36  ;;  %v1731_v47 = vmul.f32 %v1728_v28, %v1686_v30  ;;  %vm1747_vm6 = vcmp.ge.f32.partialorder %v7135_v36, 0.0 }
 0x833   :  { %6234 = vrcp.f32 %v1692_v38  ;;  %v1690_v44 = vmul.f32 0.3275911, %v1687_v43  ;;  %v1729_v17 = vsub.f32 0.0, %v1687_v43  ;;  %v1735_v50 = vmul.f32 1.442695, %v1731_v47 }
 0x835   :  { %v1693_v13 = vadd.f32 1.0, %v1690_v44  ;;  %v1732_v31 = vmul.f32 %v1729_v17, %v1687_v43 }
 0x837   :  { %6236 = vrcp.f32 %v1693_v13  ;;  %v1737_v55 = vmul.f32 1.442695, %v1732_v31 }
 0x838   :  { %6238 = vpow2.f32 %v1733_v20 }
 0x839   :  { %6240 = vpow2.f32 %v1735_v50 }
 0x83a   :  { %6242 = vpow2.f32 %v1737_v55 }
 0x83c   :  { %v6233_v29 = vpop.eup %6232 }
 0x83d   :  { %v1700_v22 = vmul.f32 1.0614054, %v6233_v29 }
 0x83f   :  { %v1703_v42 = vadd.f32 -1.4531521, %v1700_v22  ;;  %v1679_v22 = vmul.f32 0.5, %v7120_v2 }
 0x840   :  { %v6235_v48 = vpop.eup %6234 }
 0x841   :  { %v1706_v59 = vmul.f32 %v6233_v29, %v1703_v42  ;;  %v1701_v49 = vmul.f32 1.0614054, %v6235_v48 }
 0x843   :  { %v1709_v52 = vadd.f32 1.4214138, %v1706_v59  ;;  %v1704_v46 = vadd.f32 -1.4531521, %v1701_v49  ;;  %v1680_v49 = vmul.f32 0.5, %v7126_v57 }
 0x844   :  { %v6237_v53 = vpop.eup %6236 }
 0x845   :  { %v1712_v54 = vmul.f32 %v6233_v29, %v1709_v52  ;;  %v1707_v27 = vmul.f32 %v6235_v48, %v1704_v46  ;;  %v1702_v26 = vmul.f32 1.0614054, %v6237_v53  ;;  %v6239_v23 = vpop.eup %6238 }
 0x846   :  { %v6241_v38 = vpop.eup %6240 }
 0x847   :  { %v1715_v56 = vadd.f32 -0.28449672, %v1712_v54  ;;  %v1710_v60 = vadd.f32 1.4214138, %v1707_v27  ;;  %v1705_v58 = vadd.f32 -1.4531521, %v1702_v26  ;;  %v6243_v47 = vpop.eup %6242 }
 0x848   :  { %v4948_v27 = vld [vmem:[%s8110_s12 + $0x1] ss:$0 sm:$0xff] }
 0x849   :  { %v1718_v62 = vmul.f32 %v6233_v29, %v1715_v56  ;;  %v1713_v51 = vmul.f32 %v6235_v48, %v1710_v60  ;;  %v1708_v63 = vmul.f32 %v6237_v53, %v1705_v58 }
 0x84b   :  { %v1721_v0 = vadd.f32 0.2548296, %v1718_v62  ;;  %v1716_v3 = vadd.f32 -0.28449672, %v1713_v51  ;;  %v1711_v61 = vadd.f32 1.4214138, %v1708_v63 }
 0x84d   :  { %v1724_v5 = vmul.f32 %v6233_v29, %v1721_v0  ;;  %v1719_v7 = vmul.f32 %v6235_v48, %v1716_v3  ;;  %v1714_v1 = vmul.f32 %v6237_v53, %v1711_v61 }
 0x84f   :  { %v1739_v19 = vmul.f32 %v6239_v23, %v1724_v5  ;;  %v1722_v21 = vadd.f32 0.2548296, %v1719_v7  ;;  %v1717_v24 = vadd.f32 -0.28449672, %v1714_v1 }
 0x851   :  { %v1742_v30 = vsub.f32 1.0, %v1739_v19  ;;  %v1725_v33 = vmul.f32 %v6235_v48, %v1722_v21  ;;  %v1720_v43 = vmul.f32 %v6237_v53, %v1717_v24 }
 0x853   :  { %v1748_v44 = vsub.f32 0.0, %v1742_v30  ;;  %v1740_v45 = vmul.f32 %v6241_v38, %v1725_v33  ;;  %v1723_v13 = vadd.f32 0.2548296, %v1720_v43 }
 0x855   :  { %v1751_v10 = vsel %vm1745_vm4, %v1742_v30, %v1748_v44  ;;  %v1743_v28 = vsub.f32 1.0, %v1740_v45  ;;  %v1726_v20 = vmul.f32 %v6237_v53, %v1723_v13 }
 0x856   :  { %v1754_v29 = vadd.f32 1.0, %v1751_v10 }
 0x857   :  { %v1749_v17 = vsub.f32 0.0, %v1743_v28  ;;  %v1741_v59 = vmul.f32 %v6243_v47, %v1726_v20 }
 0x858   :  { %v1757_v42 = vmul.f32 %v1754_v29, %v1679_v22 }
 0x859   :  { %v1752_v48 = vsel %vm1746_vm5, %v1743_v28, %v1749_v17  ;;  %v1744_v31 = vsub.f32 1.0, %v1741_v59  ;;  %v4984_v59 = vld [vmem:[%s8114_s15 + $0xd8] sm:$0xff] }
 0x85a   :  { %v1755_v50 = vadd.f32 1.0, %v1752_v48  ;;  %5713 = vmatmul.mubr.msk.f32.vlgmr.msra.gmra.mxu1 %vm87_vm0, %v1757_v42  ;;  %v4983_v48 = vld [vmem:[%s8114_s15 + $0xd0] sm:$0xff] }
 0x85b   :  { %5715 = vmatprep.mubr.msk.f32.mxu1 %vm6446_vm1, %v6445_v12  ;;  %v1750_v2 = vsub.f32 0.0, %v1744_v31 }
 0x85c   :  { %v1758_v4 = vmul.f32 %v1755_v50, %v1680_v49  ;;  %v4982_v49 = vld [vmem:[%s8114_s15 + $0xc8] sm:$0xff]  ;;  %v4981_v50 = vld [vmem:[%s8114_s15 + $0xc0] sm:$0xff] }
 0x85d   :  { %v1753_v52 = vsel %vm1747_vm6, %v1744_v31, %v1750_v2  ;;  %v4980_v31 = vld [vmem:[%s8114_s15 + $0xb8] sm:$0xff]  ;;  %v4978_v2 = vld [vmem:[%s8114_s15 + $0xa8] sm:$0xff] }
 0x85e   :  { %5716 = vmatmul.mubr.msk.f32.gmra.mxu1 %vm87_vm0, %v1758_v4  ;;  %v1756_v46 = vadd.f32 1.0, %v1753_v52  ;;  %v4979_v4 = vld [vmem:[%s8114_s15 + $0xb0] sm:$0xff]  ;;  %v4977_v52 = vld [vmem:[%s8114_s15 + $0xa0] sm:$0xff] }
 0x85f   :  { %5718 = vmatprep.mubr.msk.f32.mxu1 %vm6446_vm1, %v6445_v12 }
 0x860   :  { %v1759_v57 = vmul.f32 %v1756_v46, %v1681_v6  ;;  %v4976_v6 = vld [vmem:[%s8114_s15 + $0x98] sm:$0xff]  ;;  %v4975_v46 = vld [vmem:[%s8114_s15 + $0x90] sm:$0xff] }
 0x862   :  { %5719 = vmatmul.mubr.msk.f32.gmra.mxu1 %vm87_vm0, %v1759_v57  ;;  %v4974_v57 = vld [vmem:[%s8114_s15 + $0x88] sm:$0xff] }
 0x91a   :  { %v1852_v53 = vpop.f32.mrf.mxu1 }
 0x91b   :  { %v1853_v41 = vadd.f32 %v4948_v27, %v1852_v53  ;;  %v4973_v53 = vld [vmem:[%s8114_s15 + $0x80] sm:$0xff] }
 0x91c   :  { %v5714_v54 = vpop.f32.mrf.mxu1 }
 0x91d   :  { %v1875_v5 = vadd.f32 0.01, %v1853_v41  ;;  %vm1872_vm11 = vcmp.lt.f32.partialorder %v1853_v41, -0.01  ;;  %v4952_v1 = vadd.f32 -0.01, %v1853_v41 }
 0x91e   :  { %v1857_v26 = vpop.f32.mrf.mxu1  ;;  %vm1866_vm13 = vcmp.gt.f32.partialorder %v1853_v41, 0.01  ;;  %v4968_v54 = vld [vmem:[%s8115_s14 + $0x1] ss:$0 sm:$0xff] }
 0x91f   :  { %v1858_v36 = vadd.f32 %v4948_v27, %v1857_v26  ;;  %v1878_v19 = vsel %vm1872_vm11, %v1875_v5, 0.0 }
 0x920   :  { %v5717_v55 = vpop.f32.mrf.mxu1  ;;  %v1881_v21 = vsel %vm1866_vm13, %v4952_v1, %v1878_v19 }
 0x921   :  { %v4953_v56 = vadd.f32 -0.01, %v1858_v36  ;;  %vm1873_vm7 = vcmp.lt.f32.partialorder %v1858_v36, -0.01  ;;  %v1876_v60 = vadd.f32 0.01, %v1858_v36 }
 0x922   :  { %v1862_v58 = vpop.f32.mrf.mxu1  ;;  %vm1867_vm9 = vcmp.gt.f32.partialorder %v1858_v36, 0.01 }
 0x923   :  { %v1863_v62 = vadd.f32 %v4948_v27, %v1862_v58  ;;  %v1879_v51 = vsel %vm1873_vm7, %v1876_v60, 0.0 }
 0x924   :  { %v5720_v63 = vpop.f32.mrf.mxu1  ;;  %v1882_v0 = vsel %vm1867_vm9, %v4953_v56, %v1879_v51 }
 0x925   :  { %1889 = vrot.lane.b32.xlu0 %v1882_v0, %s6447_s28  ;;  %v4954_v3 = vadd.f32 -0.01, %v1863_v62  ;;  %vm1874_vm10 = vcmp.lt.f32.partialorder %v1863_v62, -0.01  ;;  %v1877_v61 = vadd.f32 0.01, %v1863_v62 }
 0x926   :  { %vm1868_vm12 = vcmp.gt.f32.partialorder %v1863_v62, 0.01 }
 0x927   :  { %v1880_v7 = vsel %vm1874_vm10, %v1877_v61, 0.0 }
 0x928   :  { %v1883_v23 = vsel %vm1868_vm12, %v4954_v3, %v1880_v7 }
 0x929   :  { %1891 = vrot.lane.b32.xlu1 %v1883_v23, %s6447_s28 }
 0x92d   :  { %1887 = vrot.lane.b32.xlu1 %v1881_v21, %s6447_s28 }
 0x997   :  { %v1890_v30 = vpop.permute.xlu0 %1889 }
 0x99b   :  { %v1892_v24 = vpop.permute.xlu1 %1891 }
 0x99c   :  { %5721 = vmatprep.subr.mxu0 %v1892_v24 }
 0x99d   :  { %5722 = vmatpush3.msra.mxu0 %v1892_v24 }
 0x99e   :  { %5723 = vmatprep.subr.mxu0 %v1890_v30 }
 0x99f   :  { %5724 = vmatpush3.msra.mxu0 %v1890_v30  ;;  %v1888_v33 = vpop.permute.xlu1 %1887 }
 0x9a0   :  { %5725 = vmatprep.subr.mxu0 %v1888_v33 }
 0x9a1   :  { %5726 = vmatpush3.msra.mxu0 %v1888_v33 }
 0x9a2   :  { %5728 = vmatmul.mubr.msk.f32.vlgmr.msra.gmra.mxu0 %vm797_vm8, %v6816_v8  ;;  %5733 = vmatprep.subr.mxu0 %v1883_v23  ;;  %v4966_v8 = vld [vmem:[%s8113_s13 + $0x38] sm:$0xff] }
 0x9a3   :  { %5734 = vmatpush3.msra.mxu0 %v1883_v23  ;;  %5730 = vmatprep.mubr.msk.f32.mxu0 %vm797_vm8, %v6821_v9  ;;  %v4965_v9 = vld [vmem:[%s8113_s13 + $0x30] sm:$0xff] }
 0x9a4   :  { %5735 = vmatprep.subr.mxu0 %v1882_v0  ;;  %5745 = vmatprep.subr.mxu1 %v4966_v8 }
 0x9a5   :  { %5736 = vmatpush3.msra.mxu0 %v1882_v0  ;;  %5746 = vmatpush3.msra.mxu1 %v4966_v8 }
 0x9a6   :  { %5731 = vmatmul.mubr.msk.f32.gmra.mxu0 %vm797_vm8, %v6830_v11  ;;  %5737 = vmatprep.subr.mxu0 %v1881_v21  ;;  %v4964_v11 = vld [vmem:[%s8113_s13 + $0x28] sm:$0xff] }
 0x9a7   :  { %5738 = vmatpush3.msra.mxu0 %v1881_v21  ;;  %5739 = vmatprep.mubr.msk.f32.mxu0 %vm797_vm8, %v6835_v14  ;;  %v4963_v14 = vld [vmem:[%s8113_s13 + $0x20] sm:$0xff] }
 0x9a8   :  { %5747 = vmatprep.subr.mxu1 %v4965_v9 }
 0x9a9   :  { %5748 = vmatpush3.msra.mxu1 %v4965_v9 }
 0x9aa   :  { %5740 = vmatmul.mubr.msk.f32.vlgmr.msra.gmra.mxu0 %vm797_vm8, %v6844_v15  ;;  %5749 = vmatprep.subr.mxu1 %v4964_v11 }
 0x9ab   :  { %5742 = vmatprep.mubr.msk.f32.mxu0 %vm797_vm8, %v6849_v16  ;;  %5750 = vmatpush3.msra.mxu1 %v4964_v11 }
 0x9ac   :  { %5751 = vmatprep.subr.mxu1 %v4963_v14 }
 0x9ad   :  { %5752 = vmatpush3.msra.mxu1 %v4963_v14 }
 0x9ae   :  { %5743 = vmatmul.mubr.msk.f32.gmra.mxu0 %vm797_vm8, %v6858_v18  ;;  %5797 = vmatprep.subr.mxu1 %v6445_v12 }
 0xa62   :  { %v5729_v15 = vpop.f32.mrf.mxu0 }
 0xa64   :  { %v1962_v16 = vpop.f32.mrf.mxu0 }
 0xa66   :  { %v5732_v18 = vpop.f32.mrf.mxu0 }
 0xa68   :  { %v1972_v38 = vpop.f32.mrf.mxu0 }
 0xa6a   :  { %v5741_v43 = vpop.f32.mrf.mxu0 }
 0xa6b   :  { %v2053_v44 = vadd.f32 %v5741_v43, %v5729_v15 }
 0xa6c   :  { %v2047_v45 = vpop.f32.mrf.mxu0 }
 0xa6d   :  { %v2048_v13 = vadd.f32 %v2047_v45, %v1962_v16  ;;  %v2067_v22 = vadd.f32 %v2053_v44, %v6992_v34  ;;  %v4988_v34 = vld [vmem:[%s8114_s15 + $0xf8] sm:$0xff] }
 0xa6e   :  { %v5744_v10 = vpop.f32.mrf.mxu0  ;;  %5759 = vmatprep.subr.mxu0 %v4988_v34 }
 0xa6f   :  { %v2066_v28 = vadd.f32 %v2048_v13, %v6996_v35  ;;  %v2063_v29 = vadd.f32 %v5744_v10, %v5732_v18  ;;  %5760 = vmatpush3.msra.mxu0 %v4988_v34  ;;  %v4987_v35 = vld [vmem:[%s8114_s15 + $0xf0] sm:$0xff] }
 0xa70   :  { %v2057_v20 = vpop.f32.mrf.mxu0  ;;  %5761 = vmatprep.subr.mxu0 %v4987_v35 }
 0xa71   :  { %v2058_v47 = vadd.f32 %v2057_v20, %v1972_v38  ;;  %5753 = vmatprep.mubr.msk.f32.mxu1 %vm207_vm2, %v2066_v28  ;;  %v2069_v42 = vadd.f32 %v2063_v29, %v6986_v25  ;;  %5762 = vmatpush3.msra.mxu0 %v4987_v35  ;;  %v4986_v25 = vld [vmem:[%s8114_s15 + $0xe8] sm:$0xff] }
 0xa72   :  { %5754 = vmatmul.mubr.msk.f32.vlgmr.msra.gmra.mxu1 %vm207_vm2, %v2067_v22  ;;  %5763 = vmatprep.subr.mxu0 %v4986_v25 }
 0xa73   :  { %v2068_v17 = vadd.f32 %v2058_v47, %v6988_v32  ;;  %5764 = vmatpush3.msra.mxu0 %v4986_v25  ;;  %v4985_v32 = vld [vmem:[%s8114_s15 + $0xe0] sm:$0xff] }
 0xa74   :  { %5765 = vmatprep.subr.mxu0 %v4985_v32 }
 0xa75   :  { %5756 = vmatprep.mubr.msk.f32.mxu1 %vm207_vm2, %v2068_v17  ;;  %5766 = vmatpush3.msra.mxu0 %v4985_v32 }
 0xa76   :  { %5757 = vmatmul.mubr.msk.f32.gmra.mxu1 %vm207_vm2, %v2069_v42  ;;  %5767 = vmatprep.subr.mxu0 %v4984_v59 }
 0xa77   :  { %5805 = vmatprep.mubr.msk.f32.mxu1 %vm6446_vm1, %v6445_v12  ;;  %5768 = vmatpush3.msra.mxu0 %v4984_v59 }
 0xa78   :  { %5769 = vmatprep.subr.mxu0 %v4983_v48 }
 0xa79   :  { %5770 = vmatpush3.msra.mxu0 %v4983_v48 }
 0xa7a   :  { %5771 = vmatprep.subr.mxu0 %v4982_v49 }
 0xa7b   :  { %5772 = vmatpush3.msra.mxu0 %v4982_v49 }
 0xa7c   :  { %5773 = vmatprep.subr.mxu0 %v4981_v50 }
 0xa7d   :  { %5774 = vmatpush3.msra.mxu0 %v4981_v50 }
 0xa7e   :  { %5775 = vmatprep.subr.mxu0 %v4980_v31 }
 0xa7f   :  { %5776 = vmatpush3.msra.mxu0 %v4980_v31 }
 0xa80   :  { %5777 = vmatprep.subr.mxu0 %v4979_v4 }
 0xa81   :  { %5778 = vmatpush3.msra.mxu0 %v4979_v4 }
 0xa82   :  { %5779 = vmatprep.subr.mxu0 %v4978_v2 }
 0xa83   :  { %5780 = vmatpush3.msra.mxu0 %v4978_v2 }
 0xa84   :  { %5781 = vmatprep.subr.mxu0 %v4977_v52 }
 0xa85   :  { %5782 = vmatpush3.msra.mxu0 %v4977_v52 }
 0xa86   :  { %5783 = vmatprep.subr.mxu0 %v4976_v6 }
 0xa87   :  { %5784 = vmatpush3.msra.mxu0 %v4976_v6 }
 0xa88   :  { %5785 = vmatprep.subr.mxu0 %v4975_v46 }
 0xa89   :  { %5786 = vmatpush3.msra.mxu0 %v4975_v46 }
 0xa8a   :  { %5787 = vmatprep.subr.mxu0 %v4974_v57 }
 0xa8b   :  { %5788 = vmatpush3.msra.mxu0 %v4974_v57 }
 0xa8c   :  { %5789 = vmatprep.subr.mxu0 %v4973_v53 }
 0xa8d   :  { %5790 = vmatpush3.msra.mxu0 %v4973_v53 }
 0xa8e   :  { %5848 = vmatprep.subr.mxu0 %v6445_v12 }
 0xb32   :  { %v5755_v27 = vpop.f32.mrf.mxu1 }
 0xb33   :  { %v7246_v26 = vadd.f32 %v5755_v27, %v4968_v54 }
 0xb34   :  { %v2161_v36 = vpop.f32.mrf.mxu1 }
 0xb35   :  { %v7249_v55 = vmul.f32 0.70710677, %v7246_v26  ;;  %v7251_v56 = vadd.f32 %v4968_v54, %v2161_v36 }
 0xb36   :  { %v5758_v60 = vpop.f32.mrf.mxu1 }
 0xb37   :  { %v2189_v41 = vand.u32 2147483647, %v7249_v55  ;;  %v7255_v58 = vmul.f32 0.70710677, %v7251_v56  ;;  %v7257_v62 = vadd.f32 %v5758_v60, %v4968_v54  ;;  %vm2269_vm14 = vcmp.ge.f32.partialorder %v7249_v55, 0.0 }
 0xb38   :  { %v2171_v51 = vpop.f32.mrf.mxu1  ;;  %v2181_v55 = vmul.f32 0.5, %v7246_v26 }
 0xb39   :  { %v2193_v63 = vmul.f32 0.3275911, %v2189_v41  ;;  %v2188_v0 = vand.u32 2147483647, %v7255_v58  ;;  %v7261_v3 = vmul.f32 0.70710677, %v7257_v62  ;;  %v7263_v61 = vadd.f32 %v4968_v54, %v2171_v51 }
 0xb3a   :  { %v2245_v9 = vsub.f32 0.0, %v2189_v41  ;;  %vm2268_vm15 = vcmp.ge.f32.partialorder %v7255_v58, 0.0 }
 0xb3b   :  { %v2197_v5 = vadd.f32 1.0, %v2193_v63  ;;  %v2192_v7 = vmul.f32 0.3275911, %v2188_v0  ;;  %v2191_v23 = vand.u32 2147483647, %v7261_v3  ;;  %v2244_v11 = vsub.f32 0.0, %v2188_v0 }
 0xb3c   :  { %v7267_v1 = vmul.f32 0.70710677, %v7263_v61  ;;  %v2249_v14 = vmul.f32 %v2245_v9, %v2189_v41  ;;  %vm2271_vm3 = vcmp.ge.f32.partialorder %v7261_v3, 0.0  ;;  %v6351_v3 = vld [vmem:[%s8106_s8 + $0x18] sm:$0xff] }
 0xb3d   :  { %6244 = vrcp.f32 %v2197_v5  ;;  %v2196_v19 = vadd.f32 1.0, %v2192_v7  ;;  %v2195_v21 = vmul.f32 0.3275911, %v2191_v23  ;;  %v2247_v15 = vsub.f32 0.0, %v2191_v23 }
 0xb3e   :  { %v2190_v24 = vand.u32 2147483647, %v7267_v1  ;;  %v2248_v18 = vmul.f32 %v2244_v11, %v2188_v0  ;;  %v2254_v43 = vmul.f32 1.442695, %v2249_v14  ;;  %vm2270_vm4 = vcmp.ge.f32.partialorder %v7267_v1, 0.0  ;;  %v6352_v1 = vld [vmem:[%s8106_s8 + $0x10] sm:$0xff] }
 0xb3f   :  { %6246 = vrcp.f32 %v2196_v19  ;;  %v2199_v30 = vadd.f32 1.0, %v2195_v21  ;;  %v2251_v45 = vmul.f32 %v2247_v15, %v2191_v23 }
 0xb40   :  { %v2194_v33 = vmul.f32 0.3275911, %v2190_v24  ;;  %v2246_v44 = vsub.f32 0.0, %v2190_v24  ;;  %v2252_v28 = vmul.f32 1.442695, %v2248_v18 }
 0xb41   :  { %6248 = vrcp.f32 %v2199_v30  ;;  %v2258_v17 = vmul.f32 1.442695, %v2251_v45 }
 0xb42   :  { %v2198_v8 = vadd.f32 1.0, %v2194_v33  ;;  %v2250_v47 = vmul.f32 %v2246_v44, %v2190_v24 }
 0xb44   :  { %6250 = vrcp.f32 %v2198_v8  ;;  %v2256_v49 = vmul.f32 1.442695, %v2250_v47 }
 0xb45   :  { %6252 = vpow2.f32 %v2254_v43 }
 0xb46   :  { %6254 = vpow2.f32 %v2252_v28 }
 0xb47   :  { %6256 = vpow2.f32 %v2258_v17 }
 0xb48   :  { %6258 = vpow2.f32 %v2256_v49  ;;  %v2182_v49 = vmul.f32 0.5, %v7263_v61  ;;  %v6354_v61 = vld [vmem:[%s8106_s8] sm:$0xff] }
 0xb4a   :  { %v6245_v16 = vpop.eup %6244 }
 0xb4b   :  { %v2209_v38 = vmul.f32 1.0614054, %v6245_v16 }
 0xb4c   :  { %v6247_v13 = vpop.eup %6246 }
 0xb4d   :  { %v2213_v10 = vadd.f32 -1.4531521, %v2209_v38  ;;  %v2208_v22 = vmul.f32 1.0614054, %v6247_v13 }
 0xb4e   :  { %v6249_v29 = vpop.eup %6248 }
 0xb4f   :  { %v2217_v20 = vmul.f32 %v6245_v16, %v2213_v10  ;;  %v2212_v42 = vadd.f32 -1.4531521, %v2208_v22  ;;  %v2211_v34 = vmul.f32 1.0614054, %v6249_v29 }
 0xb51   :  { %v2221_v35 = vadd.f32 1.4214138, %v2217_v20  ;;  %v6251_v25 = vpop.eup %6250  ;;  %v2216_v32 = vmul.f32 %v6247_v13, %v2212_v42  ;;  %v2215_v59 = vadd.f32 -1.4531521, %v2211_v34 }
 0xb52   :  { %v2210_v50 = vmul.f32 1.0614054, %v6251_v25  ;;  %v6253_v5 = vpop.eup %6252 }
 0xb53   :  { %v2225_v48 = vmul.f32 %v6245_v16, %v2221_v35  ;;  %v2220_v31 = vadd.f32 1.4214138, %v2216_v32  ;;  %v2219_v4 = vmul.f32 %v6249_v29, %v2215_v59  ;;  %v6255_v33 = vpop.eup %6254 }
 0xb54   :  { %v2214_v52 = vadd.f32 -1.4531521, %v2210_v50  ;;  %v6257_v15 = vpop.eup %6256 }
 0xb55   :  { %v2229_v2 = vadd.f32 -0.28449672, %v2225_v48  ;;  %v2224_v6 = vmul.f32 %v6247_v13, %v2220_v31  ;;  %v2223_v46 = vadd.f32 1.4214138, %v2219_v4  ;;  %v6259_v10 = vpop.eup %6258 }
 0xb56   :  { %v2218_v53 = vmul.f32 %v6251_v25, %v2214_v52  ;;  %v4990_v52 = vld [vmem:[%s8116_s16 + $0x1] ss:$0 sm:$0xff] }
 0xb57   :  { %v2233_v57 = vmul.f32 %v6245_v16, %v2229_v2  ;;  %v2228_v54 = vadd.f32 -0.28449672, %v2224_v6  ;;  %v2227_v27 = vmul.f32 %v6249_v29, %v2223_v46 }
 0xb58   :  { %v2222_v60 = vadd.f32 1.4214138, %v2218_v53 }
 0xb59   :  { %v2237_v36 = vadd.f32 0.2548296, %v2233_v57  ;;  %v2232_v41 = vmul.f32 %v6247_v13, %v2228_v54  ;;  %v2231_v51 = vadd.f32 -0.28449672, %v2227_v27 }
 0xb5a   :  { %v2226_v0 = vmul.f32 %v6251_v25, %v2222_v60  ;;  %v6359_v60 = vld [vmem:[%s8107_s9 + $0x8] sm:$0xff] }
 0xb5b   :  { %v2241_v63 = vmul.f32 %v6245_v16, %v2237_v36  ;;  %v2236_v7 = vadd.f32 0.2548296, %v2232_v41  ;;  %v2235_v23 = vmul.f32 %v6249_v29, %v2231_v51  ;;  %v7353_v36 = vld [vmem:[%s8138_s27 + $0x8] sm:$0xff]  ;;  %v6360_v41 = vld [vmem:[%s8107_s9] sm:$0xff]  ;;  %v7370_v51 = vld [vmem:[%s8138_s27 + $0x10] sm:$0xff] }
 0xb5c   :  { %v2230_v21 = vadd.f32 -0.28449672, %v2226_v0 }
 0xb5d   :  { %v2261_v19 = vmul.f32 %v6253_v5, %v2241_v63  ;;  %v2240_v24 = vmul.f32 %v6247_v13, %v2236_v7  ;;  %v2239_v30 = vadd.f32 0.2548296, %v2235_v23 }
 0xb5e   :  { %v2234_v9 = vmul.f32 %v6251_v25, %v2230_v21  ;;  %v7387_v21 = vld [vmem:[%s8111_s7] sm:$0xff] }
 0xb5f   :  { %v2265_v8 = vsub.f32 1.0, %v2261_v19  ;;  %v2260_v11 = vmul.f32 %v6255_v33, %v2240_v24  ;;  %v2243_v14 = vmul.f32 %v6249_v29, %v2239_v30  ;;  %v2180_v29 = vmul.f32 0.5, %v7251_v56  ;;  %v6363_v33 = vld [vmem:[%s8108_s11 + $0x38] sm:$0xff] }
 0xb60   :  { %v2238_v38 = vadd.f32 0.2548296, %v2234_v9  ;;  %v2183_v56 = vmul.f32 0.5, %v7257_v62  ;;  %v6353_v62 = vld [vmem:[%s8106_s8 + $0x8] sm:$0xff]  ;;  %v6364_v9 = vld [vmem:[%s8108_s11 + $0x30] sm:$0xff] }
 0xb61   :  { %v2273_v18 = vsub.f32 0.0, %v2265_v8  ;;  %v2264_v43 = vsub.f32 1.0, %v2260_v11  ;;  %v2263_v16 = vmul.f32 %v6257_v15, %v2243_v14  ;;  %v6365_v14 = vld [vmem:[%s8108_s11 + $0x28] sm:$0xff] }
 0xb62   :  { %v2242_v45 = vmul.f32 %v6251_v25, %v2238_v38 }
 0xb63   :  { %v2277_v44 = vsel %vm2269_vm14, %v2265_v8, %v2273_v18  ;;  %v2272_v28 = vsub.f32 0.0, %v2264_v43  ;;  %v2267_v22 = vsub.f32 1.0, %v2263_v16  ;;  %v6366_v18 = vld [vmem:[%s8108_s11 + $0x20] sm:$0xff]  ;;  %v6368_v16 = vld [vmem:[%s8108_s11 + $0x10] sm:$0xff] }
 0xb64   :  { %v2262_v13 = vmul.f32 %v6259_v10, %v2242_v45  ;;  %v2281_v20 = vadd.f32 1.0, %v2277_v44  ;;  %v6369_v44 = vld [vmem:[%s8108_s11 + $0x8] sm:$0xff]  ;;  %v6370_v45 = vld [vmem:[%s8108_s11] sm:$0xff]  ;;  %v7434_v10 = vld [vmem:[%s8113_s13 + $0x18] sm:$0xff] }
 0xb65   :  { %v2276_v47 = vsel %vm2268_vm15, %v2264_v43, %v2272_v28  ;;  %v2275_v17 = vsub.f32 0.0, %v2267_v22  ;;  %v6367_v43 = vld [vmem:[%s8108_s11 + $0x18] sm:$0xff] }
 0xb66   :  { %v2280_v42 = vadd.f32 1.0, %v2276_v47  ;;  %v2266_v34 = vsub.f32 1.0, %v2262_v13  ;;  %v2285_v59 = vmul.f32 %v2281_v20, %v2181_v55  ;;  %v6372_v55 = vld [vmem:[%s8109_s10] ss:$0 sm:$0xff] }
 0xb67   :  { %v2279_v35 = vsel %vm2271_vm3, %v2267_v22, %v2275_v17 }
 0xb68   :  { %v2284_v32 = vmul.f32 %v2280_v42, %v2180_v29  ;;  %v2274_v25 = vsub.f32 0.0, %v2266_v34  ;;  %v2283_v48 = vadd.f32 1.0, %v2279_v35 }
 0xb6a   :  { %5791 = vmatprep.mubr.f32.mxu0 %v2284_v32  ;;  %v2278_v58 = vsel %vm2270_vm4, %v2266_v34, %v2274_v25  ;;  %v2287_v31 = vmul.f32 %v2283_v48, %v2183_v56 }
 0xb6b   :  { %5792 = vmatmul.mubr.f32.vlgmr.msra.gmra.mxu0 %v2285_v59  ;;  %v2282_v50 = vadd.f32 1.0, %v2278_v58 }
 0xb6c   :  { %5849 = vmatpush3.msra.mxu0 %v6351_v3 }
 0xb6d   :  { %v2286_v26 = vmul.f32 %v2282_v50, %v2182_v49  ;;  %5850 = vmatprep.subr.mxu0 %v6445_v12 }
 0xb6e   :  { %5851 = vmatpush3.msra.mxu0 %v6352_v1 }
 0xb6f   :  { %5794 = vmatprep.mubr.f32.mxu0 %v2286_v26  ;;  %5852 = vmatprep.subr.mxu0 %v6445_v12 }
 0xb70   :  { %5795 = vmatmul.mubr.f32.gmra.mxu0 %v2287_v31 }
 0xb71   :  { %5853 = vmatpush3.msra.mxu0 %v6353_v62  ;;  %5856 = vmatprep.mubr.msk.f32.mxu0 %vm6446_vm1, %v6445_v12 }
 0xb72   :  { %5854 = vmatprep.subr.mxu0 %v6445_v12 }
 0xb73   :  { %5855 = vmatpush3.msra.mxu0 %v6354_v61 }
 0xc2b   :  { %v5793_v4 = vpop.f32.mrf.mxu0 }
 0xc2c   :  { %v7304_v54 = vadd.f32 %v5793_v4, %v4990_v52 }
 0xc2d   :  { %v2379_v2 = vpop.f32.mrf.mxu0 }
 0xc2e   :  { %v7308_v27 = vadd.f32 %v4990_v52, %v2379_v2 }
 0xc30   :  { %v5796_v6 = vpop.f32.mrf.mxu0 }
 0xc31   :  { %v7298_v46 = vadd.f32 %v5796_v6, %v4990_v52 }
 0xc32   :  { %v2389_v57 = vpop.f32.mrf.mxu0 }
 0xc33   :  { %v7300_v53 = vadd.f32 %v4990_v52, %v2389_v57  ;;  %5798 = vmatpush3.msra.mxu1 %v7298_v46 }
 0xc34   :  { %5799 = vmatprep.subr.mxu1 %v6445_v12 }
 0xc35   :  { %5800 = vmatpush3.msra.mxu1 %v7300_v53 }
 0xc36   :  { %5801 = vmatprep.subr.mxu1 %v6445_v12 }
 0xc37   :  { %5802 = vmatpush3.msra.mxu1 %v7304_v54 }
 0xc38   :  { %5803 = vmatprep.subr.mxu1 %v6445_v12 }
 0xc39   :  { %5804 = vmatpush3.msra.mxu1 %v7308_v27 }
 0xc3a   :  { %5806 = vmatmul.mubr.msk.f32.vlgmr.msra.gmra.mxu1 %vm207_vm2, %v7004_v37  ;;  %5814 = vmatprep.subr.mxu1 %v6445_v12  ;;  %v7337_v37 = vld [vmem:[%s8138_s27] sm:$0xff] }
 0xc3b   :  { %5815 = vmatpush3.msra.mxu1 %v7298_v46  ;;  %5808 = vmatprep.mubr.msk.f32.mxu1 %vm6446_vm1, %v6445_v12 }
 0xc3c   :  { %5816 = vmatprep.subr.mxu1 %v6445_v12 }
 0xc3d   :  { %5817 = vmatpush3.msra.mxu1 %v7300_v53 }
 0xc3e   :  { %5809 = vmatmul.mubr.msk.f32.gmra.mxu1 %vm207_vm2, %v7017_v39  ;;  %5818 = vmatprep.subr.mxu1 %v6445_v12  ;;  %v6356_v39 = vld [vmem:[%s8107_s9 + $0x18] sm:$0xff] }
 0xc3f   :  { %5819 = vmatpush3.msra.mxu1 %v7304_v54  ;;  %5811 = vmatprep.mubr.msk.f32.mxu1 %vm6446_vm1, %v6445_v12 }
 0xc40   :  { %5820 = vmatprep.subr.mxu1 %v6445_v12 }
 0xc41   :  { %5821 = vmatpush3.msra.mxu1 %v7308_v27 }
 0xc42   :  { %5812 = vmatmul.mubr.msk.f32.gmra.mxu1 %vm207_vm2, %v7030_v40  ;;  %5831 = vmatprep.subr.mxu1 %v6445_v12  ;;  %v6357_v40 = vld [vmem:[%s8107_s9 + $0x10] sm:$0xff] }
 0xc43   :  { %5822 = vmatprep.mubr.msk.f32.mxu1 %vm6446_vm1, %v6445_v12 }
 0xc46   :  { %5823 = vmatmul.mubr.msk.f32.vlgmr.msra.gmra.mxu1 %vm207_vm2, %v7337_v37 }
 0xc47   :  { %5825 = vmatprep.mubr.msk.f32.mxu1 %vm6446_vm1, %v6445_v12  ;;  %5832 = vmatpush3.msra.mxu1 %v6356_v39 }
 0xc48   :  { %5833 = vmatprep.subr.mxu1 %v6445_v12 }
 0xc49   :  { %5834 = vmatpush3.msra.mxu1 %v6357_v40 }
 0xc4a   :  { %5826 = vmatmul.mubr.msk.f32.gmra.mxu1 %vm207_vm2, %v7353_v36  ;;  %5835 = vmatprep.subr.mxu1 %v6445_v12 }
 0xc4b   :  { %5828 = vmatprep.mubr.msk.f32.mxu1 %vm6446_vm1, %v6445_v12  ;;  %5836 = vmatpush3.msra.mxu1 %v6359_v60 }
 0xc4c   :  { %5837 = vmatprep.subr.mxu1 %v6445_v12 }
 0xc4d   :  { %5838 = vmatpush3.msra.mxu1 %v6360_v41 }
 0xc4e   :  { %5829 = vmatmul.mubr.msk.f32.gmra.mxu1 %vm207_vm2, %v7370_v51  ;;  %5865 = vmatprep.subr.mxu1 %v6445_v12 }
 0xc4f   :  { %5839 = vmatprep.mubr.msk.f32.mxu1 %vm6446_vm1, %v6445_v12 }
 0xcfa   :  { %v2464_v63 = vpop.f32.mrf.mxu1 }
 0xcfb   :  { %5857 = vmatmul.mubr.msk.f32.vlgmr.msra.gmra.mxu0 %vm207_vm2, %v2464_v63 }
 0xcfc   :  { %v5807_v0 = vpop.f32.mrf.mxu1  ;;  %5859 = vmatprep.mubr.msk.f32.mxu0 %vm6446_vm1, %v6445_v12 }
 0xcfe   :  { %v2469_v5 = vpop.f32.mrf.mxu1 }
 0xcff   :  { %5860 = vmatmul.mubr.msk.f32.gmra.mxu0 %vm207_vm2, %v2469_v5 }
 0xd00   :  { %v5810_v7 = vpop.f32.mrf.mxu1  ;;  %5862 = vmatprep.mubr.msk.f32.mxu0 %vm6446_vm1, %v6445_v12 }
 0xd02   :  { %v2474_v23 = vpop.f32.mrf.mxu1 }
 0xd03   :  { %5863 = vmatmul.mubr.msk.f32.gmra.mxu0 %vm207_vm2, %v2474_v23 }
 0xd04   :  { %v5813_v19 = vpop.f32.mrf.mxu1  ;;  %5896 = vmatprep.mubr.msk.f32.mxu0 %vm797_vm8, %v7387_v21 }
 0xd06   :  { %v2544_v24 = vpop.f32.mrf.mxu1 }
 0xd07   :  { %5840 = vmatmul.mubr.msk.f32.vlgmr.msra.gmra.mxu1 %vm207_vm2, %v2544_v24 }
 0xd08   :  { %v5824_v30 = vpop.f32.mrf.mxu1  ;;  %5842 = vmatprep.mubr.msk.f32.mxu1 %vm6446_vm1, %v6445_v12  ;;  %5866 = vmatpush3.msra.mxu1 %v6363_v33 }
 0xd09   :  { %5867 = vmatprep.subr.mxu1 %v6445_v12 }
 0xd0a   :  { %v2549_v8 = vpop.f32.mrf.mxu1  ;;  %5868 = vmatpush3.msra.mxu1 %v6364_v9 }
 0xd0b   :  { %5843 = vmatmul.mubr.msk.f32.gmra.mxu1 %vm207_vm2, %v2549_v8  ;;  %5869 = vmatprep.subr.mxu1 %v6445_v12 }
 0xd0c   :  { %v5827_v11 = vpop.f32.mrf.mxu1  ;;  %5845 = vmatprep.mubr.msk.f32.mxu1 %vm6446_vm1, %v6445_v12  ;;  %5870 = vmatpush3.msra.mxu1 %v6365_v14 }
 0xd0d   :  { %5871 = vmatprep.subr.mxu1 %v6445_v12 }
 0xd0e   :  { %v2554_v15 = vpop.f32.mrf.mxu1  ;;  %5872 = vmatpush3.msra.mxu1 %v6366_v18 }
 0xd0f   :  { %5846 = vmatmul.mubr.msk.f32.gmra.mxu1 %vm207_vm2, %v2554_v15  ;;  %5873 = vmatprep.subr.mxu1 %v6445_v12 }
 0xd10   :  { %v5830_v38 = vpop.f32.mrf.mxu1  ;;  %5874 = vmatpush3.msra.mxu1 %v6367_v43  ;;  %5881 = vmatprep.mubr.msk.f32.mxu1 %vm6446_vm1, %v6445_v12 }
 0xd11   :  { %5875 = vmatprep.subr.mxu1 %v6445_v12 }
 0xd12   :  { %5876 = vmatpush3.msra.mxu1 %v6368_v16 }
 0xd13   :  { %5877 = vmatprep.subr.mxu1 %v6445_v12 }
 0xd14   :  { %5878 = vmatpush3.msra.mxu1 %v6369_v44 }
 0xd15   :  { %5879 = vmatprep.subr.mxu1 %v6445_v12 }
 0xd16   :  { %5880 = vmatpush3.msra.mxu1 %v6370_v45 }
 0xd17   :  { %5914 = vmatprep.subr.mxu1 %v7434_v10 }
 0xdbb   :  { %v2722_v28 = vpop.f32.mrf.mxu0 }
 0xdbd   :  { %v5858_v22 = vpop.f32.mrf.mxu0 }
 0xdbf   :  { %v2727_v13 = vpop.f32.mrf.mxu0 }
 0xdc1   :  { %v5861_v20 = vpop.f32.mrf.mxu0 }
 0xdc3   :  { %v2732_v47 = vpop.f32.mrf.mxu0 }
 0xdc5   :  { %v5864_v17 = vpop.f32.mrf.mxu0 }
 0xdc7   :  { %v2633_v29 = vpop.f32.mrf.mxu1 }
 0xdc8   :  { %v2723_v42 = vadd.f32 %v2722_v28, %v2633_v29 }
 0xdc9   :  { %v5841_v34 = vpop.f32.mrf.mxu1 }
 0xdca   :  { %v7440_v35 = vadd.f32 %v6372_v55, %v2723_v42 }
 0xdcb   :  { %v2638_v32 = vpop.f32.mrf.mxu1 }
 0xdcc   :  { %v7443_v25 = vmul.f32 0.70710677, %v7440_v35  ;;  %v2728_v59 = vadd.f32 %v2727_v13, %v2638_v32 }
 0xdcd   :  { %v5844_v58 = vpop.f32.mrf.mxu1 }
 0xdce   :  { %v2745_v48 = vand.u32 2147483647, %v7443_v25  ;;  %v7446_v49 = vadd.f32 %v6372_v55, %v2728_v59  ;;  %vm2805_vm5 = vcmp.ge.f32.partialorder %v7443_v25, 0.0 }
 0xdcf   :  { %v2643_v50 = vpop.f32.mrf.mxu1 }
 0xdd0   :  { %v2748_v56 = vmul.f32 0.3275911, %v2745_v48  ;;  %v7449_v3 = vmul.f32 0.70710677, %v7446_v49  ;;  %v2733_v26 = vadd.f32 %v2732_v47, %v2643_v50  ;;  %v2787_v39 = vsub.f32 0.0, %v2745_v48 }
 0xdd1   :  { %v5847_v31 = vpop.f32.mrf.mxu1 }
 0xdd2   :  { %v2751_v1 = vadd.f32 1.0, %v2748_v56  ;;  %v2746_v62 = vand.u32 2147483647, %v7449_v3  ;;  %v7452_v61 = vadd.f32 %v6372_v55, %v2733_v26  ;;  %v2790_v60 = vmul.f32 %v2787_v39, %v2745_v48 }
 0xdd3   :  { %vm2806_vm6 = vcmp.ge.f32.partialorder %v7449_v3, 0.0  ;;  %v6374_v3 = vld [vmem:[%s8113_s13 + $0x8] sm:$0xff] }
 0xdd4   :  { %6260 = vrcp.f32 %v2751_v1  ;;  %v2749_v4 = vmul.f32 0.3275911, %v2746_v62  ;;  %v7455_v2 = vmul.f32 0.70710677, %v7452_v61  ;;  %v2788_v41 = vsub.f32 0.0, %v2746_v62 }
 0xdd5   :  { %v2793_v5 = vmul.f32 1.442695, %v2790_v60 }
 0xdd6   :  { %v2752_v52 = vadd.f32 1.0, %v2749_v4  ;;  %v2747_v6 = vand.u32 2147483647, %v7455_v2  ;;  %v2791_v7 = vmul.f32 %v2788_v41, %v2746_v62  ;;  %vm2807_vm7 = vcmp.ge.f32.partialorder %v7455_v2, 0.0  ;;  %v6375_v2 = vld [vmem:[%s8113_s13] sm:$0xff] }
 0xdd8   :  { %6262 = vrcp.f32 %v2752_v52  ;;  %v2750_v57 = vmul.f32 0.3275911, %v2747_v6  ;;  %v2789_v23 = vsub.f32 0.0, %v2747_v6  ;;  %v2795_v8 = vmul.f32 1.442695, %v2791_v7 }
 0xdd9   :  { %v2740_v7 = vmul.f32 0.5, %v7446_v49 }
 0xdda   :  { %v2753_v40 = vadd.f32 1.0, %v2750_v57  ;;  %v2792_v9 = vmul.f32 %v2789_v23, %v2747_v6  ;;  %v2739_v57 = vmul.f32 0.5, %v7440_v35 }
 0xddc   :  { %6264 = vrcp.f32 %v2753_v40  ;;  %v2797_v16 = vmul.f32 1.442695, %v2792_v9 }
 0xddd   :  { %6266 = vpow2.f32 %v2793_v5 }
 0xdde   :  { %6268 = vpow2.f32 %v2795_v8 }
 0xddf   :  { %6270 = vpow2.f32 %v2797_v16 }
 0xde1   :  { %v6261_v63 = vpop.eup %6260 }
 0xde2   :  { %v2760_v0 = vmul.f32 1.0614054, %v6261_v63 }
 0xde4   :  { %v2763_v19 = vadd.f32 -1.4531521, %v2760_v0 }
 0xde5   :  { %v6263_v24 = vpop.eup %6262 }
 0xde6   :  { %v2766_v30 = vmul.f32 %v6261_v63, %v2763_v19  ;;  %v2761_v33 = vmul.f32 1.0614054, %v6263_v24 }
 0xde8   :  { %v2769_v11 = vadd.f32 1.4214138, %v2766_v30  ;;  %v2764_v14 = vadd.f32 -1.4531521, %v2761_v33 }
 0xde9   :  { %v6265_v15 = vpop.eup %6264 }
 0xdea   :  { %v2772_v18 = vmul.f32 %v6261_v63, %v2769_v11  ;;  %v2767_v38 = vmul.f32 %v6263_v24, %v2764_v14  ;;  %v2762_v43 = vmul.f32 1.0614054, %v6265_v15  ;;  %v6267_v55 = vpop.eup %6266 }
 0xdeb   :  { %v6269_v26 = vpop.eup %6268 }
 0xdec   :  { %v2775_v44 = vadd.f32 -0.28449672, %v2772_v18  ;;  %v2770_v45 = vadd.f32 1.4214138, %v2767_v38  ;;  %v2765_v28 = vadd.f32 -1.4531521, %v2762_v43  ;;  %v6271_v60 = vpop.eup %6270 }
 0xdee   :  { %v2778_v22 = vmul.f32 %v6261_v63, %v2775_v44  ;;  %v2773_v13 = vmul.f32 %v6263_v24, %v2770_v45  ;;  %v2768_v20 = vmul.f32 %v6265_v15, %v2765_v28 }
 0xdf0   :  { %v2781_v47 = vadd.f32 0.2548296, %v2778_v22  ;;  %v2776_v17 = vadd.f32 -0.28449672, %v2773_v13  ;;  %v2771_v29 = vadd.f32 1.4214138, %v2768_v20 }
 0xdf2   :  { %v2784_v42 = vmul.f32 %v6261_v63, %v2781_v47  ;;  %v2779_v34 = vmul.f32 %v6263_v24, %v2776_v17  ;;  %v2774_v32 = vmul.f32 %v6265_v15, %v2771_v29 }
 0xdf4   :  { %v2799_v59 = vmul.f32 %v6267_v55, %v2784_v42  ;;  %v2782_v58 = vadd.f32 0.2548296, %v2779_v34  ;;  %v2777_v48 = vadd.f32 -0.28449672, %v2774_v32 }
 0xdf6   :  { %v2802_v50 = vsub.f32 1.0, %v2799_v59  ;;  %v2785_v56 = vmul.f32 %v6263_v24, %v2782_v58  ;;  %v2780_v31 = vmul.f32 %v6265_v15, %v2777_v48  ;;  %v6373_v24 = vld [vmem:[%s8113_s13 + $0x10] sm:$0xff]  ;;  %v7491_v48 = vld [vmem:[%s8111_s7 + $0x8] sm:$0xff] }
 0xdf8   :  { %v2808_v1 = vsub.f32 0.0, %v2802_v50  ;;  %v2800_v62 = vmul.f32 %v6269_v26, %v2785_v56  ;;  %v2783_v4 = vadd.f32 0.2548296, %v2780_v31  ;;  %v7505_v56 = vld [vmem:[%s8111_s7 + $0x18] sm:$0xff]  ;;  %v7512_v26 = vld [vmem:[%s8112_s6] sm:$0xff] }
 0xdf9   :  { %v6381_v31 = vld [vmem:[%s8114_s15 + $0x78] sm:$0xff] }
 0xdfa   :  { %v2811_v52 = vsel %vm2805_vm5, %v2802_v50, %v2808_v1  ;;  %v2803_v6 = vsub.f32 1.0, %v2800_v62  ;;  %v2786_v40 = vmul.f32 %v6265_v15, %v2783_v4  ;;  %v7498_v50 = vld [vmem:[%s8111_s7 + $0x10] sm:$0xff]  ;;  %v7522_v1 = vld [vmem:[%s8112_s6 + $0x8] sm:$0xff] }
 0xdfb   :  { %v2814_v39 = vadd.f32 1.0, %v2811_v52  ;;  %v7529_v62 = vld [vmem:[%s8112_s6 + $0x10] sm:$0xff]  ;;  %v7539_v52 = vld [vmem:[%s8112_s6 + $0x18] sm:$0xff] }
 0xdfc   :  { %v2809_v41 = vsub.f32 0.0, %v2803_v6  ;;  %v2801_v0 = vmul.f32 %v6271_v60, %v2786_v40  ;;  %v6384_v4 = vld [vmem:[%s8114_s15 + $0x70] sm:$0xff]  ;;  %v6390_v60 = vld [vmem:[%s8114_s15 + $0x48] sm:$0xff] }
 0xdfd   :  { %v2817_v63 = vmul.f32 %v2814_v39, %v2739_v57  ;;  %v6387_v57 = vld [vmem:[%s8114_s15 + $0x60] sm:$0xff]  ;;  %v6388_v39 = vld [vmem:[%s8114_s15 + $0x58] sm:$0xff]  ;;  %v6389_v40 = vld [vmem:[%s8114_s15 + $0x50] sm:$0xff] }
 0xdfe   :  { %v2812_v5 = vsel %vm2806_vm6, %v2803_v6, %v2809_v41  ;;  %v2804_v19 = vsub.f32 1.0, %v2801_v0  ;;  %v6386_v6 = vld [vmem:[%s8114_s15 + $0x68] sm:$0xff]  ;;  %v6391_v41 = vld [vmem:[%s8114_s15 + $0x40] sm:$0xff]  ;;  %v6393_v0 = vld [vmem:[%s8114_s15 + $0x30] sm:$0xff] }
 0xdff   :  { %v2815_v23 = vadd.f32 1.0, %v2812_v5  ;;  %5882 = vmatmul.mubr.msk.f32.vlgmr.msra.gmra.mxu1 %vm87_vm0, %v2817_v63  ;;  %v6392_v63 = vld [vmem:[%s8114_s15 + $0x38] sm:$0xff]  ;;  %v6394_v5 = vld [vmem:[%s8114_s15 + $0x28] sm:$0xff] }
 0xe00   :  { %5884 = vmatprep.mubr.msk.f32.mxu1 %vm6446_vm1, %v6445_v12  ;;  %5915 = vmatpush3.msra.mxu1 %v7434_v10  ;;  %v2810_v25 = vsub.f32 0.0, %v2804_v19  ;;  %v2741_v10 = vmul.f32 0.5, %v7452_v61  ;;  %v6376_v61 = vld [vmem:[%s8110_s12] ss:$0 sm:$0xff] }
 0xe01   :  { %v2818_v35 = vmul.f32 %v2815_v23, %v2740_v7  ;;  %5916 = vmatprep.subr.mxu1 %v6373_v24  ;;  %v6395_v7 = vld [vmem:[%s8114_s15 + $0x20] sm:$0xff]  ;;  %v6396_v23 = vld [vmem:[%s8114_s15 + $0x18] sm:$0xff] }
 0xe02   :  { %5917 = vmatpush3.msra.mxu1 %v6373_v24  ;;  %v2813_v49 = vsel %vm2807_vm7, %v2804_v19, %v2810_v25  ;;  %v6397_v19 = vld [vmem:[%s8114_s15 + $0x10] sm:$0xff]  ;;  %v6399_v25 = vld [vmem:[%s8114_s15] sm:$0xff] }
 0xe03   :  { %5885 = vmatmul.mubr.msk.f32.gmra.mxu1 %vm87_vm0, %v2818_v35  ;;  %5918 = vmatprep.subr.mxu1 %v6374_v3  ;;  %v2816_v30 = vadd.f32 1.0, %v2813_v49  ;;  %v6398_v35 = vld [vmem:[%s8114_s15 + $0x8] sm:$0xff] }
 0xe04   :  { %5887 = vmatprep.mubr.msk.f32.mxu1 %vm6446_vm1, %v6445_v12  ;;  %5919 = vmatpush3.msra.mxu1 %v6374_v3 }
 0xe05   :  { %5920 = vmatprep.subr.mxu1 %v6375_v2  ;;  %v2819_v33 = vmul.f32 %v2816_v30, %v2741_v10 }
 0xe06   :  { %5921 = vmatpush3.msra.mxu1 %v6375_v2 }
 0xe07   :  { %5966 = vmatprep.subr.mxu1 %v6445_v12  ;;  %5888 = vmatmul.mubr.msk.f32.gmra.mxu1 %vm87_vm0, %v2819_v33 }
 0xebf   :  { %v2895_v8 = vpop.f32.mrf.mxu1 }
 0xec0   :  { %v2896_v43 = vadd.f32 %v6376_v61, %v2895_v8 }
 0xec1   :  { %v5883_v9 = vpop.f32.mrf.mxu1 }
 0xec2   :  { %v2918_v47 = vadd.f32 0.01, %v2896_v43  ;;  %vm2915_vm12 = vcmp.lt.f32.partialorder %v2896_v43, -0.01  ;;  %v5006_v42 = vadd.f32 -0.01, %v2896_v43 }
 0xec3   :  { %v2900_v11 = vpop.f32.mrf.mxu1  ;;  %vm2909_vm14 = vcmp.gt.f32.partialorder %v2896_v43, 0.01 }
 0xec4   :  { %v2901_v14 = vadd.f32 %v6376_v61, %v2900_v11  ;;  %v2921_v34 = vsel %vm2915_vm12, %v2918_v47, 0.0 }
 0xec5   :  { %v5886_v15 = vpop.f32.mrf.mxu1  ;;  %v2924_v55 = vsel %vm2909_vm14, %v5006_v42, %v2921_v34 }
 0xec6   :  { %v5007_v18 = vadd.f32 -0.01, %v2901_v14  ;;  %vm2916_vm9 = vcmp.lt.f32.partialorder %v2901_v14, -0.01  ;;  %v2919_v38 = vadd.f32 0.01, %v2901_v14 }
 0xec7   :  { %v2905_v16 = vpop.f32.mrf.mxu1  ;;  %vm2910_vm10 = vcmp.gt.f32.partialorder %v2901_v14, 0.01 }
 0xec8   :  { %v2906_v44 = vadd.f32 %v6376_v61, %v2905_v16  ;;  %v2922_v45 = vsel %vm2916_vm9, %v2919_v38, 0.0 }
 0xec9   :  { %v5889_v28 = vpop.f32.mrf.mxu1  ;;  %v2925_v22 = vsel %vm2910_vm10, %v5007_v18, %v2922_v45 }
 0xeca   :  { %2932 = vrot.lane.b32.xlu1 %v2925_v22, %s6447_s28  ;;  %v5008_v13 = vadd.f32 -0.01, %v2906_v44  ;;  %vm2917_vm11 = vcmp.lt.f32.partialorder %v2906_v44, -0.01  ;;  %v2920_v20 = vadd.f32 0.01, %v2906_v44 }
 0xecb   :  { %vm2911_vm13 = vcmp.gt.f32.partialorder %v2906_v44, 0.01  ;;  %v6400_v44 = vld [vmem:[%s8115_s14] ss:$0 sm:$0xff] }
 0xecc   :  { %v2923_v17 = vsel %vm2917_vm11, %v2920_v20, 0.0 }
 0xecd   :  { %v2926_v29 = vsel %vm2911_vm13, %v5008_v13, %v2923_v17 }
 0xece   :  { %2934 = vrot.lane.b32.xlu0 %v2926_v29, %s6447_s28 }
 0xed2   :  { %2930 = vrot.lane.b32.xlu0 %v2924_v55, %s6447_s28 }
 0xf3c   :  { %v2933_v59 = vpop.permute.xlu1 %2932 }
 0xf40   :  { %v2935_v32 = vpop.permute.xlu0 %2934 }
 0xf41   :  { %5890 = vmatprep.subr.mxu0 %v2935_v32 }
 0xf42   :  { %5891 = vmatpush3.msra.mxu0 %v2935_v32 }
 0xf43   :  { %5892 = vmatprep.subr.mxu0 %v2933_v59 }
 0xf44   :  { %5893 = vmatpush3.msra.mxu0 %v2933_v59  ;;  %v2931_v58 = vpop.permute.xlu0 %2930 }
 0xf45   :  { %5894 = vmatprep.subr.mxu0 %v2931_v58 }
 0xf46   :  { %5895 = vmatpush3.msra.mxu0 %v2931_v58 }
 0xf47   :  { %5897 = vmatmul.mubr.msk.f32.vlgmr.msra.gmra.mxu0 %vm797_vm8, %v7491_v48  ;;  %5902 = vmatprep.subr.mxu0 %v2926_v29 }
 0xf48   :  { %5903 = vmatpush3.msra.mxu0 %v2926_v29  ;;  %5899 = vmatprep.mubr.msk.f32.mxu0 %vm797_vm8, %v7498_v50 }
 0xf49   :  { %5904 = vmatprep.subr.mxu0 %v2925_v22 }
 0xf4a   :  { %5905 = vmatpush3.msra.mxu0 %v2925_v22 }
 0xf4b   :  { %5900 = vmatmul.mubr.msk.f32.gmra.mxu0 %vm797_vm8, %v7505_v56  ;;  %5906 = vmatprep.subr.mxu0 %v2924_v55 }
 0xf4c   :  { %5907 = vmatpush3.msra.mxu0 %v2924_v55  ;;  %5908 = vmatprep.mubr.msk.f32.mxu0 %vm797_vm8, %v7512_v26 }
 0xf4d   :  { %5928 = vmatprep.subr.mxu0 %v6381_v31 }
 0xf4f   :  { %5909 = vmatmul.mubr.msk.f32.vlgmr.msra.gmra.mxu0 %vm797_vm8, %v7522_v1 }
 0xf50   :  { %5911 = vmatprep.mubr.msk.f32.mxu0 %vm797_vm8, %v7529_v62  ;;  %5929 = vmatpush3.msra.mxu0 %v6381_v31 }
 0xf51   :  { %5930 = vmatprep.subr.mxu0 %v6384_v4 }
 0xf52   :  { %5931 = vmatpush3.msra.mxu0 %v6384_v4 }
 0xf53   :  { %5912 = vmatmul.mubr.msk.f32.gmra.mxu0 %vm797_vm8, %v7539_v52  ;;  %5932 = vmatprep.subr.mxu0 %v6386_v6 }
 0xf54   :  { %5933 = vmatpush3.msra.mxu0 %v6386_v6 }
 0xf55   :  { %5934 = vmatprep.subr.mxu0 %v6387_v57 }
 0xf56   :  { %5935 = vmatpush3.msra.mxu0 %v6387_v57 }
 0xf57   :  { %5936 = vmatprep.subr.mxu0 %v6388_v39 }
 0xf58   :  { %5937 = vmatpush3.msra.mxu0 %v6388_v39 }
 0xf59   :  { %5938 = vmatprep.subr.mxu0 %v6389_v40 }
 0xf5a   :  { %5939 = vmatpush3.msra.mxu0 %v6389_v40 }
 0xf5b   :  { %5940 = vmatprep.subr.mxu0 %v6390_v60 }
 0xf5c   :  { %5941 = vmatpush3.msra.mxu0 %v6390_v60 }
 0xf5d   :  { %5942 = vmatprep.subr.mxu0 %v6391_v41 }
 0xf5e   :  { %5943 = vmatpush3.msra.mxu0 %v6391_v41 }
 0xf5f   :  { %5944 = vmatprep.subr.mxu0 %v6392_v63 }
 0xf60   :  { %5945 = vmatpush3.msra.mxu0 %v6392_v63 }
 0xf61   :  { %5946 = vmatprep.subr.mxu0 %v6393_v0 }
 0xf62   :  { %5947 = vmatpush3.msra.mxu0 %v6393_v0 }
 0xf63   :  { %5948 = vmatprep.subr.mxu0 %v6394_v5 }
 0xf64   :  { %5949 = vmatpush3.msra.mxu0 %v6394_v5 }
 0xf65   :  { %5950 = vmatprep.subr.mxu0 %v6395_v7 }
 0xf66   :  { %5951 = vmatpush3.msra.mxu0 %v6395_v7 }
 0xf67   :  { %5952 = vmatprep.subr.mxu0 %v6396_v23 }
 0xf68   :  { %5953 = vmatpush3.msra.mxu0 %v6396_v23 }
 0xf69   :  { %5954 = vmatprep.subr.mxu0 %v6397_v19 }
 0xf6a   :  { %5955 = vmatpush3.msra.mxu0 %v6397_v19 }
 0xf6b   :  { %5956 = vmatprep.subr.mxu0 %v6398_v35 }
 0xf6c   :  { %5957 = vmatpush3.msra.mxu0 %v6398_v35 }
 0xf6d   :  { %5958 = vmatprep.subr.mxu0 %v6399_v25 }
 0xf6e   :  { %5959 = vmatpush3.msra.mxu0 %v6399_v25 }
 0xf6f   :  { %6017 = vmatprep.subr.mxu0 %v6445_v12 }
0x1007   :  { %v5898_v24 = vpop.f32.mrf.mxu0 }
0x1009   :  { %v3005_v49 = vpop.f32.mrf.mxu0 }
0x100b   :  { %v5901_v3 = vpop.f32.mrf.mxu0 }
0x100d   :  { %v3015_v10 = vpop.f32.mrf.mxu0 }
0x100f   :  { %v5910_v30 = vpop.f32.mrf.mxu0 }
0x1010   :  { %v3096_v2 = vadd.f32 %v5910_v30, %v5898_v24 }
0x1011   :  { %v3090_v33 = vpop.f32.mrf.mxu0 }
0x1012   :  { %v3091_v8 = vadd.f32 %v3090_v33, %v3005_v49  ;;  %v3110_v61 = vadd.f32 %v3096_v2, %v7304_v54 }
0x1013   :  { %v5913_v9 = vpop.f32.mrf.mxu0 }
0x1014   :  { %v3109_v11 = vadd.f32 %v3091_v8, %v7308_v27  ;;  %v3106_v14 = vadd.f32 %v5913_v9, %v5901_v3 }
0x1015   :  { %v3100_v15 = vpop.f32.mrf.mxu0 }
0x1016   :  { %v3101_v18 = vadd.f32 %v3100_v15, %v3015_v10  ;;  %5922 = vmatprep.mubr.msk.f32.mxu1 %vm207_vm2, %v3109_v11  ;;  %v3112_v43 = vadd.f32 %v3106_v14, %v7298_v46 }
0x1017   :  { %5923 = vmatmul.mubr.msk.f32.vlgmr.msra.gmra.mxu1 %vm207_vm2, %v3110_v61 }
0x1018   :  { %v3111_v38 = vadd.f32 %v3101_v18, %v7300_v53 }
0x101a   :  { %5925 = vmatprep.mubr.msk.f32.mxu1 %vm207_vm2, %v3111_v38 }
0x101b   :  { %5926 = vmatmul.mubr.msk.f32.gmra.mxu1 %vm207_vm2, %v3112_v43 }
0x101c   :  { %5974 = vmatprep.mubr.msk.f32.mxu1 %vm6446_vm1, %v6445_v12 }
0x10d7   :  { %v5924_v16 = vpop.f32.mrf.mxu1 }
0x10d8   :  { %v7599_v45 = vadd.f32 %v6400_v44, %v5924_v16 }
0x10d9   :  { %v3191_v28 = vpop.f32.mrf.mxu1 }
0x10da   :  { %v7602_v22 = vmul.f32 0.70710677, %v7599_v45  ;;  %v7604_v13 = vadd.f32 %v6400_v44, %v3191_v28 }
0x10db   :  { %v5927_v20 = vpop.f32.mrf.mxu1 }
0x10dc   :  { %v3219_v47 = vand.u32 2147483647, %v7602_v22  ;;  %v7608_v17 = vmul.f32 0.70710677, %v7604_v13  ;;  %v7610_v29 = vadd.f32 %v6400_v44, %v5927_v20  ;;  %vm3299_vm15 = vcmp.ge.f32.partialorder %v7602_v22, 0.0 }
0x10dd   :  { %v3201_v42 = vpop.f32.mrf.mxu1  ;;  %v3211_v22 = vmul.f32 0.5, %v7599_v45 }
0x10de   :  { %v3223_v34 = vmul.f32 0.3275911, %v3219_v47  ;;  %v3218_v55 = vand.u32 2147483647, %v7608_v17  ;;  %v7614_v32 = vmul.f32 0.70710677, %v7610_v29  ;;  %v7616_v59 = vadd.f32 %v6400_v44, %v3201_v42 }
0x10df   :  { %v3275_v0 = vsub.f32 0.0, %v3219_v47  ;;  %vm3298_vm3 = vcmp.ge.f32.partialorder %v7608_v17, 0.0 }
0x10e0   :  { %v3227_v58 = vadd.f32 1.0, %v3223_v34  ;;  %v3222_v31 = vmul.f32 0.3275911, %v3218_v55  ;;  %v3221_v4 = vand.u32 2147483647, %v7614_v32  ;;  %v3274_v5 = vsub.f32 0.0, %v3218_v55 }
0x10e1   :  { %v7620_v6 = vmul.f32 0.70710677, %v7616_v59  ;;  %v3279_v7 = vmul.f32 %v3275_v0, %v3219_v47  ;;  %vm3301_vm4 = vcmp.ge.f32.partialorder %v7614_v32, 0.0  ;;  %v6401_v32 = vld [vmem:[%s8106_s8 + $0x38] sm:$0xff] }
0x10e2   :  { %6272 = vrcp.f32 %v3227_v58  ;;  %v3226_v57 = vadd.f32 1.0, %v3222_v31  ;;  %v3225_v39 = vmul.f32 0.3275911, %v3221_v4  ;;  %v3277_v23 = vsub.f32 0.0, %v3221_v4 }
0x10e3   :  { %v3220_v40 = vand.u32 2147483647, %v7620_v6  ;;  %v3278_v35 = vmul.f32 %v3274_v5, %v3218_v55  ;;  %v3284_v24 = vmul.f32 1.442695, %v3279_v7  ;;  %vm3300_vm5 = vcmp.ge.f32.partialorder %v7620_v6, 0.0  ;;  %v6402_v6 = vld [vmem:[%s8106_s8 + $0x30] sm:$0xff] }
0x10e4   :  { %6274 = vrcp.f32 %v3226_v57  ;;  %v3229_v60 = vadd.f32 1.0, %v3225_v39  ;;  %v3281_v3 = vmul.f32 %v3277_v23, %v3221_v4 }
0x10e5   :  { %v3224_v41 = vmul.f32 0.3275911, %v3220_v40  ;;  %v3276_v49 = vsub.f32 0.0, %v3220_v40  ;;  %v3282_v2 = vmul.f32 1.442695, %v3278_v35 }
0x10e6   :  { %6276 = vrcp.f32 %v3229_v60  ;;  %v3288_v61 = vmul.f32 1.442695, %v3281_v3 }
0x10e7   :  { %v3228_v63 = vadd.f32 1.0, %v3224_v41  ;;  %v3280_v11 = vmul.f32 %v3276_v49, %v3220_v40 }
0x10e9   :  { %6278 = vrcp.f32 %v3228_v63  ;;  %v3286_v28 = vmul.f32 1.442695, %v3280_v11 }
0x10ea   :  { %6280 = vpow2.f32 %v3284_v24 }
0x10eb   :  { %6282 = vpow2.f32 %v3282_v2 }
0x10ec   :  { %6284 = vpow2.f32 %v3288_v61 }
0x10ed   :  { %6286 = vpow2.f32 %v3286_v28 }
0x10ef   :  { %v6273_v19 = vpop.eup %6272 }
0x10f0   :  { %v3239_v25 = vmul.f32 1.0614054, %v6273_v19 }
0x10f1   :  { %v6275_v10 = vpop.eup %6274 }
0x10f2   :  { %v3243_v30 = vadd.f32 -1.4531521, %v3239_v25  ;;  %v3238_v33 = vmul.f32 1.0614054, %v6275_v10 }
0x10f3   :  { %v6277_v8 = vpop.eup %6276 }
0x10f4   :  { %v3247_v9 = vmul.f32 %v6273_v19, %v3243_v30  ;;  %v3242_v14 = vadd.f32 -1.4531521, %v3238_v33  ;;  %v3241_v15 = vmul.f32 1.0614054, %v6277_v8 }
0x10f6   :  { %v3251_v18 = vadd.f32 1.4214138, %v3247_v9  ;;  %v6279_v38 = vpop.eup %6278  ;;  %v3246_v43 = vmul.f32 %v6275_v10, %v3242_v14  ;;  %v3245_v16 = vadd.f32 -1.4531521, %v3241_v15 }
0x10f7   :  { %v3240_v20 = vmul.f32 1.0614054, %v6279_v38  ;;  %v6281_v23 = vpop.eup %6280 }
0x10f8   :  { %v3255_v44 = vmul.f32 %v6273_v19, %v3251_v18  ;;  %v3250_v47 = vadd.f32 1.4214138, %v3246_v43  ;;  %v3249_v42 = vmul.f32 %v6277_v8, %v3245_v16  ;;  %v6283_v2 = vpop.eup %6282 }
0x10f9   :  { %v3244_v55 = vadd.f32 -1.4531521, %v3240_v20  ;;  %v6285_v14 = vpop.eup %6284 }
0x10fa   :  { %v3259_v34 = vadd.f32 -0.28449672, %v3255_v44  ;;  %v3254_v58 = vmul.f32 %v6275_v10, %v3250_v47  ;;  %v3253_v31 = vadd.f32 1.4214138, %v3249_v42  ;;  %v6287_v28 = vpop.eup %6286 }
0x10fb   :  { %v3248_v57 = vmul.f32 %v6279_v38, %v3244_v55 }
0x10fc   :  { %v3263_v4 = vmul.f32 %v6273_v19, %v3259_v34  ;;  %v3258_v39 = vadd.f32 -0.28449672, %v3254_v58  ;;  %v3257_v40 = vmul.f32 %v6277_v8, %v3253_v31 }
0x10fd   :  { %v3252_v41 = vadd.f32 1.4214138, %v3248_v57 }
0x10fe   :  { %v3267_v60 = vadd.f32 0.2548296, %v3263_v4  ;;  %v3262_v63 = vmul.f32 %v6275_v10, %v3258_v39  ;;  %v3261_v0 = vadd.f32 -0.28449672, %v3257_v40 }
0x10ff   :  { %v3256_v7 = vmul.f32 %v6279_v38, %v3252_v41 }
0x1100   :  { %v3271_v5 = vmul.f32 %v6273_v19, %v3267_v60  ;;  %v3266_v35 = vadd.f32 0.2548296, %v3262_v63  ;;  %v3265_v25 = vmul.f32 %v6277_v8, %v3261_v0  ;;  %v3212_v60 = vmul.f32 0.5, %v7616_v59  ;;  %v6404_v59 = vld [vmem:[%s8106_s8 + $0x20] sm:$0xff] }
0x1101   :  { %v3260_v49 = vadd.f32 -0.28449672, %v3256_v7 }
0x1102   :  { %v3291_v24 = vmul.f32 %v6281_v23, %v3271_v5  ;;  %v3270_v3 = vmul.f32 %v6275_v10, %v3266_v35  ;;  %v3269_v30 = vadd.f32 0.2548296, %v3265_v25  ;;  %v6405_v23 = vld [vmem:[%s8116_s16] ss:$0 sm:$0xff] }
0x1103   :  { %v3264_v9 = vmul.f32 %v6279_v38, %v3260_v49 }
0x1104   :  { %v3295_v33 = vsub.f32 1.0, %v3291_v24  ;;  %v3290_v11 = vmul.f32 %v6283_v2, %v3270_v3  ;;  %v3273_v61 = vmul.f32 %v6277_v8, %v3269_v30  ;;  %v3210_v8 = vmul.f32 0.5, %v7604_v13  ;;  %v6406_v30 = vld [vmem:[%s8137_s23] sm:$0xff]  ;;  %v6407_v2 = vld [vmem:[%s8137_s23 + $0x8] sm:$0xff] }
0x1105   :  { %v3268_v18 = vadd.f32 0.2548296, %v3264_v9  ;;  %v3213_v13 = vmul.f32 0.5, %v7610_v29  ;;  %v6403_v29 = vld [vmem:[%s8106_s8 + $0x28] sm:$0xff]  ;;  %v6409_v9 = vld [vmem:[%s8107_s9 + $0x38] sm:$0xff] }
0x1106   :  { %v3303_v15 = vsub.f32 0.0, %v3295_v33  ;;  %v3294_v43 = vsub.f32 1.0, %v3290_v11  ;;  %v3293_v19 = vmul.f32 %v6285_v14, %v3273_v61  ;;  %v6410_v11 = vld [vmem:[%s8107_s9 + $0x30] sm:$0xff]  ;;  %v6412_v61 = vld [vmem:[%s8107_s9 + $0x20] sm:$0xff] }
0x1107   :  { %v3272_v44 = vmul.f32 %v6279_v38, %v3268_v18 }
0x1108   :  { %v3307_v16 = vsel %vm3299_vm15, %v3295_v33, %v3303_v15  ;;  %v3302_v20 = vsub.f32 0.0, %v3294_v43  ;;  %v3297_v47 = vsub.f32 1.0, %v3293_v19  ;;  %v6408_v33 = vld [vmem:[%s8137_s23 + $0x10] sm:$0xff] }
0x1109   :  { %v3292_v10 = vmul.f32 %v6287_v28, %v3272_v44  ;;  %v3311_v42 = vadd.f32 1.0, %v3307_v16  ;;  %v6413_v44 = vld [vmem:[%s8108_s11 + $0x78] sm:$0xff] }
0x110a   :  { %v3306_v34 = vsel %vm3298_vm3, %v3294_v43, %v3302_v20  ;;  %v3305_v55 = vsub.f32 0.0, %v3297_v47  ;;  %v6414_v20 = vld [vmem:[%s8108_s11 + $0x70] sm:$0xff] }
0x110b   :  { %v3310_v58 = vadd.f32 1.0, %v3306_v34  ;;  %v3296_v31 = vsub.f32 1.0, %v3292_v10  ;;  %v3315_v39 = vmul.f32 %v3311_v42, %v3211_v22  ;;  %v6416_v42 = vld [vmem:[%s8108_s11 + $0x60] sm:$0xff]  ;;  %v7773_v22 = vld [vmem:[%s8113_s13 + $0x38] sm:$0xff] }
0x110c   :  { %v3309_v4 = vsel %vm3301_vm4, %v3297_v47, %v3305_v55  ;;  %v6415_v47 = vld [vmem:[%s8108_s11 + $0x68] sm:$0xff]  ;;  %v6417_v55 = vld [vmem:[%s8108_s11 + $0x58] sm:$0xff] }
0x110d   :  { %v3314_v57 = vmul.f32 %v3310_v58, %v3210_v8  ;;  %v3304_v38 = vsub.f32 0.0, %v3296_v31  ;;  %v3313_v40 = vadd.f32 1.0, %v3309_v4  ;;  %v6418_v8 = vld [vmem:[%s8108_s11 + $0x50] sm:$0xff]  ;;  %v6419_v58 = vld [vmem:[%s8108_s11 + $0x48] sm:$0xff] }
0x110f   :  { %5960 = vmatprep.mubr.f32.mxu0 %v3314_v57  ;;  %v3308_v17 = vsel %vm3300_vm5, %v3296_v31, %v3304_v38  ;;  %v3317_v63 = vmul.f32 %v3313_v40, %v3213_v13  ;;  %v6420_v31 = vld [vmem:[%s8108_s11 + $0x40] sm:$0xff] }
0x1110   :  { %5961 = vmatmul.mubr.f32.vlgmr.msra.gmra.mxu0 %v3315_v39  ;;  %v3312_v41 = vadd.f32 1.0, %v3308_v17 }
0x1111   :  { %6018 = vmatpush3.msra.mxu0 %v6401_v32  ;;  %v6422_v32 = vld [vmem:[%s8109_s10 + $0x1] ss:$0 sm:$0xff] }
0x1112   :  { %v3316_v45 = vmul.f32 %v3312_v41, %v3212_v60  ;;  %6019 = vmatprep.subr.mxu0 %v6445_v12 }
0x1113   :  { %6020 = vmatpush3.msra.mxu0 %v6402_v6 }
0x1114   :  { %5963 = vmatprep.mubr.f32.mxu0 %v3316_v45  ;;  %6021 = vmatprep.subr.mxu0 %v6445_v12 }
0x1115   :  { %5964 = vmatmul.mubr.f32.gmra.mxu0 %v3317_v63 }
0x1116   :  { %6022 = vmatpush3.msra.mxu0 %v6403_v29  ;;  %6025 = vmatprep.mubr.msk.f32.mxu0 %vm6446_vm1, %v6445_v12 }
0x1117   :  { %6023 = vmatprep.subr.mxu0 %v6445_v12 }
0x1118   :  { %6024 = vmatpush3.msra.mxu0 %v6404_v59 }
0x11d0   :  { %v5962_v0 = vpop.f32.mrf.mxu0 }
0x11d1   :  { %v7657_v49 = vadd.f32 %v6405_v23, %v5962_v0 }
0x11d2   :  { %v3384_v5 = vpop.f32.mrf.mxu0 }
0x11d3   :  { %v7661_v3 = vadd.f32 %v6405_v23, %v3384_v5 }
0x11d5   :  { %v5965_v7 = vpop.f32.mrf.mxu0 }
0x11d6   :  { %v7651_v35 = vadd.f32 %v6405_v23, %v5965_v7 }
0x11d7   :  { %v3394_v25 = vpop.f32.mrf.mxu0 }
0x11d8   :  { %v7653_v24 = vadd.f32 %v6405_v23, %v3394_v25  ;;  %5967 = vmatpush3.msra.mxu1 %v7651_v35 }
0x11d9   :  { %5968 = vmatprep.subr.mxu1 %v6445_v12 }
0x11da   :  { %5969 = vmatpush3.msra.mxu1 %v7653_v24 }
0x11db   :  { %5970 = vmatprep.subr.mxu1 %v6445_v12 }
0x11dc   :  { %5971 = vmatpush3.msra.mxu1 %v7657_v49 }
0x11dd   :  { %5972 = vmatprep.subr.mxu1 %v6445_v12 }
0x11de   :  { %5973 = vmatpush3.msra.mxu1 %v7661_v3 }
0x11df   :  { %5975 = vmatmul.mubr.msk.f32.vlgmr.msra.gmra.mxu1 %vm207_vm2, %v6406_v30  ;;  %5983 = vmatprep.subr.mxu1 %v6445_v12 }
0x11e0   :  { %5984 = vmatpush3.msra.mxu1 %v7651_v35  ;;  %5977 = vmatprep.mubr.msk.f32.mxu1 %vm6446_vm1, %v6445_v12 }
0x11e1   :  { %5985 = vmatprep.subr.mxu1 %v6445_v12 }
0x11e2   :  { %5986 = vmatpush3.msra.mxu1 %v7653_v24 }
0x11e3   :  { %5978 = vmatmul.mubr.msk.f32.gmra.mxu1 %vm207_vm2, %v6407_v2  ;;  %5987 = vmatprep.subr.mxu1 %v6445_v12 }
0x11e4   :  { %5988 = vmatpush3.msra.mxu1 %v7657_v49  ;;  %5980 = vmatprep.mubr.msk.f32.mxu1 %vm6446_vm1, %v6445_v12 }
0x11e5   :  { %5989 = vmatprep.subr.mxu1 %v6445_v12 }
0x11e6   :  { %5990 = vmatpush3.msra.mxu1 %v7661_v3 }
0x11e7   :  { %5981 = vmatmul.mubr.msk.f32.gmra.mxu1 %vm207_vm2, %v6408_v33  ;;  %6000 = vmatprep.subr.mxu1 %v6445_v12 }
0x11e8   :  { %5991 = vmatprep.mubr.msk.f32.mxu1 %vm6446_vm1, %v6445_v12 }
0x11eb   :  { %5992 = vmatmul.mubr.msk.f32.vlgmr.msra.gmra.mxu1 %vm207_vm2, %v7337_v37  ;;  %v6411_v37 = vld [vmem:[%s8107_s9 + $0x28] sm:$0xff] }
0x11ec   :  { %5994 = vmatprep.mubr.msk.f32.mxu1 %vm6446_vm1, %v6445_v12  ;;  %6001 = vmatpush3.msra.mxu1 %v6409_v9 }
0x11ed   :  { %6002 = vmatprep.subr.mxu1 %v6445_v12 }
0x11ee   :  { %6003 = vmatpush3.msra.mxu1 %v6410_v11 }
0x11ef   :  { %5995 = vmatmul.mubr.msk.f32.gmra.mxu1 %vm207_vm2, %v7353_v36  ;;  %6004 = vmatprep.subr.mxu1 %v6445_v12 }
0x11f0   :  { %5997 = vmatprep.mubr.msk.f32.mxu1 %vm6446_vm1, %v6445_v12  ;;  %6005 = vmatpush3.msra.mxu1 %v6411_v37 }
0x11f1   :  { %6006 = vmatprep.subr.mxu1 %v6445_v12 }
0x11f2   :  { %6007 = vmatpush3.msra.mxu1 %v6412_v61 }
0x11f3   :  { %5998 = vmatmul.mubr.msk.f32.gmra.mxu1 %vm207_vm2, %v7370_v51  ;;  %6034 = vmatprep.subr.mxu1 %v6445_v12 }
0x11f4   :  { %6008 = vmatprep.mubr.msk.f32.mxu1 %vm6446_vm1, %v6445_v12 }
0x129f   :  { %v3469_v36 = vpop.f32.mrf.mxu1 }
0x12a0   :  { %6026 = vmatmul.mubr.msk.f32.vlgmr.msra.gmra.mxu0 %vm207_vm2, %v3469_v36 }
0x12a1   :  { %v5976_v14 = vpop.f32.mrf.mxu1  ;;  %6028 = vmatprep.mubr.msk.f32.mxu0 %vm6446_vm1, %v6445_v12 }
0x12a3   :  { %v3474_v15 = vpop.f32.mrf.mxu1 }
0x12a4   :  { %6029 = vmatmul.mubr.msk.f32.gmra.mxu0 %vm207_vm2, %v3474_v15 }
0x12a5   :  { %v5979_v18 = vpop.f32.mrf.mxu1  ;;  %6031 = vmatprep.mubr.msk.f32.mxu0 %vm6446_vm1, %v6445_v12 }
0x12a7   :  { %v3479_v51 = vpop.f32.mrf.mxu1 }
0x12a8   :  { %6032 = vmatmul.mubr.msk.f32.gmra.mxu0 %vm207_vm2, %v3479_v51 }
0x12a9   :  { %v5982_v43 = vpop.f32.mrf.mxu1  ;;  %6065 = vmatprep.mubr.msk.f32.mxu0 %vm797_vm8, %v7387_v21 }
0x12ab   :  { %v3549_v19 = vpop.f32.mrf.mxu1 }
0x12ac   :  { %6009 = vmatmul.mubr.msk.f32.vlgmr.msra.gmra.mxu1 %vm207_vm2, %v3549_v19 }
0x12ad   :  { %v5993_v16 = vpop.f32.mrf.mxu1  ;;  %6011 = vmatprep.mubr.msk.f32.mxu1 %vm6446_vm1, %v6445_v12  ;;  %6035 = vmatpush3.msra.mxu1 %v6413_v44 }
0x12ae   :  { %6036 = vmatprep.subr.mxu1 %v6445_v12 }
0x12af   :  { %v3554_v28 = vpop.f32.mrf.mxu1  ;;  %6037 = vmatpush3.msra.mxu1 %v6414_v20 }
0x12b0   :  { %6012 = vmatmul.mubr.msk.f32.gmra.mxu1 %vm207_vm2, %v3554_v28  ;;  %6038 = vmatprep.subr.mxu1 %v6445_v12 }
0x12b1   :  { %v5996_v21 = vpop.f32.mrf.mxu1  ;;  %6014 = vmatprep.mubr.msk.f32.mxu1 %vm6446_vm1, %v6445_v12  ;;  %6039 = vmatpush3.msra.mxu1 %v6415_v47 }
0x12b2   :  { %6040 = vmatprep.subr.mxu1 %v6445_v12 }
0x12b3   :  { %v3559_v10 = vpop.f32.mrf.mxu1  ;;  %6041 = vmatpush3.msra.mxu1 %v6416_v42 }
0x12b4   :  { %6015 = vmatmul.mubr.msk.f32.gmra.mxu1 %vm207_vm2, %v3559_v10  ;;  %6042 = vmatprep.subr.mxu1 %v6445_v12 }
0x12b5   :  { %v5999_v34 = vpop.f32.mrf.mxu1  ;;  %6043 = vmatpush3.msra.mxu1 %v6417_v55  ;;  %6050 = vmatprep.mubr.msk.f32.mxu1 %vm6446_vm1, %v6445_v12 }
0x12b6   :  { %6044 = vmatprep.subr.mxu1 %v6445_v12 }
0x12b7   :  { %6045 = vmatpush3.msra.mxu1 %v6418_v8 }
0x12b8   :  { %6046 = vmatprep.subr.mxu1 %v6445_v12 }
0x12b9   :  { %6047 = vmatpush3.msra.mxu1 %v6419_v58 }
0x12ba   :  { %6048 = vmatprep.subr.mxu1 %v6445_v12 }
0x12bb   :  { %6049 = vmatpush3.msra.mxu1 %v6420_v31 }
0x12bc   :  { %6083 = vmatprep.subr.mxu1 %v7773_v22 }
0x1360   :  { %v3727_v4 = vpop.f32.mrf.mxu0 }
0x1362   :  { %v6027_v57 = vpop.f32.mrf.mxu0 }
0x1364   :  { %v3732_v38 = vpop.f32.mrf.mxu0 }
0x1366   :  { %v6030_v39 = vpop.f32.mrf.mxu0 }
0x1368   :  { %v3737_v17 = vpop.f32.mrf.mxu0 }
0x136a   :  { %v6033_v40 = vpop.f32.mrf.mxu0 }
0x136c   :  { %v3638_v60 = vpop.f32.mrf.mxu1 }
0x136d   :  { %v3728_v41 = vadd.f32 %v3727_v4, %v3638_v60 }
0x136e   :  { %v6010_v13 = vpop.f32.mrf.mxu1 }
0x136f   :  { %v7779_v45 = vadd.f32 %v6422_v32, %v3728_v41 }
0x1370   :  { %v3643_v63 = vpop.f32.mrf.mxu1 }
0x1371   :  { %v7782_v6 = vmul.f32 0.70710677, %v7779_v45  ;;  %v3733_v29 = vadd.f32 %v3732_v38, %v3643_v63 }
0x1372   :  { %v6013_v59 = vpop.f32.mrf.mxu1 }
0x1373   :  { %v3750_v0 = vand.u32 2147483647, %v7782_v6  ;;  %v7785_v5 = vadd.f32 %v6422_v32, %v3733_v29  ;;  %vm3810_vm6 = vcmp.ge.f32.partialorder %v7782_v6, 0.0 }
0x1374   :  { %v3648_v7 = vpop.f32.mrf.mxu1 }
0x1375   :  { %v3753_v23 = vmul.f32 0.3275911, %v3750_v0  ;;  %v7788_v25 = vmul.f32 0.70710677, %v7785_v5  ;;  %v3738_v30 = vadd.f32 %v3737_v17, %v3648_v7  ;;  %v3792_v18 = vsub.f32 0.0, %v3750_v0 }
0x1376   :  { %v6016_v2 = vpop.f32.mrf.mxu1 }
0x1377   :  { %v3756_v33 = vadd.f32 1.0, %v3753_v23  ;;  %v3751_v9 = vand.u32 2147483647, %v7788_v25  ;;  %v7791_v11 = vadd.f32 %v6422_v32, %v3738_v30  ;;  %v3795_v43 = vmul.f32 %v3792_v18, %v3750_v0 }
0x1378   :  { %vm3811_vm7 = vcmp.ge.f32.partialorder %v7788_v25, 0.0  ;;  %v6424_v25 = vld [vmem:[%s8113_s13 + $0x28] sm:$0xff] }
0x1379   :  { %6288 = vrcp.f32 %v3756_v33  ;;  %v3754_v37 = vmul.f32 0.3275911, %v3751_v9  ;;  %v7794_v61 = vmul.f32 0.70710677, %v7791_v11  ;;  %v3793_v19 = vsub.f32 0.0, %v3751_v9 }
0x137a   :  { %v3798_v28 = vmul.f32 1.442695, %v3795_v43 }
0x137b   :  { %v3757_v36 = vadd.f32 1.0, %v3754_v37  ;;  %v3752_v14 = vand.u32 2147483647, %v7794_v61  ;;  %v3796_v20 = vmul.f32 %v3793_v19, %v3751_v9  ;;  %vm3812_vm9 = vcmp.ge.f32.partialorder %v7794_v61, 0.0  ;;  %v6425_v61 = vld [vmem:[%s8113_s13 + $0x20] sm:$0xff] }
0x137d   :  { %6290 = vrcp.f32 %v3757_v36  ;;  %v3755_v15 = vmul.f32 0.3275911, %v3752_v14  ;;  %v3794_v21 = vsub.f32 0.0, %v3752_v14  ;;  %v3800_v55 = vmul.f32 1.442695, %v3796_v20 }
0x137e   :  { %v3744_v20 = vmul.f32 0.5, %v7779_v45 }
0x137f   :  { %v3758_v51 = vadd.f32 1.0, %v3755_v15  ;;  %v3797_v8 = vmul.f32 %v3794_v21, %v3752_v14 }
0x1381   :  { %6292 = vrcp.f32 %v3758_v51  ;;  %v3802_v17 = vmul.f32 1.442695, %v3797_v8  ;;  %v3745_v8 = vmul.f32 0.5, %v7785_v5 }
0x1382   :  { %6294 = vpow2.f32 %v3798_v28 }
0x1383   :  { %6296 = vpow2.f32 %v3800_v55 }
0x1384   :  { %6298 = vpow2.f32 %v3802_v17 }
0x1386   :  { %v6289_v16 = vpop.eup %6288 }
0x1387   :  { %v3765_v44 = vmul.f32 1.0614054, %v6289_v16 }
0x1389   :  { %v3768_v47 = vadd.f32 -1.4531521, %v3765_v44 }
0x138a   :  { %v6291_v10 = vpop.eup %6290 }
0x138b   :  { %v3771_v42 = vmul.f32 %v6289_v16, %v3768_v47  ;;  %v3766_v34 = vmul.f32 1.0614054, %v6291_v10 }
0x138d   :  { %v3774_v58 = vadd.f32 1.4214138, %v3771_v42  ;;  %v3769_v31 = vadd.f32 -1.4531521, %v3766_v34 }
0x138e   :  { %v6293_v4 = vpop.eup %6292 }
0x138f   :  { %v3777_v57 = vmul.f32 %v6289_v16, %v3774_v58  ;;  %v3772_v38 = vmul.f32 %v6291_v10, %v3769_v31  ;;  %v3767_v39 = vmul.f32 1.0614054, %v6293_v4  ;;  %v6295_v30 = vpop.eup %6294 }
0x1390   :  { %v6297_v15 = vpop.eup %6296 }
0x1391   :  { %v3780_v40 = vadd.f32 -0.28449672, %v3777_v57  ;;  %v3775_v60 = vadd.f32 1.4214138, %v3772_v38  ;;  %v3770_v41 = vadd.f32 -1.4531521, %v3767_v39  ;;  %v6299_v47 = vpop.eup %6298 }
0x1393   :  { %v3783_v13 = vmul.f32 %v6289_v16, %v3780_v40  ;;  %v3778_v32 = vmul.f32 %v6291_v10, %v3775_v60  ;;  %v3773_v63 = vmul.f32 %v6293_v4, %v3770_v41 }
0x1395   :  { %v3786_v29 = vadd.f32 0.2548296, %v3783_v13  ;;  %v3781_v59 = vadd.f32 -0.28449672, %v3778_v32  ;;  %v3776_v0 = vadd.f32 1.4214138, %v3773_v63 }
0x1397   :  { %v3789_v7 = vmul.f32 %v6289_v16, %v3786_v29  ;;  %v3784_v23 = vmul.f32 %v6291_v10, %v3781_v59  ;;  %v3779_v2 = vmul.f32 %v6293_v4, %v3776_v0 }
0x1399   :  { %v3804_v33 = vmul.f32 %v6295_v30, %v3789_v7  ;;  %v3787_v9 = vadd.f32 0.2548296, %v3784_v23  ;;  %v3782_v37 = vadd.f32 -0.28449672, %v3779_v2 }
0x139b   :  { %v3807_v36 = vsub.f32 1.0, %v3804_v33  ;;  %v3790_v14 = vmul.f32 %v6291_v10, %v3787_v9  ;;  %v3785_v18 = vmul.f32 %v6293_v4, %v3782_v37 }
0x139d   :  { %v3813_v51 = vsub.f32 0.0, %v3807_v36  ;;  %v3805_v43 = vmul.f32 %v6297_v15, %v3790_v14  ;;  %v3788_v19 = vadd.f32 0.2548296, %v3785_v18 }
0x139f   :  { %v3816_v44 = vsel %vm3810_vm6, %v3807_v36, %v3813_v51  ;;  %v3808_v28 = vsub.f32 1.0, %v3805_v43  ;;  %v3791_v21 = vmul.f32 %v6293_v4, %v3788_v19  ;;  %v6423_v4 = vld [vmem:[%s8113_s13 + $0x30] sm:$0xff]  ;;  %v6427_v43 = vld [vmem:[%s8114_s15 + $0xf8] sm:$0xff] }
0x13a0   :  { %v3819_v16 = vadd.f32 1.0, %v3816_v44  ;;  %v6435_v19 = vld [vmem:[%s8114_s15 + $0xb8] sm:$0xff]  ;;  %v6436_v44 = vld [vmem:[%s8114_s15 + $0xb0] sm:$0xff] }
0x13a1   :  { %v3814_v42 = vsub.f32 0.0, %v3808_v28  ;;  %v3806_v55 = vmul.f32 %v6299_v47, %v3791_v21  ;;  %v6440_v21 = vld [vmem:[%s8114_s15 + $0x90] sm:$0xff]  ;;  %v6441_v47 = vld [vmem:[%s8114_s15 + $0x88] sm:$0xff] }
0x13a2   :  { %v3822_v34 = vmul.f32 %v3819_v16, %v3744_v20  ;;  %v6438_v20 = vld [vmem:[%s8114_s15 + $0xa0] sm:$0xff]  ;;  %v6439_v16 = vld [vmem:[%s8114_s15 + $0x98] sm:$0xff] }
0x13a3   :  { %v3817_v10 = vsel %vm3811_vm7, %v3808_v28, %v3814_v42  ;;  %v3809_v31 = vsub.f32 1.0, %v3806_v55  ;;  %v6437_v28 = vld [vmem:[%s8114_s15 + $0xa8] sm:$0xff]  ;;  %v6442_v42 = vld [vmem:[%s8114_s15 + $0x80] sm:$0xff] }
0x13a4   :  { %v3820_v58 = vadd.f32 1.0, %v3817_v10  ;;  %6051 = vmatmul.mubr.msk.f32.vlgmr.msra.gmra.mxu1 %vm87_vm0, %v3822_v34  ;;  %v4412_v34 = vld [vmem:[%s8117_s17 + $0x18] sm:$0xff] }
0x13a5   :  { %6053 = vmatprep.mubr.msk.f32.mxu1 %vm6446_vm1, %v6445_v12  ;;  %6084 = vmatpush3.msra.mxu1 %v7773_v22  ;;  %v3815_v6 = vsub.f32 0.0, %v3809_v31  ;;  %v3746_v22 = vmul.f32 0.5, %v7791_v11  ;;  %v6426_v11 = vld [vmem:[%s8110_s12 + $0x1] ss:$0 sm:$0xff] }
0x13a6   :  { %v3823_v45 = vmul.f32 %v3820_v58, %v3745_v8  ;;  %6085 = vmatprep.subr.mxu1 %v6423_v4 }
0x13a7   :  { %6086 = vmatpush3.msra.mxu1 %v6423_v4  ;;  %v3818_v5 = vsel %vm3812_vm9, %v3809_v31, %v3815_v6 }
0x13a8   :  { %6054 = vmatmul.mubr.msk.f32.gmra.mxu1 %vm87_vm0, %v3823_v45  ;;  %6087 = vmatprep.subr.mxu1 %v6424_v25  ;;  %v3821_v57 = vadd.f32 1.0, %v3818_v5 }
0x13a9   :  { %6056 = vmatprep.mubr.msk.f32.mxu1 %vm6446_vm1, %v6445_v12  ;;  %6088 = vmatpush3.msra.mxu1 %v6424_v25 }
0x13aa   :  { %6089 = vmatprep.subr.mxu1 %v6425_v61  ;;  %v3824_v38 = vmul.f32 %v3821_v57, %v3746_v22 }
0x13ab   :  { %6090 = vmatpush3.msra.mxu1 %v6425_v61 }
0x13ac   :  { %6057 = vmatmul.mubr.msk.f32.gmra.mxu1 %vm87_vm0, %v3824_v38  ;;  %6135 = vmatprep.subr.mxu1 %v4412_v34 }
0x1464   :  { %v3900_v39 = vpop.f32.mrf.mxu1 }
0x1465   :  { %v3901_v32 = vadd.f32 %v6426_v11, %v3900_v39  ;;  %v4411_v39 = vld [vmem:[%s8117_s17 + $0x10] sm:$0xff] }
0x1466   :  { %v6052_v17 = vpop.f32.mrf.mxu1 }
0x1467   :  { %v3923_v2 = vadd.f32 0.01, %v3901_v32  ;;  %vm3920_vm11 = vcmp.lt.f32.partialorder %v3901_v32, -0.01  ;;  %v5036_v37 = vadd.f32 -0.01, %v3901_v32 }
0x1468   :  { %v3905_v40 = vpop.f32.mrf.mxu1  ;;  %vm3914_vm13 = vcmp.gt.f32.partialorder %v3901_v32, 0.01 }
0x1469   :  { %v3906_v60 = vadd.f32 %v6426_v11, %v3905_v40  ;;  %v3926_v36 = vsel %vm3920_vm11, %v3923_v2, 0.0  ;;  %v4409_v40 = vld [vmem:[%s8117_s17] sm:$0xff] }
0x146a   :  { %v6055_v41 = vpop.f32.mrf.mxu1  ;;  %v3929_v14 = vsel %vm3914_vm13, %v5036_v37, %v3926_v36 }
0x146b   :  { %v5037_v12 = vadd.f32 -0.01, %v3906_v60  ;;  %vm3921_vm1 = vcmp.lt.f32.partialorder %v3906_v60, -0.01  ;;  %v3924_v13 = vadd.f32 0.01, %v3906_v60 }
0x146c   :  { %v3910_v63 = vpop.f32.mrf.mxu1  ;;  %vm3915_vm10 = vcmp.gt.f32.partialorder %v3906_v60, 0.01 }
0x146d   :  { %v3911_v29 = vadd.f32 %v6426_v11, %v3910_v63  ;;  %v3927_v59 = vsel %vm3921_vm1, %v3924_v13, 0.0 }
0x146e   :  { %v6058_v0 = vpop.f32.mrf.mxu1  ;;  %v3930_v7 = vsel %vm3915_vm10, %v5037_v12, %v3927_v59 }
0x146f   :  { %3937 = vrot.lane.b32.xlu0 %v3930_v7, %s6447_s28  ;;  %v5038_v23 = vadd.f32 -0.01, %v3911_v29  ;;  %vm3922_vm0 = vcmp.lt.f32.partialorder %v3911_v29, -0.01  ;;  %v3925_v30 = vadd.f32 0.01, %v3911_v29 }
0x1470   :  { %vm3916_vm12 = vcmp.gt.f32.partialorder %v3911_v29, 0.01 }
0x1471   :  { %v3928_v33 = vsel %vm3922_vm0, %v3925_v30, 0.0 }
0x1472   :  { %v3931_v9 = vsel %vm3916_vm12, %v5038_v23, %v3928_v33 }
0x1473   :  { %3939 = vrot.lane.b32.xlu1 %v3931_v9, %s6447_s28 }
0x1477   :  { %3935 = vrot.lane.b32.xlu1 %v3929_v14, %s6447_s28 }
0x14e1   :  { %v3938_v18 = vpop.permute.xlu0 %3937 }
0x14e5   :  { %v3940_v15 = vpop.permute.xlu1 %3939 }
0x14e6   :  { %6059 = vmatprep.subr.mxu0 %v3940_v15 }
0x14e7   :  { %6060 = vmatpush3.msra.mxu0 %v3940_v15 }
0x14e8   :  { %6061 = vmatprep.subr.mxu0 %v3938_v18 }
0x14e9   :  { %6062 = vmatpush3.msra.mxu0 %v3938_v18  ;;  %v3936_v51 = vpop.permute.xlu1 %3935 }
0x14ea   :  { %6063 = vmatprep.subr.mxu0 %v3936_v51 }
0x14eb   :  { %6064 = vmatpush3.msra.mxu0 %v3936_v51 }
0x14ec   :  { %6066 = vmatmul.mubr.msk.f32.vlgmr.msra.gmra.mxu0 %vm797_vm8, %v7491_v48  ;;  %6071 = vmatprep.subr.mxu0 %v3931_v9  ;;  %v6428_v48 = vld [vmem:[%s8114_s15 + $0xf0] sm:$0xff] }
0x14ed   :  { %6072 = vmatpush3.msra.mxu0 %v3931_v9  ;;  %6068 = vmatprep.mubr.msk.f32.mxu0 %vm797_vm8, %v7498_v50  ;;  %v6429_v50 = vld [vmem:[%s8114_s15 + $0xe8] sm:$0xff] }
0x14ee   :  { %6073 = vmatprep.subr.mxu0 %v3930_v7 }
0x14ef   :  { %6074 = vmatpush3.msra.mxu0 %v3930_v7 }
0x14f0   :  { %6069 = vmatmul.mubr.msk.f32.gmra.mxu0 %vm797_vm8, %v7505_v56  ;;  %6075 = vmatprep.subr.mxu0 %v3929_v14  ;;  %v6430_v56 = vld [vmem:[%s8114_s15 + $0xe0] sm:$0xff] }
0x14f1   :  { %6076 = vmatpush3.msra.mxu0 %v3929_v14  ;;  %6077 = vmatprep.mubr.msk.f32.mxu0 %vm797_vm8, %v7512_v26  ;;  %v6431_v26 = vld [vmem:[%s8114_s15 + $0xd8] sm:$0xff] }
0x14f2   :  { %6097 = vmatprep.subr.mxu0 %v6427_v43 }
0x14f4   :  { %6078 = vmatmul.mubr.msk.f32.vlgmr.msra.gmra.mxu0 %vm797_vm8, %v7522_v1  ;;  %v6432_v1 = vld [vmem:[%s8114_s15 + $0xd0] sm:$0xff] }
0x14f5   :  { %6080 = vmatprep.mubr.msk.f32.mxu0 %vm797_vm8, %v7529_v62  ;;  %6098 = vmatpush3.msra.mxu0 %v6427_v43  ;;  %v6433_v62 = vld [vmem:[%s8114_s15 + $0xc8] sm:$0xff] }
0x14f6   :  { %6099 = vmatprep.subr.mxu0 %v6428_v48 }
0x14f7   :  { %6100 = vmatpush3.msra.mxu0 %v6428_v48 }
0x14f8   :  { %6081 = vmatmul.mubr.msk.f32.gmra.mxu0 %vm797_vm8, %v7539_v52  ;;  %6101 = vmatprep.subr.mxu0 %v6429_v50  ;;  %v6434_v52 = vld [vmem:[%s8114_s15 + $0xc0] sm:$0xff] }
0x14f9   :  { %6102 = vmatpush3.msra.mxu0 %v6429_v50 }
0x14fa   :  { %6103 = vmatprep.subr.mxu0 %v6430_v56 }
0x14fb   :  { %6104 = vmatpush3.msra.mxu0 %v6430_v56 }
0x14fc   :  { %6105 = vmatprep.subr.mxu0 %v6431_v26 }
0x14fd   :  { %6106 = vmatpush3.msra.mxu0 %v6431_v26 }
0x14fe   :  { %6107 = vmatprep.subr.mxu0 %v6432_v1 }
0x14ff   :  { %6108 = vmatpush3.msra.mxu0 %v6432_v1 }
0x1500   :  { %6109 = vmatprep.subr.mxu0 %v6433_v62 }
0x1501   :  { %6110 = vmatpush3.msra.mxu0 %v6433_v62 }
0x1502   :  { %6111 = vmatprep.subr.mxu0 %v6434_v52 }
0x1503   :  { %6112 = vmatpush3.msra.mxu0 %v6434_v52 }
0x1504   :  { %6113 = vmatprep.subr.mxu0 %v6435_v19 }
0x1505   :  { %6114 = vmatpush3.msra.mxu0 %v6435_v19 }
0x1506   :  { %6115 = vmatprep.subr.mxu0 %v6436_v44 }
0x1507   :  { %6116 = vmatpush3.msra.mxu0 %v6436_v44 }
0x1508   :  { %6117 = vmatprep.subr.mxu0 %v6437_v28 }
0x1509   :  { %6118 = vmatpush3.msra.mxu0 %v6437_v28 }
0x150a   :  { %6119 = vmatprep.subr.mxu0 %v6438_v20 }
0x150b   :  { %6120 = vmatpush3.msra.mxu0 %v6438_v20 }
0x150c   :  { %6121 = vmatprep.subr.mxu0 %v6439_v16 }
0x150d   :  { %6122 = vmatpush3.msra.mxu0 %v6439_v16 }
0x150e   :  { %6123 = vmatprep.subr.mxu0 %v6440_v21 }
0x150f   :  { %6124 = vmatpush3.msra.mxu0 %v6440_v21 }
0x1510   :  { %6125 = vmatprep.subr.mxu0 %v6441_v47 }
0x1511   :  { %6126 = vmatpush3.msra.mxu0 %v6441_v47 }
0x1512   :  { %6127 = vmatprep.subr.mxu0 %v6442_v42 }
0x1513   :  { %6128 = vmatpush3.msra.mxu0 %v6442_v42 }
0x15ac   :  { %v6067_v55 = vpop.f32.mrf.mxu0 }
0x15ae   :  { %v4010_v10 = vpop.f32.mrf.mxu0 }
0x15b0   :  { %v6070_v8 = vpop.f32.mrf.mxu0 }
0x15b2   :  { %v4020_v58 = vpop.f32.mrf.mxu0 }
0x15b4   :  { %v6079_v31 = vpop.f32.mrf.mxu0 }
0x15b5   :  { %v4101_v45 = vadd.f32 %v6079_v31, %v6067_v55 }
0x15b6   :  { %v4095_v6 = vpop.f32.mrf.mxu0 }
0x15b7   :  { %v4096_v4 = vadd.f32 %v4095_v6, %v4010_v10  ;;  %v4115_v22 = vadd.f32 %v4101_v45, %v7657_v49 }
0x15b8   :  { %v6082_v5 = vpop.f32.mrf.mxu0 }
0x15b9   :  { %v4114_v25 = vadd.f32 %v4096_v4, %v7661_v3  ;;  %v4111_v57 = vadd.f32 %v6082_v5, %v6070_v8  ;;  %v4410_v3 = vld [vmem:[%s8117_s17 + $0x8] sm:$0xff] }
0x15ba   :  { %v4105_v61 = vpop.f32.mrf.mxu0 }
0x15bb   :  { %v4106_v38 = vadd.f32 %v4105_v61, %v4020_v58  ;;  %6091 = vmatprep.mubr.msk.f32.mxu1 %vm207_vm2, %v4114_v25  ;;  %v4117_v49 = vadd.f32 %v4111_v57, %v7651_v35  ;;  %v5059_v35 = vld [vmem:[%s8117_s17 + $0x38] sm:$0xff] }
0x15bc   :  { %6092 = vmatmul.mubr.msk.f32.vlgmr.msra.gmra.mxu1 %vm207_vm2, %v4115_v22 }
0x15bd   :  { %v4116_v17 = vadd.f32 %v4106_v38, %v7653_v24  ;;  %6136 = vmatpush3.msra.mxu1 %v4412_v34 }
0x15be   :  { %6137 = vmatprep.subr.mxu1 %v4411_v39 }
0x15bf   :  { %6094 = vmatprep.mubr.msk.f32.mxu1 %vm207_vm2, %v4116_v17  ;;  %6138 = vmatpush3.msra.mxu1 %v4411_v39 }
0x15c0   :  { %6095 = vmatmul.mubr.msk.f32.gmra.mxu1 %vm207_vm2, %v4117_v49  ;;  %6139 = vmatprep.subr.mxu1 %v4410_v3 }
0x15c1   :  { %6140 = vmatpush3.msra.mxu1 %v4410_v3  ;;  %6143 = vmatprep.mubr.msk.f32.mxu1 %vm207_vm2, %v7308_v27  ;;  %v6443_v27 = vld [vmem:[%s8115_s14 + $0x1] ss:$0 sm:$0xff] }
0x15c2   :  { %6141 = vmatprep.subr.mxu1 %v4409_v40 }
0x15c3   :  { %6142 = vmatpush3.msra.mxu1 %v4409_v40 }
0x15c4   :  { %6144 = vmatmul.mubr.msk.f32.vlgmr.msra.gmra.mxu1 %vm207_vm2, %v7304_v54  ;;  %6149 = vmatprep.subr.mxu1 %v5059_v35 }
0x15c5   :  { %6146 = vmatprep.mubr.msk.f32.mxu1 %vm207_vm2, %v7300_v53  ;;  %6150 = vmatpush3.msra.mxu1 %v5059_v35 }
0x15c8   :  { %6147 = vmatmul.mubr.msk.f32.gmra.mxu1 %vm207_vm2, %v7298_v46 }
0x167c   :  { %v6093_v24 = vpop.f32.mrf.mxu1 }
0x167d   :  { %v7922_v11 = vadd.f32 %v6443_v27, %v6093_v24 }
0x167e   :  { %v4196_v54 = vpop.f32.mrf.mxu1 }
0x167f   :  { %v7925_v60 = vmul.f32 0.70710677, %v7922_v11  ;;  %v7927_v53 = vadd.f32 %v6443_v27, %v4196_v54 }
0x1680   :  { %v6096_v46 = vpop.f32.mrf.mxu1 }
0x1681   :  { %v4224_v41 = vand.u32 2147483647, %v7925_v60  ;;  %v7931_v12 = vmul.f32 0.70710677, %v7927_v53  ;;  %v7933_v13 = vadd.f32 %v6443_v27, %v6096_v46  ;;  %vm4304_vm8 = vcmp.ge.f32.partialorder %v7925_v60, 0.0 }
0x1682   :  { %v4206_v32 = vpop.f32.mrf.mxu1  ;;  %v4216_v60 = vmul.f32 0.5, %v7922_v11  ;;  %v5058_v11 = vld [vmem:[%s8117_s17 + $0x30] sm:$0xff] }
0x1683   :  { %v4228_v63 = vmul.f32 0.3275911, %v4224_v41  ;;  %v4223_v29 = vand.u32 2147483647, %v7931_v12  ;;  %v7937_v59 = vmul.f32 0.70710677, %v7933_v13  ;;  %v7939_v0 = vadd.f32 %v6443_v27, %v4206_v32  ;;  %6151 = vmatprep.subr.mxu1 %v5058_v11 }
0x1684   :  { %v4280_v18 = vsub.f32 0.0, %v4224_v41  ;;  %vm4303_vm14 = vcmp.ge.f32.partialorder %v7931_v12, 0.0  ;;  %6152 = vmatpush3.msra.mxu1 %v5058_v11 }
0x1685   :  { %v4232_v7 = vadd.f32 1.0, %v4228_v63  ;;  %v4227_v23 = vmul.f32 0.3275911, %v4223_v29  ;;  %v4226_v30 = vand.u32 2147483647, %v7937_v59  ;;  %v4279_v51 = vsub.f32 0.0, %v4223_v29 }
0x1686   :  { %v7943_v2 = vmul.f32 0.70710677, %v7939_v0  ;;  %v4284_v43 = vmul.f32 %v4280_v18, %v4224_v41  ;;  %vm4306_vm15 = vcmp.ge.f32.partialorder %v7937_v59, 0.0 }
0x1687   :  { %6300 = vrcp.f32 %v4232_v7  ;;  %v4231_v33 = vadd.f32 1.0, %v4227_v23  ;;  %v4230_v9 = vmul.f32 0.3275911, %v4226_v30  ;;  %v4282_v48 = vsub.f32 0.0, %v4226_v30 }
0x1688   :  { %v4225_v37 = vand.u32 2147483647, %v7943_v2  ;;  %v4283_v56 = vmul.f32 %v4279_v51, %v4223_v29  ;;  %v4289_v1 = vmul.f32 1.442695, %v4284_v43  ;;  %vm4305_vm3 = vcmp.ge.f32.partialorder %v7943_v2, 0.0  ;;  %v5057_v2 = vld [vmem:[%s8117_s17 + $0x28] sm:$0xff] }
0x1689   :  { %6302 = vrcp.f32 %v4231_v33  ;;  %v4234_v36 = vadd.f32 1.0, %v4230_v9  ;;  %v4286_v52 = vmul.f32 %v4282_v48, %v4226_v30  ;;  %6153 = vmatprep.subr.mxu1 %v5057_v2 }
0x168a   :  { %v4229_v14 = vmul.f32 0.3275911, %v4225_v37  ;;  %v4281_v62 = vsub.f32 0.0, %v4225_v37  ;;  %v4287_v28 = vmul.f32 1.442695, %v4283_v56  ;;  %6154 = vmatpush3.msra.mxu1 %v5057_v2 }
0x168b   :  { %6304 = vrcp.f32 %v4234_v36  ;;  %v4293_v42 = vmul.f32 1.442695, %v4286_v52 }
0x168c   :  { %v4233_v15 = vadd.f32 1.0, %v4229_v14  ;;  %v4285_v47 = vmul.f32 %v4281_v62, %v4225_v37 }
0x168e   :  { %6306 = vrcp.f32 %v4233_v15  ;;  %v4291_v6 = vmul.f32 1.442695, %v4285_v47 }
0x168f   :  { %6308 = vpow2.f32 %v4289_v1 }
0x1690   :  { %6310 = vpow2.f32 %v4287_v28 }
0x1691   :  { %6312 = vpow2.f32 %v4293_v42 }
0x1692   :  { %6314 = vpow2.f32 %v4291_v6  ;;  %v6444_v6 = vld [vmem:[%s8116_s16 + $0x1] ss:$0 sm:$0xff] }
0x1694   :  { %v6301_v50 = vpop.eup %6300 }
0x1695   :  { %v4244_v26 = vmul.f32 1.0614054, %v6301_v50 }
0x1696   :  { %v6303_v19 = vpop.eup %6302 }
0x1697   :  { %v4248_v44 = vadd.f32 -1.4531521, %v4244_v26  ;;  %v4243_v20 = vmul.f32 1.0614054, %v6303_v19 }
0x1698   :  { %v6305_v16 = vpop.eup %6304 }
0x1699   :  { %v4252_v21 = vmul.f32 %v6301_v50, %v4248_v44  ;;  %v4247_v34 = vadd.f32 -1.4531521, %v4243_v20  ;;  %v4246_v55 = vmul.f32 1.0614054, %v6305_v16  ;;  %v4215_v20 = vmul.f32 0.5, %v7927_v53 }
0x169a   :  { %v4218_v53 = vmul.f32 0.5, %v7933_v13  ;;  %v5056_v13 = vld [vmem:[%s8117_s17 + $0x20] sm:$0xff] }
0x169b   :  { %v4256_v10 = vadd.f32 1.4214138, %v4252_v21  ;;  %v6307_v8 = vpop.eup %6306  ;;  %v4251_v58 = vmul.f32 %v6303_v19, %v4247_v34  ;;  %v4250_v31 = vadd.f32 -1.4531521, %v4246_v55  ;;  %6155 = vmatprep.subr.mxu1 %v5056_v13 }
0x169c   :  { %v4245_v4 = vmul.f32 1.0614054, %v6307_v8  ;;  %v6309_v41 = vpop.eup %6308  ;;  %6156 = vmatpush3.msra.mxu1 %v5056_v13 }
0x169d   :  { %v4260_v45 = vmul.f32 %v6301_v50, %v4256_v10  ;;  %v4255_v5 = vadd.f32 1.4214138, %v4251_v58  ;;  %v4254_v25 = vmul.f32 %v6305_v16, %v4250_v31  ;;  %v6311_v33 = vpop.eup %6310 }
0x169e   :  { %v4249_v57 = vadd.f32 -1.4531521, %v4245_v4  ;;  %v6313_v15 = vpop.eup %6312 }
0x169f   :  { %v4264_v22 = vadd.f32 -0.28449672, %v4260_v45  ;;  %v4259_v61 = vmul.f32 %v6303_v19, %v4255_v5  ;;  %v4258_v38 = vadd.f32 1.4214138, %v4254_v25  ;;  %v6315_v26 = vpop.eup %6314 }
0x16a0   :  { %v4253_v17 = vmul.f32 %v6307_v8, %v4249_v57 }
0x16a1   :  { %v4268_v39 = vmul.f32 %v6301_v50, %v4264_v22  ;;  %v4263_v3 = vadd.f32 -0.28449672, %v4259_v61  ;;  %v4262_v49 = vmul.f32 %v6305_v16, %v4258_v38  ;;  %v4749_v38 = vld [vmem:[%s8118_s19 + $0x78] sm:$0xff] }
0x16a2   :  { %v4257_v35 = vadd.f32 1.4214138, %v4253_v17  ;;  %6163 = vmatprep.subr.mxu1 %v4749_v38  ;;  %v4747_v17 = vld [vmem:[%s8118_s19 + $0x68] sm:$0xff] }
0x16a3   :  { %v4272_v40 = vadd.f32 0.2548296, %v4268_v39  ;;  %v4267_v24 = vmul.f32 %v6303_v19, %v4263_v3  ;;  %v4266_v27 = vadd.f32 -0.28449672, %v4262_v49  ;;  %v4748_v39 = vld [vmem:[%s8118_s19 + $0x70] sm:$0xff]  ;;  %v4746_v3 = vld [vmem:[%s8118_s19 + $0x60] sm:$0xff] }
0x16a4   :  { %v4261_v46 = vmul.f32 %v6307_v8, %v4257_v35  ;;  %v4745_v49 = vld [vmem:[%s8118_s19 + $0x58] sm:$0xff]  ;;  %v4743_v35 = vld [vmem:[%s8118_s19 + $0x48] sm:$0xff] }
0x16a5   :  { %v4276_v54 = vmul.f32 %v6301_v50, %v4272_v40  ;;  %v4271_v32 = vadd.f32 0.2548296, %v4267_v24  ;;  %v4270_v63 = vmul.f32 %v6305_v16, %v4266_v27  ;;  %v4744_v40 = vld [vmem:[%s8118_s19 + $0x50] sm:$0xff]  ;;  %v4742_v24 = vld [vmem:[%s8118_s19 + $0x40] sm:$0xff]  ;;  %v4741_v27 = vld [vmem:[%s8118_s19 + $0x38] sm:$0xff] }
0x16a6   :  { %v4265_v7 = vadd.f32 -0.28449672, %v4261_v46  ;;  %v4739_v46 = vld [vmem:[%s8118_s19 + $0x28] sm:$0xff] }
0x16a7   :  { %v4296_v29 = vmul.f32 %v6309_v41, %v4276_v54  ;;  %v4275_v23 = vmul.f32 %v6303_v19, %v4271_v32  ;;  %v4274_v30 = vadd.f32 0.2548296, %v4270_v63  ;;  %v4740_v54 = vld [vmem:[%s8118_s19 + $0x30] sm:$0xff]  ;;  %v4738_v41 = vld [vmem:[%s8118_s19 + $0x20] sm:$0xff]  ;;  %v4737_v32 = vld [vmem:[%s8118_s19 + $0x18] sm:$0xff] }
0x16a8   :  { %v4269_v37 = vmul.f32 %v6307_v8, %v4265_v7  ;;  %v4736_v63 = vld [vmem:[%s8118_s19 + $0x10] sm:$0xff]  ;;  %v4734_v7 = vld [vmem:[%s8118_s19] sm:$0xff] }
0x16a9   :  { %v4300_v9 = vsub.f32 1.0, %v4296_v29  ;;  %v4295_v36 = vmul.f32 %v6311_v33, %v4275_v23  ;;  %v4278_v14 = vmul.f32 %v6305_v16, %v4274_v30  ;;  %v4735_v29 = vld [vmem:[%s8118_s19 + $0x8] sm:$0xff]  ;;  %v6145_v23 = vpop.f32.mrf.mxu1 }
0x16aa   :  { %v4273_v51 = vadd.f32 0.2548296, %v4269_v37 }
0x16ab   :  { %v4308_v18 = vsub.f32 0.0, %v4300_v9  ;;  %v4299_v43 = vsub.f32 1.0, %v4295_v36  ;;  %v4298_v48 = vmul.f32 %v6313_v15, %v4278_v14  ;;  %v4491_v30 = vpop.f32.mrf.mxu1 }
0x16ac   :  { %v4277_v56 = vmul.f32 %v6307_v8, %v4273_v51  ;;  %v4217_v8 = vmul.f32 0.5, %v7939_v0 }
0x16ad   :  { %v4312_v50 = vsel %vm4304_vm8, %v4300_v9, %v4308_v18  ;;  %v4307_v1 = vsub.f32 0.0, %v4299_v43  ;;  %v4302_v62 = vsub.f32 1.0, %v4298_v48  ;;  %v6148_v33 = vpop.f32.mrf.mxu1  ;;  %v5055_v9 = vld [vmem:[%s8119_s18] ss:$0 sm:$0xff] }
0x16ae   :  { %v4297_v52 = vmul.f32 %v6315_v26, %v4277_v56  ;;  %v4316_v19 = vadd.f32 1.0, %v4312_v50  ;;  %v4517_v36 = vadd.f32 %v6145_v23, %v5055_v9  ;;  %v4516_v15 = vadd.f32 %v5055_v9, %v4491_v30 }
0x16af   :  { %v4311_v44 = vsel %vm4303_vm14, %v4299_v43, %v4307_v1  ;;  %v4310_v28 = vsub.f32 0.0, %v4302_v62  ;;  %v4501_v37 = vpop.f32.mrf.mxu1  ;;  %v4519_v50 = vadd.f32 %v6148_v33, %v5055_v9 }
0x16b0   :  { %v4315_v16 = vadd.f32 1.0, %v4311_v44  ;;  %v4301_v21 = vsub.f32 1.0, %v4297_v52  ;;  %v4320_v55 = vmul.f32 %v4316_v19, %v4216_v60 }
0x16b1   :  { %v4314_v47 = vsel %vm4306_vm15, %v4302_v62, %v4310_v28  ;;  %v4518_v62 = vadd.f32 %v5055_v9, %v4501_v37 }
0x16b2   :  { %v4319_v42 = vmul.f32 %v4315_v16, %v4215_v20  ;;  %v4309_v34 = vsub.f32 0.0, %v4301_v21  ;;  %v4318_v10 = vadd.f32 1.0, %v4314_v47 }
0x16b4   :  { %6129 = vmatprep.mubr.f32.mxu0 %v4319_v42  ;;  %v4313_v12 = vsel %vm4305_vm3, %v4301_v21, %v4309_v34  ;;  %v4322_v31 = vmul.f32 %v4318_v10, %v4218_v53 }
0x16b5   :  { %6130 = vmatmul.mubr.f32.vlgmr.msra.gmra.mxu0 %v4320_v55  ;;  %v4317_v58 = vadd.f32 1.0, %v4313_v12 }
0x16b7   :  { %v4321_v59 = vmul.f32 %v4317_v58, %v4217_v8 }
0x16b9   :  { %6132 = vmatprep.mubr.f32.mxu0 %v4321_v59 }
0x16ba   :  { %6133 = vmatmul.mubr.f32.gmra.mxu0 %v4322_v31 }
0x1775   :  { %v6131_v0 = vpop.f32.mrf.mxu0 }
0x1776   :  { %v4395_v5 = vadd.f32 %v6444_v6, %v6131_v0 }
0x1777   :  { %v4389_v45 = vpop.f32.mrf.mxu0 }
0x1778   :  { %v4390_v4 = vadd.f32 %v6444_v6, %v4389_v45 }
0x177a   :  { %v6134_v25 = vpop.f32.mrf.mxu0  ;;  %6157 = vmatprep.mubr.msk.f32.mxu1 %vm207_vm2, %v4390_v4 }
0x177b   :  { %6158 = vmatmul.mubr.msk.f32.vlgmr.msra.gmra.mxu1 %vm207_vm2, %v4395_v5  ;;  %v4405_v61 = vadd.f32 %v6444_v6, %v6134_v25 }
0x177c   :  { %v4399_v22 = vpop.f32.mrf.mxu0  ;;  %6164 = vmatpush3.msra.mxu1 %v4749_v38 }
0x177d   :  { %v4400_v57 = vadd.f32 %v6444_v6, %v4399_v22  ;;  %6165 = vmatprep.subr.mxu1 %v4748_v39 }
0x177e   :  { %6166 = vmatpush3.msra.mxu1 %v4748_v39 }
0x177f   :  { %6160 = vmatprep.mubr.msk.f32.mxu1 %vm207_vm2, %v4400_v57  ;;  %6167 = vmatprep.subr.mxu1 %v4747_v17 }
0x1780   :  { %6161 = vmatmul.mubr.msk.f32.gmra.mxu1 %vm207_vm2, %v4405_v61 }
0x1781   :  { %6168 = vmatpush3.msra.mxu1 %v4747_v17 }
0x1782   :  { %6169 = vmatprep.subr.mxu1 %v4746_v3 }
0x1783   :  { %6170 = vmatpush3.msra.mxu1 %v4746_v3 }
0x1784   :  { %6171 = vmatprep.subr.mxu1 %v4745_v49 }
0x1785   :  { %6172 = vmatpush3.msra.mxu1 %v4745_v49 }
0x1786   :  { %6173 = vmatprep.subr.mxu1 %v4744_v40 }
0x1787   :  { %6174 = vmatpush3.msra.mxu1 %v4744_v40 }
0x1788   :  { %6175 = vmatprep.subr.mxu1 %v4743_v35 }
0x1789   :  { %6176 = vmatpush3.msra.mxu1 %v4743_v35 }
0x178a   :  { %6177 = vmatprep.subr.mxu1 %v4742_v24 }
0x178b   :  { %6178 = vmatpush3.msra.mxu1 %v4742_v24 }
0x178c   :  { %6179 = vmatprep.subr.mxu1 %v4741_v27 }
0x178d   :  { %6180 = vmatpush3.msra.mxu1 %v4741_v27 }
0x178e   :  { %6181 = vmatprep.subr.mxu1 %v4740_v54 }
0x178f   :  { %6182 = vmatpush3.msra.mxu1 %v4740_v54 }
0x1790   :  { %6183 = vmatprep.subr.mxu1 %v4739_v46 }
0x1791   :  { %6184 = vmatpush3.msra.mxu1 %v4739_v46 }
0x1792   :  { %6185 = vmatprep.subr.mxu1 %v4738_v41 }
0x1793   :  { %6186 = vmatpush3.msra.mxu1 %v4738_v41 }
0x1794   :  { %6187 = vmatprep.subr.mxu1 %v4737_v32 }
0x1795   :  { %6188 = vmatpush3.msra.mxu1 %v4737_v32 }
0x1796   :  { %6189 = vmatprep.subr.mxu1 %v4736_v63 }
0x1797   :  { %6190 = vmatpush3.msra.mxu1 %v4736_v63 }
0x1798   :  { %6191 = vmatprep.subr.mxu1 %v4735_v29 }
0x1799   :  { %6192 = vmatpush3.msra.mxu1 %v4735_v29 }
0x179a   :  { %6193 = vmatprep.subr.mxu1 %v4734_v7 }
0x179b   :  { %6194 = vmatpush3.msra.mxu1 %v4734_v7 }
0x183b   :  { %v6159_v14 = vpop.f32.mrf.mxu1 }
0x183c   :  { %v8021_v18 = vadd.f32 %v6159_v14, %v4517_v36 }
0x183d   :  { %v4603_v51 = vpop.f32.mrf.mxu1 }
0x183e   :  { %v8024_v43 = vmul.f32 0.70710677, %v8021_v18  ;;  %v8026_v48 = vadd.f32 %v4603_v51, %v4516_v15 }
0x1840   :  { %v4635_v56 = vand.u32 2147483647, %v8024_v43  ;;  %v8030_v26 = vmul.f32 0.70710677, %v8026_v48  ;;  %v6162_v1 = vpop.f32.mrf.mxu1  ;;  %vm4715_vm4 = vcmp.ge.f32.partialorder %v8024_v43, 0.0  ;;  %v4627_v43 = vmul.f32 0.5, %v8021_v18 }
0x1841   :  { %v8032_v52 = vadd.f32 %v6162_v1, %v4519_v50  ;;  %v5064_v18 = vld [vmem:[%s8120_s20] ss:$0 sm:$0xff] }
0x1842   :  { %v4639_v19 = vmul.f32 0.3275911, %v4635_v56  ;;  %v4634_v44 = vand.u32 2147483647, %v8030_v26  ;;  %v4613_v28 = vpop.f32.mrf.mxu1  ;;  %v4691_v53 = vsub.f32 0.0, %v4635_v56  ;;  %vm4714_vm5 = vcmp.ge.f32.partialorder %v8030_v26, 0.0 }
0x1843   :  { %v8036_v20 = vmul.f32 0.70710677, %v8032_v52  ;;  %v8038_v16 = vadd.f32 %v4613_v28, %v4518_v62 }
0x1844   :  { %v4643_v21 = vadd.f32 1.0, %v4639_v19  ;;  %v4638_v60 = vmul.f32 0.3275911, %v4634_v44  ;;  %v4690_v59 = vsub.f32 0.0, %v4634_v44  ;;  %v4695_v31 = vmul.f32 %v4691_v53, %v4635_v56 }
0x1845   :  { %v4637_v47 = vand.u32 2147483647, %v8036_v20  ;;  %v8042_v42 = vmul.f32 0.70710677, %v8038_v16  ;;  %vm4717_vm6 = vcmp.ge.f32.partialorder %v8036_v20, 0.0 }
0x1846   :  { %6316 = vrcp.f32 %v4643_v21  ;;  %v4642_v34 = vadd.f32 1.0, %v4638_v60  ;;  %v4694_v13 = vmul.f32 %v4690_v59, %v4634_v44  ;;  %v4700_v45 = vmul.f32 1.442695, %v4695_v31 }
0x1847   :  { %v4641_v55 = vmul.f32 0.3275911, %v4637_v47  ;;  %v4636_v12 = vand.u32 2147483647, %v8042_v42  ;;  %v4693_v11 = vsub.f32 0.0, %v4637_v47  ;;  %vm4716_vm7 = vcmp.ge.f32.partialorder %v8042_v42, 0.0 }
0x1848   :  { %6318 = vrcp.f32 %v4642_v34  ;;  %v4698_v22 = vmul.f32 1.442695, %v4694_v13 }
0x1849   :  { %v4645_v10 = vadd.f32 1.0, %v4641_v55  ;;  %v4640_v8 = vmul.f32 0.3275911, %v4636_v12  ;;  %v4692_v6 = vsub.f32 0.0, %v4636_v12  ;;  %v4697_v4 = vmul.f32 %v4693_v11, %v4637_v47 }
0x184b   :  { %6320 = vrcp.f32 %v4645_v10  ;;  %v4644_v58 = vadd.f32 1.0, %v4640_v8  ;;  %v4696_v39 = vmul.f32 %v4692_v6, %v4636_v12  ;;  %v4704_v3 = vmul.f32 1.442695, %v4697_v4 }
0x184d   :  { %6322 = vrcp.f32 %v4644_v58  ;;  %v4702_v46 = vmul.f32 1.442695, %v4696_v39 }
0x184e   :  { %6324 = vpow2.f32 %v4700_v45 }
0x184f   :  { %6326 = vpow2.f32 %v4698_v22 }
0x1850   :  { %6328 = vpow2.f32 %v4704_v3 }
0x1851   :  { %6330 = vpow2.f32 %v4702_v46 }
0x1853   :  { %v6317_v2 = vpop.eup %6316 }
0x1854   :  { %v4655_v0 = vmul.f32 1.0614054, %v6317_v2 }
0x1855   :  { %v6319_v5 = vpop.eup %6318 }
0x1856   :  { %v4659_v25 = vadd.f32 -1.4531521, %v4655_v0  ;;  %v4654_v57 = vmul.f32 1.0614054, %v6319_v5 }
0x1858   :  { %v6321_v61 = vpop.eup %6320  ;;  %v4663_v38 = vmul.f32 %v6317_v2, %v4659_v25  ;;  %v4658_v49 = vadd.f32 -1.4531521, %v4654_v57  ;;  %v4626_v57 = vmul.f32 0.5, %v8026_v48  ;;  %v4629_v48 = vmul.f32 0.5, %v8032_v52 }
0x1859   :  { %v4657_v17 = vmul.f32 1.0614054, %v6321_v61 }
0x185a   :  { %v4667_v40 = vadd.f32 1.4214138, %v4663_v38  ;;  %v6323_v35 = vpop.eup %6322  ;;  %v4662_v27 = vmul.f32 %v6319_v5, %v4658_v49 }
0x185b   :  { %v4661_v24 = vadd.f32 -1.4531521, %v4657_v17  ;;  %v4656_v41 = vmul.f32 1.0614054, %v6323_v35  ;;  %v6325_v62 = vpop.eup %6324 }
0x185c   :  { %v4671_v54 = vmul.f32 %v6317_v2, %v4667_v40  ;;  %v4666_v63 = vadd.f32 1.4214138, %v4662_v27  ;;  %v6327_v34 = vpop.eup %6326 }
0x185d   :  { %v4665_v32 = vmul.f32 %v6321_v61, %v4661_v24  ;;  %v4660_v7 = vadd.f32 -1.4531521, %v4656_v41  ;;  %v6329_v58 = vpop.eup %6328 }
0x185e   :  { %v4675_v29 = vadd.f32 -0.28449672, %v4671_v54  ;;  %v4670_v30 = vmul.f32 %v6319_v5, %v4666_v63  ;;  %v6331_v0 = vpop.eup %6330 }
0x185f   :  { %v4669_v23 = vadd.f32 1.4214138, %v4665_v32  ;;  %v4664_v9 = vmul.f32 %v6323_v35, %v4660_v7 }
0x1860   :  { %v4679_v33 = vmul.f32 %v6317_v2, %v4675_v29  ;;  %v4674_v36 = vadd.f32 -0.28449672, %v4670_v30 }
0x1861   :  { %v4673_v37 = vmul.f32 %v6321_v61, %v4669_v23  ;;  %v4668_v15 = vadd.f32 1.4214138, %v4664_v9 }
0x1862   :  { %v4683_v14 = vadd.f32 0.2548296, %v4679_v33  ;;  %v4678_v50 = vmul.f32 %v6319_v5, %v4674_v36 }
0x1863   :  { %v4677_v51 = vadd.f32 -0.28449672, %v4673_v37  ;;  %v4672_v1 = vmul.f32 %v6323_v35, %v4668_v15 }
0x1864   :  { %v4687_v56 = vmul.f32 %v6317_v2, %v4683_v14  ;;  %v4682_v44 = vadd.f32 0.2548296, %v4678_v50 }
0x1865   :  { %v4681_v19 = vmul.f32 %v6321_v61, %v4677_v51  ;;  %v4676_v21 = vadd.f32 -0.28449672, %v4672_v1 }
0x1866   :  { %v4707_v28 = vmul.f32 %v6325_v62, %v4687_v56  ;;  %v4686_v47 = vmul.f32 %v6319_v5, %v4682_v44 }
0x1867   :  { %v4685_v60 = vadd.f32 0.2548296, %v4681_v19  ;;  %v4680_v12 = vmul.f32 %v6323_v35, %v4676_v21 }
0x1868   :  { %v4711_v55 = vsub.f32 1.0, %v4707_v28  ;;  %v4706_v8 = vmul.f32 %v6327_v34, %v4686_v47 }
0x1869   :  { %v4689_v10 = vmul.f32 %v6321_v61, %v4685_v60  ;;  %v4684_v59 = vadd.f32 0.2548296, %v4680_v12 }
0x186a   :  { %v4719_v53 = vsub.f32 0.0, %v4711_v55  ;;  %v4710_v11 = vsub.f32 1.0, %v4706_v8 }
0x186b   :  { %v4709_v31 = vmul.f32 %v6329_v58, %v4689_v10  ;;  %v4688_v13 = vmul.f32 %v6323_v35, %v4684_v59  ;;  %v4628_v35 = vmul.f32 0.5, %v8038_v16 }
0x186c   :  { %v4723_v2 = vsel %vm4715_vm4, %v4711_v55, %v4719_v53  ;;  %v4718_v6 = vsub.f32 0.0, %v4710_v11 }
0x186d   :  { %v4713_v45 = vsub.f32 1.0, %v4709_v31  ;;  %v4708_v4 = vmul.f32 %v6331_v0, %v4688_v13  ;;  %v4727_v5 = vadd.f32 1.0, %v4723_v2 }
0x186e   :  { %v4722_v22 = vsel %vm4714_vm5, %v4710_v11, %v4718_v6 }
0x186f   :  { %v4721_v25 = vsub.f32 0.0, %v4713_v45  ;;  %v4726_v61 = vadd.f32 1.0, %v4722_v22  ;;  %v4712_v38 = vsub.f32 1.0, %v4708_v4  ;;  %v4731_v49 = vmul.f32 %v4727_v5, %v4627_v43 }
0x1871   :  { %v4725_v39 = vsel %vm4717_vm6, %v4713_v45, %v4721_v25  ;;  %v4730_v17 = vmul.f32 %v4726_v61, %v4626_v57  ;;  %v4720_v3 = vsub.f32 0.0, %v4712_v38 }
0x1872   :  { %v4729_v40 = vadd.f32 1.0, %v4725_v39 }
0x1873   :  { %6195 = vmatprep.mubr.f32.mxu1 %v4730_v17  ;;  %v4724_v26 = vsel %vm4716_vm7, %v4712_v38, %v4720_v3 }
0x1874   :  { %6196 = vmatmul.mubr.f32.vlgmr.msra.gmra.mxu1 %v4731_v49  ;;  %v4728_v24 = vadd.f32 1.0, %v4724_v26  ;;  %v4733_v27 = vmul.f32 %v4729_v40, %v4629_v48 }
0x1876   :  { %v4732_v20 = vmul.f32 %v4728_v24, %v4628_v35 }
0x1878   :  { %6198 = vmatprep.mubr.f32.mxu1 %v4732_v20 }
0x1879   :  { %6199 = vmatmul.mubr.f32.gmra.mxu1 %v4733_v27 }
0x1934   :  { %v6197_v54 = vpop.f32.mrf.mxu1 }
0x1935   :  { %v4829_v46 = vadd.f32 %v6197_v54, %v5064_v18 }
0x1936   :  { %v4823_v42 = vpop.f32.mrf.mxu1 }
0x1937   :  { %v4843_v41 = vsub.f32 0.0, %v4829_v46  ;;  %v4824_v32 = vadd.f32 %v5064_v18, %v4823_v42 }
0x1939   :  { %v4848_v63 = vmul.f32 1.442695, %v4843_v41  ;;  %v4842_v29 = vsub.f32 0.0, %v4824_v32  ;;  %v6200_v16 = vpop.f32.mrf.mxu1 }
0x193a   :  { %v4839_v7 = vadd.f32 %v6200_v16, %v5064_v18 }
0x193b   :  { %6332 = vpow2.f32 %v4848_v63  ;;  %v4846_v23 = vmul.f32 1.442695, %v4842_v29  ;;  %v4833_v52 = vpop.f32.mrf.mxu1 }
0x193c   :  { %v4845_v30 = vsub.f32 0.0, %v4839_v7  ;;  %v4834_v33 = vadd.f32 %v5064_v18, %v4833_v52 }
0x193d   :  { %6334 = vpow2.f32 %v4846_v23 }
0x193e   :  { %v4852_v9 = vmul.f32 1.442695, %v4845_v30  ;;  %v4844_v37 = vsub.f32 0.0, %v4834_v33 }
0x1940   :  { %6336 = vpow2.f32 %v4852_v9  ;;  %v4850_v36 = vmul.f32 1.442695, %v4844_v37 }
0x1942   :  { %6338 = vpow2.f32 %v4850_v36 }
0x1948   :  { %v6333_v14 = vpop.eup %6332 }
0x1949   :  { %v4855_v15 = vadd.f32 1.0, %v6333_v14 }
0x194a   :  { %v6335_v51 = vpop.eup %6334 }
0x194b   :  { %4859 = vst.msk [vmem:[%s8121_s21 + $0x8] sm:$0xff] %vm207_vm2, %v4855_v15  ;;  %v4854_v50 = vadd.f32 1.0, %v6335_v51 }
0x194d   :  { %v6337_v56 = vpop.eup %6336  ;;  %4858 = vst.msk [vmem:[%s8121_s21] sm:$0xff] %vm207_vm2, %v4854_v50 }
0x194e   :  { %v4857_v1 = vadd.f32 1.0, %v6337_v56 }
0x194f   :  { %v6339_v62 = vpop.eup %6338 }
0x1950   :  { %4861 = vst.msk [vmem:[%s8121_s21 + $0x18] sm:$0xff] %vm207_vm2, %v4857_v1  ;;  %v4856_v19 = vadd.f32 1.0, %v6339_v62 }
0x1952   :  { %v4863_v44 = vld [vmem:[%s8121_s21 + $0x8] sm:$0xff]  ;;  %4860 = vst.msk [vmem:[%s8121_s21 + $0x10] sm:$0xff] %vm207_vm2, %v4856_v19 }
0x1953   :  { %6340 = vrcp.f32 %v4863_v44 }
0x1954   :  { %v4862_v28 = vld [vmem:[%s8121_s21] sm:$0xff] }
0x1955   :  { %6342 = vrcp.f32 %v4862_v28 }
0x1957   :  { %v4865_v21 = vld [vmem:[%s8121_s21 + $0x18] sm:$0xff] }
0x1958   :  { %6344 = vrcp.f32 %v4865_v21 }
0x1959   :  { %v4864_v60 = vld [vmem:[%s8121_s21 + $0x10] sm:$0xff] }
0x195a   :  { %6346 = vrcp.f32 %v4864_v60 }
0x1960   :  { %v6341_v47 = vpop.eup %6340 }
0x1961   :  { %4871 = vst.msk [vmem:[%s8121_s21 + $0x8] sm:$0xff] %vm207_vm2, %v6341_v47 }
0x1962   :  { %v6343_v34 = vpop.eup %6342 }
0x1963   :  { %4870 = vst.msk [vmem:[%s8121_s21] sm:$0xff] %vm207_vm2, %v6343_v34 }
0x1965   :  { %v6345_v55 = vpop.eup %6344 }
0x1966   :  { %4873 = vst.msk [vmem:[%s8121_s21 + $0x18] sm:$0xff] %vm207_vm2, %v6345_v55 }
0x1967   :  { %v6347_v12 = vpop.eup %6346 }
0x1968   :  { %4872 = vst.msk [vmem:[%s8121_s21 + $0x10] sm:$0xff] %vm207_vm2, %v6347_v12 }

</bundles_post_ra>
